<compile_context>
chip_gen: v7x
topology: tpu7x:2x2x1
jax: 0.10.0
libtpu: 0.0.40
codegen_flags: <defaults>
</compile_context>

<pallas_src>
import jax
import jax.numpy as jnp
from jax.experimental import pallas as pl
from jax.experimental.pallas import tpu as pltpu

# ---------------- model hyper-parameters (small, consistent with the module) --
B = 2            # batch
T = 8            # input_time
C = 4            # input_channel
X = 16           # input_x
Y = 16           # input_y
K = 5            # Tconv1_kernel_size
CONV_OC = 16     # Tconv1_out_channel
OH = X - 4       # 12 conv output height
OW = Y - 4       # 12 conv output width
PH = OH // 2     # 6  pooled height
PW = OW // 2     # 6  pooled width
NPOS = PH * PW   # 36 pooled spatial positions
FEAT = C * K * K          # 100 im2col feature size
FEAT_PAD = 128            # lane-aligned contraction dim
FLAT = CONV_OC * NPOS     # 576 flattened pooled features
D1 = 64          # Tdense1_out
D2 = 64          # Tdense2_out
HID = 32         # n_gru_hidden_units (small)
LABEL = 6        # num_label
N = B * T        # 16 frames


# --------------------------- single fused kernel ------------------------------
def widar3_kernel(patches_ref, wc_ref, bc_ref, w1_ref, b1_ref, w2_ref, b2_ref,
                  wih_ref, bih_ref, whh_ref, bhh_ref, w3_ref, b3_ref,
                  out_ref, flat_ref):
    # ---- conv as one big im2col matmul + bias + relu -------------------------
    conv = jnp.dot(patches_ref[...], wc_ref[...],
                   preferred_element_type=jnp.float32)            # (2304, 16)
    conv = jnp.maximum(conv + bc_ref[...], 0.0)

    # ---- 2x2 max-pool: rows are corner-major, 4 contiguous slabs of 576 rows -
    s = NPOS * N                                                  # 576
    pooled = jnp.maximum(jnp.maximum(conv[0:s], conv[s:2 * s]),
                         jnp.maximum(conv[2 * s:3 * s], conv[3 * s:4 * s]))
    # pooled: (576, 16), row = p*N + n, lane = oc

    # ---- relayout (p, n, oc) -> (n, (p, oc)) through a lane-dense scratch ----
    for p in range(NPOS):
        flat_ref[:, p * CONV_OC:(p + 1) * CONV_OC] = pooled[p * N:(p + 1) * N, :]
    flat = flat_ref[...]                                          # (16, 576)

    # ---- dense1 -> relu -> dense2 -> relu ------------------------------------
    h1 = jnp.maximum(
        jnp.dot(flat, w1_ref[...], preferred_element_type=jnp.float32)
        + b1_ref[...], 0.0)                                       # (16, 64)
    feat = jnp.maximum(
        jnp.dot(h1, w2_ref[...], preferred_element_type=jnp.float32)
        + b2_ref[...], 0.0)                                       # (16, 64)

    # ---- GRU: hoisted input projection + fully unrolled recurrence -----------
    gx_all = jnp.dot(feat, wih_ref[...],
                     preferred_element_type=jnp.float32) + bih_ref[...]  # (16,96)
    whh = whh_ref[...]
    bhh = bhh_ref[...]
    h = jnp.zeros((B, HID), jnp.float32)
    for t in range(T):
        gx = gx_all[t * B:(t + 1) * B, :]                         # (B, 96)
        gh = jnp.dot(h, whh, preferred_element_type=jnp.float32) + bhh
        r = jax.nn.sigmoid(gx[:, 0:HID] + gh[:, 0:HID])
        z = jax.nn.sigmoid(gx[:, HID:2 * HID] + gh[:, HID:2 * HID])
        ng = jnp.tanh(gx[:, 2 * HID:3 * HID] + r * gh[:, 2 * HID:3 * HID])
        h = (1.0 - z) * ng + z * h

    # ---- final dense (dropout2 is identity at inference) ---------------------
    out_ref[...] = (jnp.dot(h, w3_ref[...], preferred_element_type=jnp.float32)
                    + b3_ref[...])


def widar3_fused(patches, p):
    vmem = pl.BlockSpec(memory_space=pltpu.MemorySpace.VMEM)
    return pl.pallas_call(
        widar3_kernel,
        out_shape=jax.ShapeDtypeStruct((B, LABEL), jnp.float32),
        in_specs=[vmem] * 13,
        out_specs=pl.BlockSpec(memory_space=pltpu.MemorySpace.VMEM),
        scratch_shapes=[pltpu.VMEM((N, FLAT), jnp.float32)],
    )(patches, p["wc"], p["bc"], p["w1"], p["b1"], p["w2"], p["b2"],
      p["wih"], p["bih"], p["whh"], p["bhh"], p["w3"], p["b3"])


# ------------------------------------ glue ------------------------------------
def build_patches(x):
    """x: (B, T, C, X, Y) -> patches (4*NPOS*N, FEAT_PAD).

    Row order: (corner=(dy,dx), p=(ph,pw), n=t*B+b) so the 2x2 max-pool is a
    max over 4 contiguous 576-row slabs and GRU timesteps are contiguous row
    groups.  Column order: (c, kh, kw), zero-padded 100 -> 128 for lane
    alignment of the matmul contraction.
    """
    frames = x.transpose(1, 0, 2, 3, 4).reshape(N, C, X, Y)       # time-major
    slabs = [frames[:, :, kh:kh + OH, kw:kw + OW]
             for kh in range(K) for kw in range(K)]               # (N, C, 12, 12)
    pat = jnp.stack(slabs, axis=2)                                # (N, C, 25, 12, 12)
    pat = pat.reshape(N, FEAT, OH, OW)                            # (N, F, 12, 12)
    pat = pat.reshape(N, FEAT, PH, 2, PW, 2)                      # (N, F, ph, dy, pw, dx)
    pat = pat.transpose(3, 5, 2, 4, 0, 1)                         # (dy, dx, ph, pw, N, F)
    pat = pat.reshape(4 * NPOS * N, FEAT)                         # (2304, 100)
    return jnp.pad(pat, ((0, 0), (0, FEAT_PAD - FEAT)))           # (2304, 128)


def init_params(key):
    ks = jax.random.split(key, 12)
    s = 0.1
    f32 = jnp.float32
    # conv: PyTorch Conv2d weight (16, C, 5, 5) -> (C*25, 16), zero-pad to 128 rows
    wc = (jax.random.normal(ks[0], (CONV_OC, C, K, K), f32) * s
          ).reshape(CONV_OC, FEAT).T
    wc = jnp.pad(wc, ((0, FEAT_PAD - FEAT), (0, 0)))
    return {
        "wc": wc,
        "bc": jax.random.normal(ks[1], (1, CONV_OC), f32) * s,
        # dense1 weights stored with input-feature order (ph, pw, oc)
        "w1": jax.random.normal(ks[2], (FLAT, D1), f32) * s,
        "b1": jax.random.normal(ks[3], (1, D1), f32) * s,
        "w2": jax.random.normal(ks[4], (D1, D2), f32) * s,
        "b2": jax.random.normal(ks[5], (1, D2), f32) * s,
        # GRU weights, gate order [r | z | n], stored transposed (in, 3*HID)
        "wih": jax.random.normal(ks[6], (D2, 3 * HID), f32) * s,
        "whh": jax.random.normal(ks[7], (HID, 3 * HID), f32) * s,
        "bih": jax.random.normal(ks[8], (1, 3 * HID), f32) * s,
        "bhh": jax.random.normal(ks[9], (1, 3 * HID), f32) * s,
        # final dense
        "w3": jax.random.normal(ks[10], (HID, LABEL), f32) * s,
        "b3": jax.random.normal(ks[11], (1, LABEL), f32) * s,
    }


def widar3_forward(x, params):
    patches = build_patches(x)            # XLA glue; read exactly once by the kernel
    return widar3_fused(patches, params)  # (B, LABEL)


if __name__ == "__main__":
    key = jax.random.PRNGKey(0)
    kx, kp = jax.random.split(key)
    x = jax.random.normal(kx, (B, T, C, X, Y), jnp.float32)
    params = init_params(kp)

    logits = jax.jit(widar3_forward)(x, params)
    logits = jax.block_until_ready(logits)

    assert logits.shape == (B, LABEL), logits.shape
    assert bool(jnp.all(jnp.isfinite(logits)))
    print("KERNEL_OK")
</pallas_src>

<mosaic_0001>
module attributes {stable_mosaic.version = 11 : i64} {
  func.func @widar3_kernel(%arg0: memref<2304x128xf32, #tpu.memory_space<vmem>>, %arg1: memref<128x16xf32, #tpu.memory_space<vmem>>, %arg2: memref<1x16xf32, #tpu.memory_space<vmem>>, %arg3: memref<576x64xf32, #tpu.memory_space<vmem>>, %arg4: memref<1x64xf32, #tpu.memory_space<vmem>>, %arg5: memref<64x64xf32, #tpu.memory_space<vmem>>, %arg6: memref<1x64xf32, #tpu.memory_space<vmem>>, %arg7: memref<64x96xf32, #tpu.memory_space<vmem>>, %arg8: memref<1x96xf32, #tpu.memory_space<vmem>>, %arg9: memref<32x96xf32, #tpu.memory_space<vmem>>, %arg10: memref<1x96xf32, #tpu.memory_space<vmem>>, %arg11: memref<32x6xf32, #tpu.memory_space<vmem>>, %arg12: memref<1x6xf32, #tpu.memory_space<vmem>>, %arg13: memref<2x6xf32, #tpu.memory_space<vmem>>, %arg14: memref<16x576xf32, #tpu.memory_space<vmem>>) attributes {dimension_semantics = [], scalar_prefetch = 0 : i64, scratch_operands = 1 : i64, tpu.core_type = #tpu.core_type<tc>} {
    %c0 = arith.constant 0 : index
    %c0_0 = arith.constant 0 : index
    %0 = vector.load %arg0[%c0, %c0_0] : memref<2304x128xf32, #tpu.memory_space<vmem>>, vector<2304x128xf32>
    %c0_1 = arith.constant 0 : index
    %c0_2 = arith.constant 0 : index
    %1 = vector.load %arg1[%c0_1, %c0_2] : memref<128x16xf32, #tpu.memory_space<vmem>>, vector<128x16xf32>
    %cst = arith.constant dense<0.000000e+00> : vector<2304x16xf32>
    %2 = tpu.matmul %0, %1, %cst {dimension_numbers = #tpu.dot_dimension_numbers<[1], [0], [0], [1], [0, 0, 1, 1], [], []>} : vector<2304x128xf32>, vector<128x16xf32>, vector<2304x16xf32> -> vector<2304x16xf32>
    %c0_3 = arith.constant 0 : index
    %c0_4 = arith.constant 0 : index
    %3 = vector.load %arg2[%c0_3, %c0_4] : memref<1x16xf32, #tpu.memory_space<vmem>>, vector<1x16xf32>
    %4 = vector.broadcast %3 : vector<1x16xf32> to vector<2304x16xf32>
    %5 = arith.addf %2, %4 : vector<2304x16xf32>
    %cst_5 = arith.constant 0.000000e+00 : f32
    %6 = vector.broadcast %cst_5 : f32 to vector<2304x16xf32>
    %7 = arith.maximumf %5, %6 : vector<2304x16xf32>
    %8 = vector.extract_strided_slice %7 {offsets = [0, 0], sizes = [576, 16], strides = [1, 1]} : vector<2304x16xf32> to vector<576x16xf32>
    %9 = vector.extract_strided_slice %7 {offsets = [576, 0], sizes = [576, 16], strides = [1, 1]} : vector<2304x16xf32> to vector<576x16xf32>
    %10 = arith.maximumf %8, %9 : vector<576x16xf32>
    %11 = vector.extract_strided_slice %7 {offsets = [1152, 0], sizes = [576, 16], strides = [1, 1]} : vector<2304x16xf32> to vector<576x16xf32>
    %12 = vector.extract_strided_slice %7 {offsets = [1728, 0], sizes = [576, 16], strides = [1, 1]} : vector<2304x16xf32> to vector<576x16xf32>
    %13 = arith.maximumf %11, %12 : vector<576x16xf32>
    %14 = arith.maximumf %10, %13 : vector<576x16xf32>
    %15 = vector.extract_strided_slice %14 {offsets = [0, 0], sizes = [16, 16], strides = [1, 1]} : vector<576x16xf32> to vector<16x16xf32>
    %c0_6 = arith.constant 0 : index
    %c0_7 = arith.constant 0 : index
    %16 = vector.load %arg14[%c0_6, %c0_7] : memref<16x576xf32, #tpu.memory_space<vmem>>, vector<16x16xf32>
    tpu.vector_store %arg14[%c0_6, %c0_7], %15 {strides = array<i32>} : memref<16x576xf32, #tpu.memory_space<vmem>>, vector<16x16xf32>,
    %17 = vector.extract_strided_slice %14 {offsets = [16, 0], sizes = [16, 16], strides = [1, 1]} : vector<576x16xf32> to vector<16x16xf32>
    %c0_8 = arith.constant 0 : index
    %c16 = arith.constant 16 : index
    %18 = vector.load %arg14[%c0_8, %c16] : memref<16x576xf32, #tpu.memory_space<vmem>>, vector<16x16xf32>
    tpu.vector_store %arg14[%c0_8, %c16], %17 {strides = array<i32>} : memref<16x576xf32, #tpu.memory_space<vmem>>, vector<16x16xf32>,
    %19 = vector.extract_strided_slice %14 {offsets = [32, 0], sizes = [16, 16], strides = [1, 1]} : vector<576x16xf32> to vector<16x16xf32>
    %c0_9 = arith.constant 0 : index
    %c32 = arith.constant 32 : index
    %20 = vector.load %arg14[%c0_9, %c32] : memref<16x576xf32, #tpu.memory_space<vmem>>, vector<16x16xf32>
    tpu.vector_store %arg14[%c0_9, %c32], %19 {strides = array<i32>} : memref<16x576xf32, #tpu.memory_space<vmem>>, vector<16x16xf32>,
    %21 = vector.extract_strided_slice %14 {offsets = [48, 0], sizes = [16, 16], strides = [1, 1]} : vector<576x16xf32> to vector<16x16xf32>
    %c0_10 = arith.constant 0 : index
    %c48 = arith.constant 48 : index
    %22 = vector.load %arg14[%c0_10, %c48] : memref<16x576xf32, #tpu.memory_space<vmem>>, vector<16x16xf32>
    tpu.vector_store %arg14[%c0_10, %c48], %21 {strides = array<i32>} : memref<16x576xf32, #tpu.memory_space<vmem>>, vector<16x16xf32>,
    %23 = vector.extract_strided_slice %14 {offsets = [64, 0], sizes = [16, 16], strides = [1, 1]} : vector<576x16xf32> to vector<16x16xf32>
    %c0_11 = arith.constant 0 : index
    %c64 = arith.constant 64 : index
    %24 = vector.load %arg14[%c0_11, %c64] : memref<16x576xf32, #tpu.memory_space<vmem>>, vector<16x16xf32>
    tpu.vector_store %arg14[%c0_11, %c64], %23 {strides = array<i32>} : memref<16x576xf32, #tpu.memory_space<vmem>>, vector<16x16xf32>,
    %25 = vector.extract_strided_slice %14 {offsets = [80, 0], sizes = [16, 16], strides = [1, 1]} : vector<576x16xf32> to vector<16x16xf32>
    %c0_12 = arith.constant 0 : index
    %c80 = arith.constant 80 : index
    %26 = vector.load %arg14[%c0_12, %c80] : memref<16x576xf32, #tpu.memory_space<vmem>>, vector<16x16xf32>
    tpu.vector_store %arg14[%c0_12, %c80], %25 {strides = array<i32>} : memref<16x576xf32, #tpu.memory_space<vmem>>, vector<16x16xf32>,
    %27 = vector.extract_strided_slice %14 {offsets = [96, 0], sizes = [16, 16], strides = [1, 1]} : vector<576x16xf32> to vector<16x16xf32>
    %c0_13 = arith.constant 0 : index
    %c96 = arith.constant 96 : index
    %28 = vector.load %arg14[%c0_13, %c96] : memref<16x576xf32, #tpu.memory_space<vmem>>, vector<16x16xf32>
    tpu.vector_store %arg14[%c0_13, %c96], %27 {strides = array<i32>} : memref<16x576xf32, #tpu.memory_space<vmem>>, vector<16x16xf32>,
    %29 = vector.extract_strided_slice %14 {offsets = [112, 0], sizes = [16, 16], strides = [1, 1]} : vector<576x16xf32> to vector<16x16xf32>
    %c0_14 = arith.constant 0 : index
    %c112 = arith.constant 112 : index
    %30 = vector.load %arg14[%c0_14, %c112] : memref<16x576xf32, #tpu.memory_space<vmem>>, vector<16x16xf32>
    tpu.vector_store %arg14[%c0_14, %c112], %29 {strides = array<i32>} : memref<16x576xf32, #tpu.memory_space<vmem>>, vector<16x16xf32>,
    %31 = vector.extract_strided_slice %14 {offsets = [128, 0], sizes = [16, 16], strides = [1, 1]} : vector<576x16xf32> to vector<16x16xf32>
    %c0_15 = arith.constant 0 : index
    %c128 = arith.constant 128 : index
    %32 = vector.load %arg14[%c0_15, %c128] : memref<16x576xf32, #tpu.memory_space<vmem>>, vector<16x16xf32>
    tpu.vector_store %arg14[%c0_15, %c128], %31 {strides = array<i32>} : memref<16x576xf32, #tpu.memory_space<vmem>>, vector<16x16xf32>,
    %33 = vector.extract_strided_slice %14 {offsets = [144, 0], sizes = [16, 16], strides = [1, 1]} : vector<576x16xf32> to vector<16x16xf32>
    %c0_16 = arith.constant 0 : index
    %c144 = arith.constant 144 : index
    %34 = vector.load %arg14[%c0_16, %c144] : memref<16x576xf32, #tpu.memory_space<vmem>>, vector<16x16xf32>
    tpu.vector_store %arg14[%c0_16, %c144], %33 {strides = array<i32>} : memref<16x576xf32, #tpu.memory_space<vmem>>, vector<16x16xf32>,
    %35 = vector.extract_strided_slice %14 {offsets = [160, 0], sizes = [16, 16], strides = [1, 1]} : vector<576x16xf32> to vector<16x16xf32>
    %c0_17 = arith.constant 0 : index
    %c160 = arith.constant 160 : index
    %36 = vector.load %arg14[%c0_17, %c160] : memref<16x576xf32, #tpu.memory_space<vmem>>, vector<16x16xf32>
    tpu.vector_store %arg14[%c0_17, %c160], %35 {strides = array<i32>} : memref<16x576xf32, #tpu.memory_space<vmem>>, vector<16x16xf32>,
    %37 = vector.extract_strided_slice %14 {offsets = [176, 0], sizes = [16, 16], strides = [1, 1]} : vector<576x16xf32> to vector<16x16xf32>
    %c0_18 = arith.constant 0 : index
    %c176 = arith.constant 176 : index
    %38 = vector.load %arg14[%c0_18, %c176] : memref<16x576xf32, #tpu.memory_space<vmem>>, vector<16x16xf32>
    tpu.vector_store %arg14[%c0_18, %c176], %37 {strides = array<i32>} : memref<16x576xf32, #tpu.memory_space<vmem>>, vector<16x16xf32>,
    %39 = vector.extract_strided_slice %14 {offsets = [192, 0], sizes = [16, 16], strides = [1, 1]} : vector<576x16xf32> to vector<16x16xf32>
    %c0_19 = arith.constant 0 : index
    %c192 = arith.constant 192 : index
    %40 = vector.load %arg14[%c0_19, %c192] : memref<16x576xf32, #tpu.memory_space<vmem>>, vector<16x16xf32>
    tpu.vector_store %arg14[%c0_19, %c192], %39 {strides = array<i32>} : memref<16x576xf32, #tpu.memory_space<vmem>>, vector<16x16xf32>,
    %41 = vector.extract_strided_slice %14 {offsets = [208, 0], sizes = [16, 16], strides = [1, 1]} : vector<576x16xf32> to vector<16x16xf32>
    %c0_20 = arith.constant 0 : index
    %c208 = arith.constant 208 : index
    %42 = vector.load %arg14[%c0_20, %c208] : memref<16x576xf32, #tpu.memory_space<vmem>>, vector<16x16xf32>
    tpu.vector_store %arg14[%c0_20, %c208], %41 {strides = array<i32>} : memref<16x576xf32, #tpu.memory_space<vmem>>, vector<16x16xf32>,
    %43 = vector.extract_strided_slice %14 {offsets = [224, 0], sizes = [16, 16], strides = [1, 1]} : vector<576x16xf32> to vector<16x16xf32>
    %c0_21 = arith.constant 0 : index
    %c224 = arith.constant 224 : index
    %44 = vector.load %arg14[%c0_21, %c224] : memref<16x576xf32, #tpu.memory_space<vmem>>, vector<16x16xf32>
    tpu.vector_store %arg14[%c0_21, %c224], %43 {strides = array<i32>} : memref<16x576xf32, #tpu.memory_space<vmem>>, vector<16x16xf32>,
    %45 = vector.extract_strided_slice %14 {offsets = [240, 0], sizes = [16, 16], strides = [1, 1]} : vector<576x16xf32> to vector<16x16xf32>
    %c0_22 = arith.constant 0 : index
    %c240 = arith.constant 240 : index
    %46 = vector.load %arg14[%c0_22, %c240] : memref<16x576xf32, #tpu.memory_space<vmem>>, vector<16x16xf32>
    tpu.vector_store %arg14[%c0_22, %c240], %45 {strides = array<i32>} : memref<16x576xf32, #tpu.memory_space<vmem>>, vector<16x16xf32>,
    %47 = vector.extract_strided_slice %14 {offsets = [256, 0], sizes = [16, 16], strides = [1, 1]} : vector<576x16xf32> to vector<16x16xf32>
    %c0_23 = arith.constant 0 : index
    %c256 = arith.constant 256 : index
    %48 = vector.load %arg14[%c0_23, %c256] : memref<16x576xf32, #tpu.memory_space<vmem>>, vector<16x16xf32>
    tpu.vector_store %arg14[%c0_23, %c256], %47 {strides = array<i32>} : memref<16x576xf32, #tpu.memory_space<vmem>>, vector<16x16xf32>,
    %49 = vector.extract_strided_slice %14 {offsets = [272, 0], sizes = [16, 16], strides = [1, 1]} : vector<576x16xf32> to vector<16x16xf32>
    %c0_24 = arith.constant 0 : index
    %c272 = arith.constant 272 : index
    %50 = vector.load %arg14[%c0_24, %c272] : memref<16x576xf32, #tpu.memory_space<vmem>>, vector<16x16xf32>
    tpu.vector_store %arg14[%c0_24, %c272], %49 {strides = array<i32>} : memref<16x576xf32, #tpu.memory_space<vmem>>, vector<16x16xf32>,
    %51 = vector.extract_strided_slice %14 {offsets = [288, 0], sizes = [16, 16], strides = [1, 1]} : vector<576x16xf32> to vector<16x16xf32>
    %c0_25 = arith.constant 0 : index
    %c288 = arith.constant 288 : index
    %52 = vector.load %arg14[%c0_25, %c288] : memref<16x576xf32, #tpu.memory_space<vmem>>, vector<16x16xf32>
    tpu.vector_store %arg14[%c0_25, %c288], %51 {strides = array<i32>} : memref<16x576xf32, #tpu.memory_space<vmem>>, vector<16x16xf32>,
    %53 = vector.extract_strided_slice %14 {offsets = [304, 0], sizes = [16, 16], strides = [1, 1]} : vector<576x16xf32> to vector<16x16xf32>
    %c0_26 = arith.constant 0 : index
    %c304 = arith.constant 304 : index
    %54 = vector.load %arg14[%c0_26, %c304] : memref<16x576xf32, #tpu.memory_space<vmem>>, vector<16x16xf32>
    tpu.vector_store %arg14[%c0_26, %c304], %53 {strides = array<i32>} : memref<16x576xf32, #tpu.memory_space<vmem>>, vector<16x16xf32>,
    %55 = vector.extract_strided_slice %14 {offsets = [320, 0], sizes = [16, 16], strides = [1, 1]} : vector<576x16xf32> to vector<16x16xf32>
    %c0_27 = arith.constant 0 : index
    %c320 = arith.constant 320 : index
    %56 = vector.load %arg14[%c0_27, %c320] : memref<16x576xf32, #tpu.memory_space<vmem>>, vector<16x16xf32>
    tpu.vector_store %arg14[%c0_27, %c320], %55 {strides = array<i32>} : memref<16x576xf32, #tpu.memory_space<vmem>>, vector<16x16xf32>,
    %57 = vector.extract_strided_slice %14 {offsets = [336, 0], sizes = [16, 16], strides = [1, 1]} : vector<576x16xf32> to vector<16x16xf32>
    %c0_28 = arith.constant 0 : index
    %c336 = arith.constant 336 : index
    %58 = vector.load %arg14[%c0_28, %c336] : memref<16x576xf32, #tpu.memory_space<vmem>>, vector<16x16xf32>
    tpu.vector_store %arg14[%c0_28, %c336], %57 {strides = array<i32>} : memref<16x576xf32, #tpu.memory_space<vmem>>, vector<16x16xf32>,
    %59 = vector.extract_strided_slice %14 {offsets = [352, 0], sizes = [16, 16], strides = [1, 1]} : vector<576x16xf32> to vector<16x16xf32>
    %c0_29 = arith.constant 0 : index
    %c352 = arith.constant 352 : index
    %60 = vector.load %arg14[%c0_29, %c352] : memref<16x576xf32, #tpu.memory_space<vmem>>, vector<16x16xf32>
    tpu.vector_store %arg14[%c0_29, %c352], %59 {strides = array<i32>} : memref<16x576xf32, #tpu.memory_space<vmem>>, vector<16x16xf32>,
    %61 = vector.extract_strided_slice %14 {offsets = [368, 0], sizes = [16, 16], strides = [1, 1]} : vector<576x16xf32> to vector<16x16xf32>
    %c0_30 = arith.constant 0 : index
    %c368 = arith.constant 368 : index
    %62 = vector.load %arg14[%c0_30, %c368] : memref<16x576xf32, #tpu.memory_space<vmem>>, vector<16x16xf32>
    tpu.vector_store %arg14[%c0_30, %c368], %61 {strides = array<i32>} : memref<16x576xf32, #tpu.memory_space<vmem>>, vector<16x16xf32>,
    %63 = vector.extract_strided_slice %14 {offsets = [384, 0], sizes = [16, 16], strides = [1, 1]} : vector<576x16xf32> to vector<16x16xf32>
    %c0_31 = arith.constant 0 : index
    %c384 = arith.constant 384 : index
    %64 = vector.load %arg14[%c0_31, %c384] : memref<16x576xf32, #tpu.memory_space<vmem>>, vector<16x16xf32>
    tpu.vector_store %arg14[%c0_31, %c384], %63 {strides = array<i32>} : memref<16x576xf32, #tpu.memory_space<vmem>>, vector<16x16xf32>,
    %65 = vector.extract_strided_slice %14 {offsets = [400, 0], sizes = [16, 16], strides = [1, 1]} : vector<576x16xf32> to vector<16x16xf32>
    %c0_32 = arith.constant 0 : index
    %c400 = arith.constant 400 : index
    %66 = vector.load %arg14[%c0_32, %c400] : memref<16x576xf32, #tpu.memory_space<vmem>>, vector<16x16xf32>
    tpu.vector_store %arg14[%c0_32, %c400], %65 {strides = array<i32>} : memref<16x576xf32, #tpu.memory_space<vmem>>, vector<16x16xf32>,
    %67 = vector.extract_strided_slice %14 {offsets = [416, 0], sizes = [16, 16], strides = [1, 1]} : vector<576x16xf32> to vector<16x16xf32>
    %c0_33 = arith.constant 0 : index
    %c416 = arith.constant 416 : index
    %68 = vector.load %arg14[%c0_33, %c416] : memref<16x576xf32, #tpu.memory_space<vmem>>, vector<16x16xf32>
    tpu.vector_store %arg14[%c0_33, %c416], %67 {strides = array<i32>} : memref<16x576xf32, #tpu.memory_space<vmem>>, vector<16x16xf32>,
    %69 = vector.extract_strided_slice %14 {offsets = [432, 0], sizes = [16, 16], strides = [1, 1]} : vector<576x16xf32> to vector<16x16xf32>
    %c0_34 = arith.constant 0 : index
    %c432 = arith.constant 432 : index
    %70 = vector.load %arg14[%c0_34, %c432] : memref<16x576xf32, #tpu.memory_space<vmem>>, vector<16x16xf32>
    tpu.vector_store %arg14[%c0_34, %c432], %69 {strides = array<i32>} : memref<16x576xf32, #tpu.memory_space<vmem>>, vector<16x16xf32>,
    %71 = vector.extract_strided_slice %14 {offsets = [448, 0], sizes = [16, 16], strides = [1, 1]} : vector<576x16xf32> to vector<16x16xf32>
    %c0_35 = arith.constant 0 : index
    %c448 = arith.constant 448 : index
    %72 = vector.load %arg14[%c0_35, %c448] : memref<16x576xf32, #tpu.memory_space<vmem>>, vector<16x16xf32>
    tpu.vector_store %arg14[%c0_35, %c448], %71 {strides = array<i32>} : memref<16x576xf32, #tpu.memory_space<vmem>>, vector<16x16xf32>,
    %73 = vector.extract_strided_slice %14 {offsets = [464, 0], sizes = [16, 16], strides = [1, 1]} : vector<576x16xf32> to vector<16x16xf32>
    %c0_36 = arith.constant 0 : index
    %c464 = arith.constant 464 : index
    %74 = vector.load %arg14[%c0_36, %c464] : memref<16x576xf32, #tpu.memory_space<vmem>>, vector<16x16xf32>
    tpu.vector_store %arg14[%c0_36, %c464], %73 {strides = array<i32>} : memref<16x576xf32, #tpu.memory_space<vmem>>, vector<16x16xf32>,
    %75 = vector.extract_strided_slice %14 {offsets = [480, 0], sizes = [16, 16], strides = [1, 1]} : vector<576x16xf32> to vector<16x16xf32>
    %c0_37 = arith.constant 0 : index
    %c480 = arith.constant 480 : index
    %76 = vector.load %arg14[%c0_37, %c480] : memref<16x576xf32, #tpu.memory_space<vmem>>, vector<16x16xf32>
    tpu.vector_store %arg14[%c0_37, %c480], %75 {strides = array<i32>} : memref<16x576xf32, #tpu.memory_space<vmem>>, vector<16x16xf32>,
    %77 = vector.extract_strided_slice %14 {offsets = [496, 0], sizes = [16, 16], strides = [1, 1]} : vector<576x16xf32> to vector<16x16xf32>
    %c0_38 = arith.constant 0 : index
    %c496 = arith.constant 496 : index
    %78 = vector.load %arg14[%c0_38, %c496] : memref<16x576xf32, #tpu.memory_space<vmem>>, vector<16x16xf32>
    tpu.vector_store %arg14[%c0_38, %c496], %77 {strides = array<i32>} : memref<16x576xf32, #tpu.memory_space<vmem>>, vector<16x16xf32>,
    %79 = vector.extract_strided_slice %14 {offsets = [512, 0], sizes = [16, 16], strides = [1, 1]} : vector<576x16xf32> to vector<16x16xf32>
    %c0_39 = arith.constant 0 : index
    %c512 = arith.constant 512 : index
    %80 = vector.load %arg14[%c0_39, %c512] : memref<16x576xf32, #tpu.memory_space<vmem>>, vector<16x16xf32>
    tpu.vector_store %arg14[%c0_39, %c512], %79 {strides = array<i32>} : memref<16x576xf32, #tpu.memory_space<vmem>>, vector<16x16xf32>,
    %81 = vector.extract_strided_slice %14 {offsets = [528, 0], sizes = [16, 16], strides = [1, 1]} : vector<576x16xf32> to vector<16x16xf32>
    %c0_40 = arith.constant 0 : index
    %c528 = arith.constant 528 : index
    %82 = vector.load %arg14[%c0_40, %c528] : memref<16x576xf32, #tpu.memory_space<vmem>>, vector<16x16xf32>
    tpu.vector_store %arg14[%c0_40, %c528], %81 {strides = array<i32>} : memref<16x576xf32, #tpu.memory_space<vmem>>, vector<16x16xf32>,
    %83 = vector.extract_strided_slice %14 {offsets = [544, 0], sizes = [16, 16], strides = [1, 1]} : vector<576x16xf32> to vector<16x16xf32>
    %c0_41 = arith.constant 0 : index
    %c544 = arith.constant 544 : index
    %84 = vector.load %arg14[%c0_41, %c544] : memref<16x576xf32, #tpu.memory_space<vmem>>, vector<16x16xf32>
    tpu.vector_store %arg14[%c0_41, %c544], %83 {strides = array<i32>} : memref<16x576xf32, #tpu.memory_space<vmem>>, vector<16x16xf32>,
    %85 = vector.extract_strided_slice %14 {offsets = [560, 0], sizes = [16, 16], strides = [1, 1]} : vector<576x16xf32> to vector<16x16xf32>
    %c0_42 = arith.constant 0 : index
    %c560 = arith.constant 560 : index
    %86 = vector.load %arg14[%c0_42, %c560] : memref<16x576xf32, #tpu.memory_space<vmem>>, vector<16x16xf32>
    tpu.vector_store %arg14[%c0_42, %c560], %85 {strides = array<i32>} : memref<16x576xf32, #tpu.memory_space<vmem>>, vector<16x16xf32>,
    %c0_43 = arith.constant 0 : index
    %c0_44 = arith.constant 0 : index
    %87 = vector.load %arg14[%c0_43, %c0_44] : memref<16x576xf32, #tpu.memory_space<vmem>>, vector<16x576xf32>
    %c0_45 = arith.constant 0 : index
    %c0_46 = arith.constant 0 : index
    %88 = vector.load %arg3[%c0_45, %c0_46] : memref<576x64xf32, #tpu.memory_space<vmem>>, vector<576x64xf32>
    %cst_47 = arith.constant dense<0.000000e+00> : vector<16x64xf32>
    %89 = tpu.matmul %87, %88, %cst_47 {dimension_numbers = #tpu.dot_dimension_numbers<[1], [0], [0], [1], [0, 0, 1, 1], [], []>} : vector<16x576xf32>, vector<576x64xf32>, vector<16x64xf32> -> vector<16x64xf32>
    %c0_48 = arith.constant 0 : index
    %c0_49 = arith.constant 0 : index
    %90 = vector.load %arg4[%c0_48, %c0_49] : memref<1x64xf32, #tpu.memory_space<vmem>>, vector<1x64xf32>
    %91 = vector.broadcast %90 : vector<1x64xf32> to vector<16x64xf32>
    %92 = arith.addf %89, %91 : vector<16x64xf32>
    %cst_50 = arith.constant 0.000000e+00 : f32
    %93 = vector.broadcast %cst_50 : f32 to vector<16x64xf32>
    %94 = arith.maximumf %92, %93 : vector<16x64xf32>
    %c0_51 = arith.constant 0 : index
    %c0_52 = arith.constant 0 : index
    %95 = vector.load %arg5[%c0_51, %c0_52] : memref<64x64xf32, #tpu.memory_space<vmem>>, vector<64x64xf32>
    %cst_53 = arith.constant dense<0.000000e+00> : vector<16x64xf32>
    %96 = tpu.matmul %94, %95, %cst_53 {dimension_numbers = #tpu.dot_dimension_numbers<[1], [0], [0], [1], [0, 0, 1, 1], [], []>} : vector<16x64xf32>, vector<64x64xf32>, vector<16x64xf32> -> vector<16x64xf32>
    %c0_54 = arith.constant 0 : index
    %c0_55 = arith.constant 0 : index
    %97 = vector.load %arg6[%c0_54, %c0_55] : memref<1x64xf32, #tpu.memory_space<vmem>>, vector<1x64xf32>
    %98 = vector.broadcast %97 : vector<1x64xf32> to vector<16x64xf32>
    %99 = arith.addf %96, %98 : vector<16x64xf32>
    %cst_56 = arith.constant 0.000000e+00 : f32
    %100 = vector.broadcast %cst_56 : f32 to vector<16x64xf32>
    %101 = arith.maximumf %99, %100 : vector<16x64xf32>
    %c0_57 = arith.constant 0 : index
    %c0_58 = arith.constant 0 : index
    %102 = vector.load %arg7[%c0_57, %c0_58] : memref<64x96xf32, #tpu.memory_space<vmem>>, vector<64x96xf32>
    %cst_59 = arith.constant dense<0.000000e+00> : vector<16x96xf32>
    %103 = tpu.matmul %101, %102, %cst_59 {dimension_numbers = #tpu.dot_dimension_numbers<[1], [0], [0], [1], [0, 0, 1, 1], [], []>} : vector<16x64xf32>, vector<64x96xf32>, vector<16x96xf32> -> vector<16x96xf32>
    %c0_60 = arith.constant 0 : index
    %c0_61 = arith.constant 0 : index
    %104 = vector.load %arg8[%c0_60, %c0_61] : memref<1x96xf32, #tpu.memory_space<vmem>>, vector<1x96xf32>
    %105 = vector.broadcast %104 : vector<1x96xf32> to vector<16x96xf32>
    %106 = arith.addf %103, %105 : vector<16x96xf32>
    %c0_62 = arith.constant 0 : index
    %c0_63 = arith.constant 0 : index
    %107 = vector.load %arg9[%c0_62, %c0_63] : memref<32x96xf32, #tpu.memory_space<vmem>>, vector<32x96xf32>
    %c0_64 = arith.constant 0 : index
    %c0_65 = arith.constant 0 : index
    %108 = vector.load %arg10[%c0_64, %c0_65] : memref<1x96xf32, #tpu.memory_space<vmem>>, vector<1x96xf32>
    %cst_66 = arith.constant 0.000000e+00 : f32
    %109 = vector.broadcast %cst_66 : f32 to vector<2x32xf32>
    %110 = vector.extract_strided_slice %106 {offsets = [0, 0], sizes = [2, 96], strides = [1, 1]} : vector<16x96xf32> to vector<2x96xf32>
    %cst_67 = arith.constant dense<0.000000e+00> : vector<2x96xf32>
    %111 = tpu.matmul %109, %107, %cst_67 {dimension_numbers = #tpu.dot_dimension_numbers<[1], [0], [0], [1], [0, 0, 1, 1], [], []>} : vector<2x32xf32>, vector<32x96xf32>, vector<2x96xf32> -> vector<2x96xf32>
    %112 = vector.broadcast %108 : vector<1x96xf32> to vector<2x96xf32>
    %113 = arith.addf %111, %112 : vector<2x96xf32>
    %114 = vector.extract_strided_slice %110 {offsets = [0, 0], sizes = [2, 32], strides = [1, 1]} : vector<2x96xf32> to vector<2x32xf32>
    %115 = vector.extract_strided_slice %113 {offsets = [0, 0], sizes = [2, 32], strides = [1, 1]} : vector<2x96xf32> to vector<2x32xf32>
    %116 = arith.addf %114, %115 : vector<2x32xf32>
    %117 = arith.negf %116 : vector<2x32xf32>
    %118 = math.exp %117 : vector<2x32xf32>
    %cst_68 = arith.constant 1.000000e+00 : f32
    %119 = vector.broadcast %cst_68 : f32 to vector<2x32xf32>
    %120 = arith.addf %119, %118 : vector<2x32xf32>
    %121 = arith.divf %119, %120 : vector<2x32xf32>
    %122 = vector.extract_strided_slice %110 {offsets = [0, 32], sizes = [2, 32], strides = [1, 1]} : vector<2x96xf32> to vector<2x32xf32>
    %123 = vector.extract_strided_slice %113 {offsets = [0, 32], sizes = [2, 32], strides = [1, 1]} : vector<2x96xf32> to vector<2x32xf32>
    %124 = arith.addf %122, %123 : vector<2x32xf32>
    %125 = arith.negf %124 : vector<2x32xf32>
    %126 = math.exp %125 : vector<2x32xf32>
    %cst_69 = arith.constant 1.000000e+00 : f32
    %127 = vector.broadcast %cst_69 : f32 to vector<2x32xf32>
    %128 = arith.addf %127, %126 : vector<2x32xf32>
    %129 = arith.divf %127, %128 : vector<2x32xf32>
    %130 = vector.extract_strided_slice %110 {offsets = [0, 64], sizes = [2, 32], strides = [1, 1]} : vector<2x96xf32> to vector<2x32xf32>
    %131 = vector.extract_strided_slice %113 {offsets = [0, 64], sizes = [2, 32], strides = [1, 1]} : vector<2x96xf32> to vector<2x32xf32>
    %132 = arith.mulf %121, %131 : vector<2x32xf32>
    %133 = arith.addf %130, %132 : vector<2x32xf32>
    %134 = math.tanh %133 : vector<2x32xf32>
    %cst_70 = arith.constant 1.000000e+00 : f32
    %135 = vector.broadcast %cst_70 : f32 to vector<2x32xf32>
    %136 = arith.subf %135, %129 : vector<2x32xf32>
    %137 = arith.mulf %136, %134 : vector<2x32xf32>
    %138 = arith.mulf %129, %109 : vector<2x32xf32>
    %139 = arith.addf %137, %138 : vector<2x32xf32>
    %140 = vector.extract_strided_slice %106 {offsets = [2, 0], sizes = [2, 96], strides = [1, 1]} : vector<16x96xf32> to vector<2x96xf32>
    %cst_71 = arith.constant dense<0.000000e+00> : vector<2x96xf32>
    %141 = tpu.matmul %139, %107, %cst_71 {dimension_numbers = #tpu.dot_dimension_numbers<[1], [0], [0], [1], [0, 0, 1, 1], [], []>} : vector<2x32xf32>, vector<32x96xf32>, vector<2x96xf32> -> vector<2x96xf32>
    %142 = vector.broadcast %108 : vector<1x96xf32> to vector<2x96xf32>
    %143 = arith.addf %141, %142 : vector<2x96xf32>
    %144 = vector.extract_strided_slice %140 {offsets = [0, 0], sizes = [2, 32], strides = [1, 1]} : vector<2x96xf32> to vector<2x32xf32>
    %145 = vector.extract_strided_slice %143 {offsets = [0, 0], sizes = [2, 32], strides = [1, 1]} : vector<2x96xf32> to vector<2x32xf32>
    %146 = arith.addf %144, %145 : vector<2x32xf32>
    %147 = arith.negf %146 : vector<2x32xf32>
    %148 = math.exp %147 : vector<2x32xf32>
    %cst_72 = arith.constant 1.000000e+00 : f32
    %149 = vector.broadcast %cst_72 : f32 to vector<2x32xf32>
    %150 = arith.addf %149, %148 : vector<2x32xf32>
    %151 = arith.divf %149, %150 : vector<2x32xf32>
    %152 = vector.extract_strided_slice %140 {offsets = [0, 32], sizes = [2, 32], strides = [1, 1]} : vector<2x96xf32> to vector<2x32xf32>
    %153 = vector.extract_strided_slice %143 {offsets = [0, 32], sizes = [2, 32], strides = [1, 1]} : vector<2x96xf32> to vector<2x32xf32>
    %154 = arith.addf %152, %153 : vector<2x32xf32>
    %155 = arith.negf %154 : vector<2x32xf32>
    %156 = math.exp %155 : vector<2x32xf32>
    %cst_73 = arith.constant 1.000000e+00 : f32
    %157 = vector.broadcast %cst_73 : f32 to vector<2x32xf32>
    %158 = arith.addf %157, %156 : vector<2x32xf32>
    %159 = arith.divf %157, %158 : vector<2x32xf32>
    %160 = vector.extract_strided_slice %140 {offsets = [0, 64], sizes = [2, 32], strides = [1, 1]} : vector<2x96xf32> to vector<2x32xf32>
    %161 = vector.extract_strided_slice %143 {offsets = [0, 64], sizes = [2, 32], strides = [1, 1]} : vector<2x96xf32> to vector<2x32xf32>
    %162 = arith.mulf %151, %161 : vector<2x32xf32>
    %163 = arith.addf %160, %162 : vector<2x32xf32>
    %164 = math.tanh %163 : vector<2x32xf32>
    %cst_74 = arith.constant 1.000000e+00 : f32
    %165 = vector.broadcast %cst_74 : f32 to vector<2x32xf32>
    %166 = arith.subf %165, %159 : vector<2x32xf32>
    %167 = arith.mulf %166, %164 : vector<2x32xf32>
    %168 = arith.mulf %159, %139 : vector<2x32xf32>
    %169 = arith.addf %167, %168 : vector<2x32xf32>
    %170 = vector.extract_strided_slice %106 {offsets = [4, 0], sizes = [2, 96], strides = [1, 1]} : vector<16x96xf32> to vector<2x96xf32>
    %cst_75 = arith.constant dense<0.000000e+00> : vector<2x96xf32>
    %171 = tpu.matmul %169, %107, %cst_75 {dimension_numbers = #tpu.dot_dimension_numbers<[1], [0], [0], [1], [0, 0, 1, 1], [], []>} : vector<2x32xf32>, vector<32x96xf32>, vector<2x96xf32> -> vector<2x96xf32>
    %172 = vector.broadcast %108 : vector<1x96xf32> to vector<2x96xf32>
    %173 = arith.addf %171, %172 : vector<2x96xf32>
    %174 = vector.extract_strided_slice %170 {offsets = [0, 0], sizes = [2, 32], strides = [1, 1]} : vector<2x96xf32> to vector<2x32xf32>
    %175 = vector.extract_strided_slice %173 {offsets = [0, 0], sizes = [2, 32], strides = [1, 1]} : vector<2x96xf32> to vector<2x32xf32>
    %176 = arith.addf %174, %175 : vector<2x32xf32>
    %177 = arith.negf %176 : vector<2x32xf32>
    %178 = math.exp %177 : vector<2x32xf32>
    %cst_76 = arith.constant 1.000000e+00 : f32
    %179 = vector.broadcast %cst_76 : f32 to vector<2x32xf32>
    %180 = arith.addf %179, %178 : vector<2x32xf32>
    %181 = arith.divf %179, %180 : vector<2x32xf32>
    %182 = vector.extract_strided_slice %170 {offsets = [0, 32], sizes = [2, 32], strides = [1, 1]} : vector<2x96xf32> to vector<2x32xf32>
    %183 = vector.extract_strided_slice %173 {offsets = [0, 32], sizes = [2, 32], strides = [1, 1]} : vector<2x96xf32> to vector<2x32xf32>
    %184 = arith.addf %182, %183 : vector<2x32xf32>
    %185 = arith.negf %184 : vector<2x32xf32>
    %186 = math.exp %185 : vector<2x32xf32>
    %cst_77 = arith.constant 1.000000e+00 : f32
    %187 = vector.broadcast %cst_77 : f32 to vector<2x32xf32>
    %188 = arith.addf %187, %186 : vector<2x32xf32>
    %189 = arith.divf %187, %188 : vector<2x32xf32>
    %190 = vector.extract_strided_slice %170 {offsets = [0, 64], sizes = [2, 32], strides = [1, 1]} : vector<2x96xf32> to vector<2x32xf32>
    %191 = vector.extract_strided_slice %173 {offsets = [0, 64], sizes = [2, 32], strides = [1, 1]} : vector<2x96xf32> to vector<2x32xf32>
    %192 = arith.mulf %181, %191 : vector<2x32xf32>
    %193 = arith.addf %190, %192 : vector<2x32xf32>
    %194 = math.tanh %193 : vector<2x32xf32>
    %cst_78 = arith.constant 1.000000e+00 : f32
    %195 = vector.broadcast %cst_78 : f32 to vector<2x32xf32>
    %196 = arith.subf %195, %189 : vector<2x32xf32>
    %197 = arith.mulf %196, %194 : vector<2x32xf32>
    %198 = arith.mulf %189, %169 : vector<2x32xf32>
    %199 = arith.addf %197, %198 : vector<2x32xf32>
    %200 = vector.extract_strided_slice %106 {offsets = [6, 0], sizes = [2, 96], strides = [1, 1]} : vector<16x96xf32> to vector<2x96xf32>
    %cst_79 = arith.constant dense<0.000000e+00> : vector<2x96xf32>
    %201 = tpu.matmul %199, %107, %cst_79 {dimension_numbers = #tpu.dot_dimension_numbers<[1], [0], [0], [1], [0, 0, 1, 1], [], []>} : vector<2x32xf32>, vector<32x96xf32>, vector<2x96xf32> -> vector<2x96xf32>
    %202 = vector.broadcast %108 : vector<1x96xf32> to vector<2x96xf32>
    %203 = arith.addf %201, %202 : vector<2x96xf32>
    %204 = vector.extract_strided_slice %200 {offsets = [0, 0], sizes = [2, 32], strides = [1, 1]} : vector<2x96xf32> to vector<2x32xf32>
    %205 = vector.extract_strided_slice %203 {offsets = [0, 0], sizes = [2, 32], strides = [1, 1]} : vector<2x96xf32> to vector<2x32xf32>
    %206 = arith.addf %204, %205 : vector<2x32xf32>
    %207 = arith.negf %206 : vector<2x32xf32>
    %208 = math.exp %207 : vector<2x32xf32>
    %cst_80 = arith.constant 1.000000e+00 : f32
    %209 = vector.broadcast %cst_80 : f32 to vector<2x32xf32>
    %210 = arith.addf %209, %208 : vector<2x32xf32>
    %211 = arith.divf %209, %210 : vector<2x32xf32>
    %212 = vector.extract_strided_slice %200 {offsets = [0, 32], sizes = [2, 32], strides = [1, 1]} : vector<2x96xf32> to vector<2x32xf32>
    %213 = vector.extract_strided_slice %203 {offsets = [0, 32], sizes = [2, 32], strides = [1, 1]} : vector<2x96xf32> to vector<2x32xf32>
    %214 = arith.addf %212, %213 : vector<2x32xf32>
    %215 = arith.negf %214 : vector<2x32xf32>
    %216 = math.exp %215 : vector<2x32xf32>
    %cst_81 = arith.constant 1.000000e+00 : f32
    %217 = vector.broadcast %cst_81 : f32 to vector<2x32xf32>
    %218 = arith.addf %217, %216 : vector<2x32xf32>
    %219 = arith.divf %217, %218 : vector<2x32xf32>
    %220 = vector.extract_strided_slice %200 {offsets = [0, 64], sizes = [2, 32], strides = [1, 1]} : vector<2x96xf32> to vector<2x32xf32>
    %221 = vector.extract_strided_slice %203 {offsets = [0, 64], sizes = [2, 32], strides = [1, 1]} : vector<2x96xf32> to vector<2x32xf32>
    %222 = arith.mulf %211, %221 : vector<2x32xf32>
    %223 = arith.addf %220, %222 : vector<2x32xf32>
    %224 = math.tanh %223 : vector<2x32xf32>
    %cst_82 = arith.constant 1.000000e+00 : f32
    %225 = vector.broadcast %cst_82 : f32 to vector<2x32xf32>
    %226 = arith.subf %225, %219 : vector<2x32xf32>
    %227 = arith.mulf %226, %224 : vector<2x32xf32>
    %228 = arith.mulf %219, %199 : vector<2x32xf32>
    %229 = arith.addf %227, %228 : vector<2x32xf32>
    %230 = vector.extract_strided_slice %106 {offsets = [8, 0], sizes = [2, 96], strides = [1, 1]} : vector<16x96xf32> to vector<2x96xf32>
    %cst_83 = arith.constant dense<0.000000e+00> : vector<2x96xf32>
    %231 = tpu.matmul %229, %107, %cst_83 {dimension_numbers = #tpu.dot_dimension_numbers<[1], [0], [0], [1], [0, 0, 1, 1], [], []>} : vector<2x32xf32>, vector<32x96xf32>, vector<2x96xf32> -> vector<2x96xf32>
    %232 = vector.broadcast %108 : vector<1x96xf32> to vector<2x96xf32>
    %233 = arith.addf %231, %232 : vector<2x96xf32>
    %234 = vector.extract_strided_slice %230 {offsets = [0, 0], sizes = [2, 32], strides = [1, 1]} : vector<2x96xf32> to vector<2x32xf32>
    %235 = vector.extract_strided_slice %233 {offsets = [0, 0], sizes = [2, 32], strides = [1, 1]} : vector<2x96xf32> to vector<2x32xf32>
    %236 = arith.addf %234, %235 : vector<2x32xf32>
    %237 = arith.negf %236 : vector<2x32xf32>
    %238 = math.exp %237 : vector<2x32xf32>
    %cst_84 = arith.constant 1.000000e+00 : f32
    %239 = vector.broadcast %cst_84 : f32 to vector<2x32xf32>
    %240 = arith.addf %239, %238 : vector<2x32xf32>
    %241 = arith.divf %239, %240 : vector<2x32xf32>
    %242 = vector.extract_strided_slice %230 {offsets = [0, 32], sizes = [2, 32], strides = [1, 1]} : vector<2x96xf32> to vector<2x32xf32>
    %243 = vector.extract_strided_slice %233 {offsets = [0, 32], sizes = [2, 32], strides = [1, 1]} : vector<2x96xf32> to vector<2x32xf32>
    %244 = arith.addf %242, %243 : vector<2x32xf32>
    %245 = arith.negf %244 : vector<2x32xf32>
    %246 = math.exp %245 : vector<2x32xf32>
    %cst_85 = arith.constant 1.000000e+00 : f32
    %247 = vector.broadcast %cst_85 : f32 to vector<2x32xf32>
    %248 = arith.addf %247, %246 : vector<2x32xf32>
    %249 = arith.divf %247, %248 : vector<2x32xf32>
    %250 = vector.extract_strided_slice %230 {offsets = [0, 64], sizes = [2, 32], strides = [1, 1]} : vector<2x96xf32> to vector<2x32xf32>
    %251 = vector.extract_strided_slice %233 {offsets = [0, 64], sizes = [2, 32], strides = [1, 1]} : vector<2x96xf32> to vector<2x32xf32>
    %252 = arith.mulf %241, %251 : vector<2x32xf32>
    %253 = arith.addf %250, %252 : vector<2x32xf32>
    %254 = math.tanh %253 : vector<2x32xf32>
    %cst_86 = arith.constant 1.000000e+00 : f32
    %255 = vector.broadcast %cst_86 : f32 to vector<2x32xf32>
    %256 = arith.subf %255, %249 : vector<2x32xf32>
    %257 = arith.mulf %256, %254 : vector<2x32xf32>
    %258 = arith.mulf %249, %229 : vector<2x32xf32>
    %259 = arith.addf %257, %258 : vector<2x32xf32>
    %260 = vector.extract_strided_slice %106 {offsets = [10, 0], sizes = [2, 96], strides = [1, 1]} : vector<16x96xf32> to vector<2x96xf32>
    %cst_87 = arith.constant dense<0.000000e+00> : vector<2x96xf32>
    %261 = tpu.matmul %259, %107, %cst_87 {dimension_numbers = #tpu.dot_dimension_numbers<[1], [0], [0], [1], [0, 0, 1, 1], [], []>} : vector<2x32xf32>, vector<32x96xf32>, vector<2x96xf32> -> vector<2x96xf32>
    %262 = vector.broadcast %108 : vector<1x96xf32> to vector<2x96xf32>
    %263 = arith.addf %261, %262 : vector<2x96xf32>
    %264 = vector.extract_strided_slice %260 {offsets = [0, 0], sizes = [2, 32], strides = [1, 1]} : vector<2x96xf32> to vector<2x32xf32>
    %265 = vector.extract_strided_slice %263 {offsets = [0, 0], sizes = [2, 32], strides = [1, 1]} : vector<2x96xf32> to vector<2x32xf32>
    %266 = arith.addf %264, %265 : vector<2x32xf32>
    %267 = arith.negf %266 : vector<2x32xf32>
    %268 = math.exp %267 : vector<2x32xf32>
    %cst_88 = arith.constant 1.000000e+00 : f32
    %269 = vector.broadcast %cst_88 : f32 to vector<2x32xf32>
    %270 = arith.addf %269, %268 : vector<2x32xf32>
    %271 = arith.divf %269, %270 : vector<2x32xf32>
    %272 = vector.extract_strided_slice %260 {offsets = [0, 32], sizes = [2, 32], strides = [1, 1]} : vector<2x96xf32> to vector<2x32xf32>
    %273 = vector.extract_strided_slice %263 {offsets = [0, 32], sizes = [2, 32], strides = [1, 1]} : vector<2x96xf32> to vector<2x32xf32>
    %274 = arith.addf %272, %273 : vector<2x32xf32>
    %275 = arith.negf %274 : vector<2x32xf32>
    %276 = math.exp %275 : vector<2x32xf32>
    %cst_89 = arith.constant 1.000000e+00 : f32
    %277 = vector.broadcast %cst_89 : f32 to vector<2x32xf32>
    %278 = arith.addf %277, %276 : vector<2x32xf32>
    %279 = arith.divf %277, %278 : vector<2x32xf32>
    %280 = vector.extract_strided_slice %260 {offsets = [0, 64], sizes = [2, 32], strides = [1, 1]} : vector<2x96xf32> to vector<2x32xf32>
    %281 = vector.extract_strided_slice %263 {offsets = [0, 64], sizes = [2, 32], strides = [1, 1]} : vector<2x96xf32> to vector<2x32xf32>
    %282 = arith.mulf %271, %281 : vector<2x32xf32>
    %283 = arith.addf %280, %282 : vector<2x32xf32>
    %284 = math.tanh %283 : vector<2x32xf32>
    %cst_90 = arith.constant 1.000000e+00 : f32
    %285 = vector.broadcast %cst_90 : f32 to vector<2x32xf32>
    %286 = arith.subf %285, %279 : vector<2x32xf32>
    %287 = arith.mulf %286, %284 : vector<2x32xf32>
    %288 = arith.mulf %279, %259 : vector<2x32xf32>
    %289 = arith.addf %287, %288 : vector<2x32xf32>
    %290 = vector.extract_strided_slice %106 {offsets = [12, 0], sizes = [2, 96], strides = [1, 1]} : vector<16x96xf32> to vector<2x96xf32>
    %cst_91 = arith.constant dense<0.000000e+00> : vector<2x96xf32>
    %291 = tpu.matmul %289, %107, %cst_91 {dimension_numbers = #tpu.dot_dimension_numbers<[1], [0], [0], [1], [0, 0, 1, 1], [], []>} : vector<2x32xf32>, vector<32x96xf32>, vector<2x96xf32> -> vector<2x96xf32>
    %292 = vector.broadcast %108 : vector<1x96xf32> to vector<2x96xf32>
    %293 = arith.addf %291, %292 : vector<2x96xf32>
    %294 = vector.extract_strided_slice %290 {offsets = [0, 0], sizes = [2, 32], strides = [1, 1]} : vector<2x96xf32> to vector<2x32xf32>
    %295 = vector.extract_strided_slice %293 {offsets = [0, 0], sizes = [2, 32], strides = [1, 1]} : vector<2x96xf32> to vector<2x32xf32>
    %296 = arith.addf %294, %295 : vector<2x32xf32>
    %297 = arith.negf %296 : vector<2x32xf32>
    %298 = math.exp %297 : vector<2x32xf32>
    %cst_92 = arith.constant 1.000000e+00 : f32
    %299 = vector.broadcast %cst_92 : f32 to vector<2x32xf32>
    %300 = arith.addf %299, %298 : vector<2x32xf32>
    %301 = arith.divf %299, %300 : vector<2x32xf32>
    %302 = vector.extract_strided_slice %290 {offsets = [0, 32], sizes = [2, 32], strides = [1, 1]} : vector<2x96xf32> to vector<2x32xf32>
    %303 = vector.extract_strided_slice %293 {offsets = [0, 32], sizes = [2, 32], strides = [1, 1]} : vector<2x96xf32> to vector<2x32xf32>
    %304 = arith.addf %302, %303 : vector<2x32xf32>
    %305 = arith.negf %304 : vector<2x32xf32>
    %306 = math.exp %305 : vector<2x32xf32>
    %cst_93 = arith.constant 1.000000e+00 : f32
    %307 = vector.broadcast %cst_93 : f32 to vector<2x32xf32>
    %308 = arith.addf %307, %306 : vector<2x32xf32>
    %309 = arith.divf %307, %308 : vector<2x32xf32>
    %310 = vector.extract_strided_slice %290 {offsets = [0, 64], sizes = [2, 32], strides = [1, 1]} : vector<2x96xf32> to vector<2x32xf32>
    %311 = vector.extract_strided_slice %293 {offsets = [0, 64], sizes = [2, 32], strides = [1, 1]} : vector<2x96xf32> to vector<2x32xf32>
    %312 = arith.mulf %301, %311 : vector<2x32xf32>
    %313 = arith.addf %310, %312 : vector<2x32xf32>
    %314 = math.tanh %313 : vector<2x32xf32>
    %cst_94 = arith.constant 1.000000e+00 : f32
    %315 = vector.broadcast %cst_94 : f32 to vector<2x32xf32>
    %316 = arith.subf %315, %309 : vector<2x32xf32>
    %317 = arith.mulf %316, %314 : vector<2x32xf32>
    %318 = arith.mulf %309, %289 : vector<2x32xf32>
    %319 = arith.addf %317, %318 : vector<2x32xf32>
    %320 = vector.extract_strided_slice %106 {offsets = [14, 0], sizes = [2, 96], strides = [1, 1]} : vector<16x96xf32> to vector<2x96xf32>
    %cst_95 = arith.constant dense<0.000000e+00> : vector<2x96xf32>
    %321 = tpu.matmul %319, %107, %cst_95 {dimension_numbers = #tpu.dot_dimension_numbers<[1], [0], [0], [1], [0, 0, 1, 1], [], []>} : vector<2x32xf32>, vector<32x96xf32>, vector<2x96xf32> -> vector<2x96xf32>
    %322 = vector.broadcast %108 : vector<1x96xf32> to vector<2x96xf32>
    %323 = arith.addf %321, %322 : vector<2x96xf32>
    %324 = vector.extract_strided_slice %320 {offsets = [0, 0], sizes = [2, 32], strides = [1, 1]} : vector<2x96xf32> to vector<2x32xf32>
    %325 = vector.extract_strided_slice %323 {offsets = [0, 0], sizes = [2, 32], strides = [1, 1]} : vector<2x96xf32> to vector<2x32xf32>
    %326 = arith.addf %324, %325 : vector<2x32xf32>
    %327 = arith.negf %326 : vector<2x32xf32>
    %328 = math.exp %327 : vector<2x32xf32>
    %cst_96 = arith.constant 1.000000e+00 : f32
    %329 = vector.broadcast %cst_96 : f32 to vector<2x32xf32>
    %330 = arith.addf %329, %328 : vector<2x32xf32>
    %331 = arith.divf %329, %330 : vector<2x32xf32>
    %332 = vector.extract_strided_slice %320 {offsets = [0, 32], sizes = [2, 32], strides = [1, 1]} : vector<2x96xf32> to vector<2x32xf32>
    %333 = vector.extract_strided_slice %323 {offsets = [0, 32], sizes = [2, 32], strides = [1, 1]} : vector<2x96xf32> to vector<2x32xf32>
    %334 = arith.addf %332, %333 : vector<2x32xf32>
    %335 = arith.negf %334 : vector<2x32xf32>
    %336 = math.exp %335 : vector<2x32xf32>
    %cst_97 = arith.constant 1.000000e+00 : f32
    %337 = vector.broadcast %cst_97 : f32 to vector<2x32xf32>
    %338 = arith.addf %337, %336 : vector<2x32xf32>
    %339 = arith.divf %337, %338 : vector<2x32xf32>
    %340 = vector.extract_strided_slice %320 {offsets = [0, 64], sizes = [2, 32], strides = [1, 1]} : vector<2x96xf32> to vector<2x32xf32>
    %341 = vector.extract_strided_slice %323 {offsets = [0, 64], sizes = [2, 32], strides = [1, 1]} : vector<2x96xf32> to vector<2x32xf32>
    %342 = arith.mulf %331, %341 : vector<2x32xf32>
    %343 = arith.addf %340, %342 : vector<2x32xf32>
    %344 = math.tanh %343 : vector<2x32xf32>
    %cst_98 = arith.constant 1.000000e+00 : f32
    %345 = vector.broadcast %cst_98 : f32 to vector<2x32xf32>
    %346 = arith.subf %345, %339 : vector<2x32xf32>
    %347 = arith.mulf %346, %344 : vector<2x32xf32>
    %348 = arith.mulf %339, %319 : vector<2x32xf32>
    %349 = arith.addf %347, %348 : vector<2x32xf32>
    %c0_99 = arith.constant 0 : index
    %c0_100 = arith.constant 0 : index
    %350 = vector.load %arg11[%c0_99, %c0_100] : memref<32x6xf32, #tpu.memory_space<vmem>>, vector<32x6xf32>
    %cst_101 = arith.constant dense<0.000000e+00> : vector<2x6xf32>
    %351 = tpu.matmul %349, %350, %cst_101 {dimension_numbers = #tpu.dot_dimension_numbers<[1], [0], [0], [1], [0, 0, 1, 1], [], []>} : vector<2x32xf32>, vector<32x6xf32>, vector<2x6xf32> -> vector<2x6xf32>
    %c0_102 = arith.constant 0 : index
    %c0_103 = arith.constant 0 : index
    %352 = vector.load %arg12[%c0_102, %c0_103] : memref<1x6xf32, #tpu.memory_space<vmem>>, vector<1x6xf32>
    %353 = vector.broadcast %352 : vector<1x6xf32> to vector<2x6xf32>
    %354 = arith.addf %351, %353 : vector<2x6xf32>
    %c0_104 = arith.constant 0 : index
    %c0_105 = arith.constant 0 : index
    %355 = vector.load %arg13[%c0_104, %c0_105] : memref<2x6xf32, #tpu.memory_space<vmem>>, vector<2x6xf32>
    tpu.vector_store %arg13[%c0_104, %c0_105], %354 {strides = array<i32>} : memref<2x6xf32, #tpu.memory_space<vmem>>, vector<2x6xf32>,
    return
  }
}

</mosaic_0001>

<bundles_post_ra>
// kernel: widar3_forward.1
= control target key start
LH: loop header
LB: loop body
LE: loop exit
PB: predicated region body
PF: predicated region fallthrough
CT: control target
= control target key end

     0   :  { %s8540_s0 = inlined_call_operand.vmem [shape: f32[2304,128], index: 0, kind: input, shape index: {}]   ;;  %s8541_s1 = inlined_call_operand.vmem [shape: f32[128,16], index: 1, kind: input, shape index: {}]   ;;  %s8542_s2 = inlined_call_operand.vmem [shape: f32[1,16], index: 2, kind: input, shape index: {}]   ;;  %s8543_s3 = inlined_call_operand.vmem [shape: f32[576,64], index: 3, kind: input, shape index: {}]   ;;  %s8544_s4 = inlined_call_operand.vmem [shape: f32[1,64], index: 4, kind: input, shape index: {}]   ;;  %s8545_s5 = inlined_call_operand.vmem [shape: f32[64,64], index: 5, kind: input, shape index: {}]   ;;  %s8546_s6 = inlined_call_operand.vmem [shape: f32[1,64], index: 6, kind: input, shape index: {}]   ;;  %s8547_s7 = inlined_call_operand.vmem [shape: f32[64,96], index: 7, kind: input, shape index: {}]   ;;  %s8548_s8 = inlined_call_operand.vmem [shape: f32[1,96], index: 8, kind: input, shape index: {}]   ;;  %s8549_s9 = inlined_call_operand.vmem [shape: f32[32,96], index: 9, kind: input, shape index: {}]   ;;  %s8550_s10 = inlined_call_operand.vmem [shape: f32[1,96], index: 10, kind: input, shape index: {}]   ;;  %s8551_s11 = inlined_call_operand.vmem [shape: f32[32,6], index: 11, kind: input, shape index: {}]   ;;  %s8552_s12 = inlined_call_operand.vmem [shape: f32[1,6], index: 12, kind: input, shape index: {}]   ;;  %s8553_s13 = inlined_call_operand.hbm [shape: f32[2,6], index: 13, kind: output, shape index: {}]  }
   0x1   :  { %v333_v0 = vld [vmem:[%s8541_s1] sm:$0xff]  ;;  %v334_v1 = vld [vmem:[%s8541_s1 + $0x8] sm:$0xff]  ;;  %v335_v2 = vld [vmem:[%s8541_s1 + $0x10] sm:$0xff] }
   0x2   :  { %v5264_v3 = vpack.c.bf16 %v334_v1, %v333_v0  ;;  %v336_v4 = vld [vmem:[%s8541_s1 + $0x18] sm:$0xff]  ;;  %v337_v6 = vld [vmem:[%s8541_s1 + $0x20] sm:$0xff]  ;;  %v338_v7 = vld [vmem:[%s8541_s1 + $0x28] sm:$0xff] }
   0x3   :  { %v5268_v5 = vpack.c.bf16 %v336_v4, %v335_v2  ;;  %v5272_v8 = vpack.c.bf16 %v338_v7, %v337_v6  ;;  %v45_v9 = vld [vmem:[%s8540_s0] sm:$0xff]  ;;  %v339_v11 = vld [vmem:[%s8541_s1 + $0x30] sm:$0xff]  ;;  %v340_v12 = vld [vmem:[%s8541_s1 + $0x38] sm:$0xff] }
   0x4   :  { %5265 = vmatprep.subr.bf16.mxu0 %v5264_v3  ;;  %5462 = vmatprep.subr.bf16.mxu1 %v5264_v3  ;;  %v229_v10 = vld [vmem:[%s8540_s0 + $0x5c0] sm:$0xff]  ;;  %v5276_v13 = vpack.c.bf16 %v340_v12, %v339_v11  ;;  %v342_v15 = vld [vmem:[%s8541_s1 + $0x48] sm:$0xff]  ;;  %v343_v17 = vld [vmem:[%s8541_s1 + $0x50] sm:$0xff] }
   0x5   :  { %5267 = vmatpush3.bf16.msra.mxu0 %v5264_v3  ;;  %5470 = vmatpush3.bf16.msra.mxu1 %v5264_v3  ;;  %v341_v14 = vld [vmem:[%s8541_s1 + $0x40] sm:$0xff]  ;;  %v344_v18 = vld [vmem:[%s8541_s1 + $0x58] sm:$0xff]  ;;  %v346_v21 = vld [vmem:[%s8541_s1 + $0x68] sm:$0xff] }
   0x6   :  { %5269 = vmatprep.subr.bf16.mxu0 %v5268_v5  ;;  %5463 = vmatprep.subr.bf16.mxu1 %v5268_v5  ;;  %v5280_v16 = vpack.c.bf16 %v342_v15, %v341_v14  ;;  %v5284_v19 = vpack.c.bf16 %v344_v18, %v343_v17  ;;  %v345_v20 = vld [vmem:[%s8541_s1 + $0x60] sm:$0xff]  ;;  %v347_v23 = vld [vmem:[%s8541_s1 + $0x70] sm:$0xff]  ;;  %v348_v24 = vld [vmem:[%s8541_s1 + $0x78] sm:$0xff] }
   0x7   :  { %4676 = vmatprep.mubr.f32.mxu0 %v45_v9  ;;  %4952 = vmatprep.mubr.f32.mxu1 %v229_v10  ;;  %v5288_v22 = vpack.c.bf16 %v346_v21, %v345_v20  ;;  %v5292_v25 = vpack.c.bf16 %v348_v24, %v347_v23  ;;  %v46_v26 = vld [vmem:[%s8540_s0 + $0x8] sm:$0xff]  ;;  %v47_v28 = vld [vmem:[%s8540_s0 + $0x10] sm:$0xff]  ;;  %v48_v30 = vld [vmem:[%s8540_s0 + $0x18] sm:$0xff] }
   0x8   :  { %v230_v27 = vld [vmem:[%s8540_s0 + $0x5c8] sm:$0xff]  ;;  %v231_v29 = vld [vmem:[%s8540_s0 + $0x5d0] sm:$0xff]  ;;  %v232_v31 = vld [vmem:[%s8540_s0 + $0x5d8] sm:$0xff] }
   0x9   :  { %5271 = vmatpush3.bf16.msra.mxu0 %v5268_v5  ;;  %5471 = vmatpush3.bf16.msra.mxu1 %v5268_v5  ;;  %v49_v32 = vld [vmem:[%s8540_s0 + $0x20] sm:$0xff]  ;;  %v50_v34 = vld [vmem:[%s8540_s0 + $0x28] sm:$0xff]  ;;  %v51_v36 = vld [vmem:[%s8540_s0 + $0x30] sm:$0xff] }
   0xa   :  { %5273 = vmatprep.subr.bf16.mxu0 %v5272_v8  ;;  %5464 = vmatprep.subr.bf16.mxu1 %v5272_v8  ;;  %v233_v33 = vld [vmem:[%s8540_s0 + $0x5e0] sm:$0xff]  ;;  %v234_v35 = vld [vmem:[%s8540_s0 + $0x5e8] sm:$0xff]  ;;  %v235_v37 = vld [vmem:[%s8540_s0 + $0x5f0] sm:$0xff] }
   0xb   :  { %v52_v38 = vld [vmem:[%s8540_s0 + $0x38] sm:$0xff]  ;;  %v53_v40 = vld [vmem:[%s8540_s0 + $0x40] sm:$0xff]  ;;  %v54_v42 = vld [vmem:[%s8540_s0 + $0x48] sm:$0xff] }
   0xc   :  { %v236_v39 = vld [vmem:[%s8540_s0 + $0x5f8] sm:$0xff]  ;;  %v237_v41 = vld [vmem:[%s8540_s0 + $0x600] sm:$0xff]  ;;  %v238_v43 = vld [vmem:[%s8540_s0 + $0x608] sm:$0xff] }
   0xd   :  { %5275 = vmatpush3.bf16.msra.mxu0 %v5272_v8  ;;  %5472 = vmatpush3.bf16.msra.mxu1 %v5272_v8  ;;  %v55_v44 = vld [vmem:[%s8540_s0 + $0x50] sm:$0xff]  ;;  %v56_v46 = vld [vmem:[%s8540_s0 + $0x58] sm:$0xff]  ;;  %v57_v48 = vld [vmem:[%s8540_s0 + $0x60] sm:$0xff] }
   0xe   :  { %5277 = vmatprep.subr.bf16.mxu0 %v5276_v13  ;;  %5465 = vmatprep.subr.bf16.mxu1 %v5276_v13  ;;  %v239_v45 = vld [vmem:[%s8540_s0 + $0x610] sm:$0xff]  ;;  %v240_v47 = vld [vmem:[%s8540_s0 + $0x618] sm:$0xff]  ;;  %v241_v49 = vld [vmem:[%s8540_s0 + $0x620] sm:$0xff] }
   0xf   :  { %v58_v50 = vld [vmem:[%s8540_s0 + $0x68] sm:$0xff]  ;;  %v59_v52 = vld [vmem:[%s8540_s0 + $0x70] sm:$0xff] }
  0x10   :  { %v242_v51 = vld [vmem:[%s8540_s0 + $0x628] sm:$0xff]  ;;  %v243_v53 = vld [vmem:[%s8540_s0 + $0x630] sm:$0xff] }
  0x11   :  { %5279 = vmatpush3.bf16.msra.mxu0 %v5276_v13  ;;  %5473 = vmatpush3.bf16.msra.mxu1 %v5276_v13 }
  0x12   :  { %5281 = vmatprep.subr.bf16.mxu0 %v5280_v16  ;;  %5466 = vmatprep.subr.bf16.mxu1 %v5280_v16 }
  0x15   :  { %5283 = vmatpush3.bf16.msra.mxu0 %v5280_v16  ;;  %5474 = vmatpush3.bf16.msra.mxu1 %v5280_v16 }
  0x16   :  { %5285 = vmatprep.subr.bf16.mxu0 %v5284_v19  ;;  %5467 = vmatprep.subr.bf16.mxu1 %v5284_v19 }
  0x19   :  { %5287 = vmatpush3.bf16.msra.mxu0 %v5284_v19  ;;  %5475 = vmatpush3.bf16.msra.mxu1 %v5284_v19 }
  0x1a   :  { %5289 = vmatprep.subr.bf16.mxu0 %v5288_v22  ;;  %5468 = vmatprep.subr.bf16.mxu1 %v5288_v22 }
  0x1d   :  { %5291 = vmatpush3.bf16.msra.mxu0 %v5288_v22  ;;  %5476 = vmatpush3.bf16.msra.mxu1 %v5288_v22 }
  0x1e   :  { %5293 = vmatprep.subr.bf16.mxu0 %v5292_v25  ;;  %5469 = vmatprep.subr.bf16.mxu1 %v5292_v25 }
  0x21   :  { %5295 = vmatpush3.bf16.msra.mxu0 %v5292_v25  ;;  %5477 = vmatpush3.bf16.msra.mxu1 %v5292_v25 }
  0x24   :  { %4677 = vmatmul.mubr.f32.vlgmr.msra.gmra.mrb[0].mxu0 %v46_v26  ;;  %4953 = vmatmul.mubr.f32.vlgmr.msra.gmra.mrb[0].mxu1 %v230_v27 }
  0x25   :  { %4679 = vmatprep.mubr.f32.mxu0 %v47_v28  ;;  %4955 = vmatprep.mubr.f32.mxu1 %v231_v29 }
  0x28   :  { %4680 = vmatmul.mubr.f32.gmra.mrb[2].mxu0 %v48_v30  ;;  %4956 = vmatmul.mubr.f32.gmra.mrb[2].mxu1 %v232_v31 }
  0x29   :  { %4682 = vmatprep.mubr.f32.mxu0 %v49_v32  ;;  %4958 = vmatprep.mubr.f32.mxu1 %v233_v33 }
  0x2c   :  { %4683 = vmatmul.mubr.f32.gmra.mrb[4].mxu0 %v50_v34  ;;  %4959 = vmatmul.mubr.f32.gmra.mrb[4].mxu1 %v234_v35 }
  0x2d   :  { %4685 = vmatprep.mubr.f32.mxu0 %v51_v36  ;;  %4961 = vmatprep.mubr.f32.mxu1 %v235_v37 }
  0x30   :  { %4686 = vmatmul.mubr.f32.gmra.mrb[6].mxu0 %v52_v38  ;;  %4962 = vmatmul.mubr.f32.gmra.mrb[6].mxu1 %v236_v39 }
  0x31   :  { %4688 = vmatprep.mubr.f32.mxu0 %v53_v40  ;;  %4964 = vmatprep.mubr.f32.mxu1 %v237_v41 }
  0x34   :  { %4689 = vmatmul.mubr.f32.gmra.mrb[8].mxu0 %v54_v42  ;;  %4965 = vmatmul.mubr.f32.gmra.mrb[8].mxu1 %v238_v43 }
  0x35   :  { %4691 = vmatprep.mubr.f32.mxu0 %v55_v44  ;;  %4967 = vmatprep.mubr.f32.mxu1 %v239_v45 }
  0x38   :  { %4692 = vmatmul.mubr.f32.gmra.mrb[10].mxu0 %v56_v46  ;;  %4968 = vmatmul.mubr.f32.gmra.mrb[10].mxu1 %v240_v47 }
  0x39   :  { %4694 = vmatprep.mubr.f32.mxu0 %v57_v48  ;;  %4970 = vmatprep.mubr.f32.mxu1 %v241_v49 }
  0x3a   :  { %18 = vsyncpa [#allocation4], 0  ;;  %v60_v54 = vld [vmem:[%s8540_s0 + $0x78] sm:$0xff]  ;;  %v61_v56 = vld [vmem:[%s8540_s0 + $0x80] sm:$0xff]  ;;  %s5563_s1 = smov 64   ;;  %s5564_s14 = smov 80  }
  0x3b   :  { %v244_v55 = vld [vmem:[%s8540_s0 + $0x638] sm:$0xff]  ;;  %v245_v57 = vld [vmem:[%s8540_s0 + $0x640] sm:$0xff]  ;;  %v62_v58 = vld [vmem:[%s8540_s0 + $0x88] sm:$0xff]  ;;  %s5565_s15 = smov 96   ;;  %vm2365_vm0 = vcmask 130048   ;;  %s5566_s24 = smov 16  }
  0x3c   :  { %4695 = vmatmul.mubr.f32.gmra.mrb[12].mxu0 %v58_v50  ;;  %4971 = vmatmul.mubr.f32.gmra.mrb[12].mxu1 %v242_v51  ;;  %v246_v59 = vld [vmem:[%s8540_s0 + $0x648] sm:$0xff]  ;;  %v63_v60 = vld [vmem:[%s8540_s0 + $0x90] sm:$0xff]  ;;  %v64_v62 = vld [vmem:[%s8540_s0 + $0x98] sm:$0xff]  ;;  %s5568_s25 = smov 48   ;;  %s5569_s19 = smov 112   ;;  %vm2376_vm1 = vcmask 261248  }
  0x3d   :  { %4697 = vmatprep.mubr.f32.mxu0 %v59_v52  ;;  %4973 = vmatprep.mubr.f32.mxu1 %v243_v53  ;;  %v247_v61 = vld [vmem:[%s8540_s0 + $0x650] sm:$0xff]  ;;  %v248_v63 = vld [vmem:[%s8540_s0 + $0x658] sm:$0xff]  ;;  %v65_v0 = vld [vmem:[%s8540_s0 + $0xa0] sm:$0xff]  ;;  %vm2387_vm2 = vcmask 392448   ;;  %vm2398_vm3 = vcmask 523648   ;;  %vm2409_vm4 = vcmask 654848  }
  0x3e   :  { %v249_v1 = vld [vmem:[%s8540_s0 + $0x660] sm:$0xff]  ;;  %v66_v2 = vld [vmem:[%s8540_s0 + $0xa8] sm:$0xff]  ;;  %v67_v4 = vld [vmem:[%s8540_s0 + $0xb0] sm:$0xff]  ;;  %vm2420_vm5 = vcmask 786048   ;;  %vm2431_vm6 = vcmask 917248   ;;  %vm2442_vm7 = vcmask 1048448  }
  0x3f   :  { %v250_v3 = vld [vmem:[%s8540_s0 + $0x668] sm:$0xff]  ;;  %v251_v5 = vld [vmem:[%s8540_s0 + $0x670] sm:$0xff]  ;;  %v68_v6 = vld [vmem:[%s8540_s0 + $0xb8] sm:$0xff]  ;;  %vm2782_vm8 = vcmask 523264   ;;  %vm5571_vm9 = vmmov 0   ;;  %vm3221_vm10 = vcmask 261120  }
  0x40   :  { %4698 = vmatmul.mubr.f32.gmra.mrb[14].mxu0 %v60_v54  ;;  %4974 = vmatmul.mubr.f32.gmra.mrb[14].mxu1 %v244_v55  ;;  %v252_v7 = vld [vmem:[%s8540_s0 + $0x678] sm:$0xff]  ;;  %v69_v8 = vld [vmem:[%s8540_s0 + $0xc0] sm:$0xff]  ;;  %v70_v10 = vld [vmem:[%s8540_s0 + $0xc8] sm:$0xff]  ;;  %s5573_s20 = smov [#allocation3]   ;;  %vm4145_vm11 = vcmask 41984  }
  0x41   :  { %4700 = vmatprep.mubr.f32.mxu0 %v61_v56  ;;  %4976 = vmatprep.mubr.f32.mxu1 %v245_v57  ;;  %v253_v9 = vld [vmem:[%s8540_s0 + $0x680] sm:$0xff]  ;;  %v254_v11 = vld [vmem:[%s8540_s0 + $0x688] sm:$0xff]  ;;  %v71_v12 = vld [vmem:[%s8540_s0 + $0xd0] sm:$0xff]  ;;  %s4153_s21 = sshll.u32 %s5573_s20, 4  ;;  %s4154_s21 = int_to_ptr.vmem [resolvable:$true] %s4153_s21 }
  0x42   :  { %v255_v13 = vld [vmem:[%s8540_s0 + $0x690] sm:$0xff]  ;;  %v72_v14 = vld [vmem:[%s8540_s0 + $0xd8] sm:$0xff]  ;;  %v73_v16 = vld [vmem:[%s8540_s0 + $0xe0] sm:$0xff]  ;;  %p5544_p1 = scmp.lt.s32.totalorder %s4154_s21, %s4154_s21 }
  0x43   :  { %v256_v15 = vld [vmem:[%s8540_s0 + $0x698] sm:$0xff]  ;;  %v257_v17 = vld [vmem:[%s8540_s0 + $0x6a0] sm:$0xff]  ;;  %v74_v18 = vld [vmem:[%s8540_s0 + $0xe8] sm:$0xff] }
  0x44   :  { %4701 = vmatmul.mubr.f32.gmra.mrb[16].mxu0 %v62_v58  ;;  %4977 = vmatmul.mubr.f32.gmra.mrb[16].mxu1 %v246_v59  ;;  %v258_v19 = vld [vmem:[%s8540_s0 + $0x6a8] sm:$0xff]  ;;  %v75_v20 = vld [vmem:[%s8540_s0 + $0xf0] sm:$0xff]  ;;  %v76_v22 = vld [vmem:[%s8540_s0 + $0xf8] sm:$0xff] }
  0x45   :  { %4703 = vmatprep.mubr.f32.mxu0 %v63_v60  ;;  %4979 = vmatprep.mubr.f32.mxu1 %v247_v61  ;;  %v259_v21 = vld [vmem:[%s8540_s0 + $0x6b0] sm:$0xff]  ;;  %v260_v23 = vld [vmem:[%s8540_s0 + $0x6b8] sm:$0xff]  ;;  %v77_v24 = vld [vmem:[%s8540_s0 + $0x100] sm:$0xff] }
  0x46   :  { %v261_v25 = vld [vmem:[%s8540_s0 + $0x6c0] sm:$0xff]  ;;  %v78_v26 = vld [vmem:[%s8540_s0 + $0x108] sm:$0xff]  ;;  %v79_v28 = vld [vmem:[%s8540_s0 + $0x110] sm:$0xff] }
  0x47   :  { %v262_v27 = vld [vmem:[%s8540_s0 + $0x6c8] sm:$0xff]  ;;  %v263_v29 = vld [vmem:[%s8540_s0 + $0x6d0] sm:$0xff]  ;;  %v80_v30 = vld [vmem:[%s8540_s0 + $0x118] sm:$0xff] }
  0x48   :  { %4704 = vmatmul.mubr.f32.gmra.mrb[18].mxu0 %v64_v62  ;;  %4980 = vmatmul.mubr.f32.gmra.mrb[18].mxu1 %v248_v63  ;;  %v264_v31 = vld [vmem:[%s8540_s0 + $0x6d8] sm:$0xff]  ;;  %v81_v32 = vld [vmem:[%s8540_s0 + $0x120] sm:$0xff]  ;;  %v82_v34 = vld [vmem:[%s8540_s0 + $0x128] sm:$0xff] }
  0x49   :  { %4706 = vmatprep.mubr.f32.mxu0 %v65_v0  ;;  %4982 = vmatprep.mubr.f32.mxu1 %v249_v1  ;;  %v265_v33 = vld [vmem:[%s8540_s0 + $0x6e0] sm:$0xff]  ;;  %v266_v35 = vld [vmem:[%s8540_s0 + $0x6e8] sm:$0xff]  ;;  %v83_v36 = vld [vmem:[%s8540_s0 + $0x130] sm:$0xff] }
  0x4a   :  { %v267_v37 = vld [vmem:[%s8540_s0 + $0x6f0] sm:$0xff]  ;;  %v84_v38 = vld [vmem:[%s8540_s0 + $0x138] sm:$0xff]  ;;  %v85_v40 = vld [vmem:[%s8540_s0 + $0x140] sm:$0xff] }
  0x4b   :  { %v268_v39 = vld [vmem:[%s8540_s0 + $0x6f8] sm:$0xff]  ;;  %v269_v41 = vld [vmem:[%s8540_s0 + $0x700] sm:$0xff]  ;;  %v86_v42 = vld [vmem:[%s8540_s0 + $0x148] sm:$0xff] }
  0x4c   :  { %4707 = vmatmul.mubr.f32.gmra.mrb[20].mxu0 %v66_v2  ;;  %4983 = vmatmul.mubr.f32.gmra.mrb[20].mxu1 %v250_v3  ;;  %v270_v43 = vld [vmem:[%s8540_s0 + $0x708] sm:$0xff]  ;;  %v87_v44 = vld [vmem:[%s8540_s0 + $0x150] sm:$0xff]  ;;  %v88_v46 = vld [vmem:[%s8540_s0 + $0x158] sm:$0xff] }
  0x4d   :  { %4709 = vmatprep.mubr.f32.mxu0 %v67_v4  ;;  %4985 = vmatprep.mubr.f32.mxu1 %v251_v5  ;;  %v271_v45 = vld [vmem:[%s8540_s0 + $0x710] sm:$0xff]  ;;  %v272_v47 = vld [vmem:[%s8540_s0 + $0x718] sm:$0xff]  ;;  %v89_v48 = vld [vmem:[%s8540_s0 + $0x160] sm:$0xff] }
  0x4e   :  { %v273_v49 = vld [vmem:[%s8540_s0 + $0x720] sm:$0xff]  ;;  %v90_v50 = vld [vmem:[%s8540_s0 + $0x168] sm:$0xff]  ;;  %v91_v52 = vld [vmem:[%s8540_s0 + $0x170] sm:$0xff] }
  0x4f   :  { %v274_v51 = vld [vmem:[%s8540_s0 + $0x728] sm:$0xff]  ;;  %v275_v53 = vld [vmem:[%s8540_s0 + $0x730] sm:$0xff]  ;;  %v92_v54 = vld [vmem:[%s8540_s0 + $0x178] sm:$0xff] }
  0x50   :  { %4710 = vmatmul.mubr.f32.gmra.mrb[22].mxu0 %v68_v6  ;;  %4986 = vmatmul.mubr.f32.gmra.mrb[22].mxu1 %v252_v7  ;;  %v276_v55 = vld [vmem:[%s8540_s0 + $0x738] sm:$0xff]  ;;  %v93_v56 = vld [vmem:[%s8540_s0 + $0x180] sm:$0xff]  ;;  %v94_v58 = vld [vmem:[%s8540_s0 + $0x188] sm:$0xff] }
  0x51   :  { %4712 = vmatprep.mubr.f32.mxu0 %v69_v8  ;;  %4988 = vmatprep.mubr.f32.mxu1 %v253_v9  ;;  %v277_v57 = vld [vmem:[%s8540_s0 + $0x740] sm:$0xff]  ;;  %v278_v59 = vld [vmem:[%s8540_s0 + $0x748] sm:$0xff]  ;;  %v95_v60 = vld [vmem:[%s8540_s0 + $0x190] sm:$0xff] }
  0x52   :  { %v279_v61 = vld [vmem:[%s8540_s0 + $0x750] sm:$0xff]  ;;  %v96_v62 = vld [vmem:[%s8540_s0 + $0x198] sm:$0xff]  ;;  %v97_v0 = vld [vmem:[%s8540_s0 + $0x1a0] sm:$0xff] }
  0x53   :  { %v280_v63 = vld [vmem:[%s8540_s0 + $0x758] sm:$0xff]  ;;  %v281_v1 = vld [vmem:[%s8540_s0 + $0x760] sm:$0xff]  ;;  %v98_v2 = vld [vmem:[%s8540_s0 + $0x1a8] sm:$0xff] }
  0x54   :  { %4713 = vmatmul.mubr.f32.gmra.mrb[24].mxu0 %v70_v10  ;;  %4989 = vmatmul.mubr.f32.gmra.mrb[24].mxu1 %v254_v11  ;;  %v282_v3 = vld [vmem:[%s8540_s0 + $0x768] sm:$0xff]  ;;  %v99_v4 = vld [vmem:[%s8540_s0 + $0x1b0] sm:$0xff]  ;;  %v100_v6 = vld [vmem:[%s8540_s0 + $0x1b8] sm:$0xff] }
  0x55   :  { %4715 = vmatprep.mubr.f32.mxu0 %v71_v12  ;;  %4991 = vmatprep.mubr.f32.mxu1 %v255_v13  ;;  %v283_v5 = vld [vmem:[%s8540_s0 + $0x770] sm:$0xff]  ;;  %v284_v7 = vld [vmem:[%s8540_s0 + $0x778] sm:$0xff]  ;;  %v101_v8 = vld [vmem:[%s8540_s0 + $0x1c0] sm:$0xff] }
  0x56   :  { %v285_v9 = vld [vmem:[%s8540_s0 + $0x780] sm:$0xff]  ;;  %v102_v10 = vld [vmem:[%s8540_s0 + $0x1c8] sm:$0xff]  ;;  %v103_v12 = vld [vmem:[%s8540_s0 + $0x1d0] sm:$0xff] }
  0x57   :  { %v286_v11 = vld [vmem:[%s8540_s0 + $0x788] sm:$0xff]  ;;  %v287_v13 = vld [vmem:[%s8540_s0 + $0x790] sm:$0xff] }
  0x58   :  { %4716 = vmatmul.mubr.f32.gmra.mrb[26].mxu0 %v72_v14  ;;  %4992 = vmatmul.mubr.f32.gmra.mrb[26].mxu1 %v256_v15  ;;  %v104_v14 = vld [vmem:[%s8540_s0 + $0x1d8] sm:$0xff] }
  0x59   :  { %4718 = vmatprep.mubr.f32.mxu0 %v73_v16  ;;  %4994 = vmatprep.mubr.f32.mxu1 %v257_v17  ;;  %v288_v15 = vld [vmem:[%s8540_s0 + $0x798] sm:$0xff]  ;;  %v105_v16 = vld [vmem:[%s8540_s0 + $0x1e0] sm:$0xff] }
  0x5a   :  { %v289_v17 = vld [vmem:[%s8540_s0 + $0x7a0] sm:$0xff] }
  0x5c   :  { %4719 = vmatmul.mubr.f32.gmra.mrb[28].mxu0 %v74_v18  ;;  %4995 = vmatmul.mubr.f32.gmra.mrb[28].mxu1 %v258_v19  ;;  %v106_v18 = vld [vmem:[%s8540_s0 + $0x1e8] sm:$0xff] }
  0x5d   :  { %4721 = vmatprep.mubr.f32.mxu0 %v75_v20  ;;  %4997 = vmatprep.mubr.f32.mxu1 %v259_v21  ;;  %v290_v19 = vld [vmem:[%s8540_s0 + $0x7a8] sm:$0xff]  ;;  %v107_v20 = vld [vmem:[%s8540_s0 + $0x1f0] sm:$0xff] }
  0x5e   :  { %v291_v21 = vld [vmem:[%s8540_s0 + $0x7b0] sm:$0xff] }
  0x60   :  { %4722 = vmatmul.mubr.f32.gmra.mrb[30].mxu0 %v76_v22  ;;  %4998 = vmatmul.mubr.f32.gmra.mrb[30].mxu1 %v260_v23  ;;  %v108_v22 = vld [vmem:[%s8540_s0 + $0x1f8] sm:$0xff] }
  0x61   :  { %4724 = vmatprep.mubr.f32.mxu0 %v77_v24  ;;  %5000 = vmatprep.mubr.f32.mxu1 %v261_v25  ;;  %v292_v23 = vld [vmem:[%s8540_s0 + $0x7b8] sm:$0xff]  ;;  %v109_v24 = vld [vmem:[%s8540_s0 + $0x200] sm:$0xff] }
  0x62   :  { %v293_v25 = vld [vmem:[%s8540_s0 + $0x7c0] sm:$0xff] }
  0x64   :  { %4725 = vmatmul.mubr.f32.gmra.mrb[32].mxu0 %v78_v26  ;;  %5001 = vmatmul.mubr.f32.gmra.mrb[32].mxu1 %v262_v27  ;;  %v110_v26 = vld [vmem:[%s8540_s0 + $0x208] sm:$0xff] }
  0x65   :  { %4727 = vmatprep.mubr.f32.mxu0 %v79_v28  ;;  %5003 = vmatprep.mubr.f32.mxu1 %v263_v29  ;;  %v294_v27 = vld [vmem:[%s8540_s0 + $0x7c8] sm:$0xff]  ;;  %v111_v28 = vld [vmem:[%s8540_s0 + $0x210] sm:$0xff] }
  0x66   :  { %v295_v29 = vld [vmem:[%s8540_s0 + $0x7d0] sm:$0xff] }
  0x68   :  { %4728 = vmatmul.mubr.f32.gmra.mrb[34].mxu0 %v80_v30  ;;  %5004 = vmatmul.mubr.f32.gmra.mrb[34].mxu1 %v264_v31  ;;  %v112_v30 = vld [vmem:[%s8540_s0 + $0x218] sm:$0xff] }
  0x69   :  { %4730 = vmatprep.mubr.f32.mxu0 %v81_v32  ;;  %5006 = vmatprep.mubr.f32.mxu1 %v265_v33  ;;  %v296_v31 = vld [vmem:[%s8540_s0 + $0x7d8] sm:$0xff]  ;;  %v113_v32 = vld [vmem:[%s8540_s0 + $0x220] sm:$0xff] }
  0x6a   :  { %v297_v33 = vld [vmem:[%s8540_s0 + $0x7e0] sm:$0xff] }
  0x6c   :  { %4731 = vmatmul.mubr.f32.gmra.mrb[36].mxu0 %v82_v34  ;;  %5007 = vmatmul.mubr.f32.gmra.mrb[36].mxu1 %v266_v35  ;;  %v114_v34 = vld [vmem:[%s8540_s0 + $0x228] sm:$0xff] }
  0x6d   :  { %4733 = vmatprep.mubr.f32.mxu0 %v83_v36  ;;  %5009 = vmatprep.mubr.f32.mxu1 %v267_v37  ;;  %v298_v35 = vld [vmem:[%s8540_s0 + $0x7e8] sm:$0xff]  ;;  %v115_v36 = vld [vmem:[%s8540_s0 + $0x230] sm:$0xff] }
  0x6e   :  { %v299_v37 = vld [vmem:[%s8540_s0 + $0x7f0] sm:$0xff] }
  0x70   :  { %4734 = vmatmul.mubr.f32.gmra.mrb[38].mxu0 %v84_v38  ;;  %5010 = vmatmul.mubr.f32.gmra.mrb[38].mxu1 %v268_v39  ;;  %v116_v38 = vld [vmem:[%s8540_s0 + $0x238] sm:$0xff] }
  0x71   :  { %4736 = vmatprep.mubr.f32.mxu0 %v85_v40  ;;  %5012 = vmatprep.mubr.f32.mxu1 %v269_v41  ;;  %v300_v39 = vld [vmem:[%s8540_s0 + $0x7f8] sm:$0xff]  ;;  %v117_v40 = vld [vmem:[%s8540_s0 + $0x240] sm:$0xff] }
  0x72   :  { %v301_v41 = vld [vmem:[%s8540_s0 + $0x800] sm:$0xff] }
  0x74   :  { %4737 = vmatmul.mubr.f32.gmra.mrb[40].mxu0 %v86_v42  ;;  %5013 = vmatmul.mubr.f32.gmra.mrb[40].mxu1 %v270_v43  ;;  %v118_v42 = vld [vmem:[%s8540_s0 + $0x248] sm:$0xff] }
  0x75   :  { %4739 = vmatprep.mubr.f32.mxu0 %v87_v44  ;;  %5015 = vmatprep.mubr.f32.mxu1 %v271_v45  ;;  %v302_v43 = vld [vmem:[%s8540_s0 + $0x808] sm:$0xff]  ;;  %v119_v44 = vld [vmem:[%s8540_s0 + $0x250] sm:$0xff] }
  0x76   :  { %v303_v45 = vld [vmem:[%s8540_s0 + $0x810] sm:$0xff] }
  0x78   :  { %4740 = vmatmul.mubr.f32.gmra.mrb[42].mxu0 %v88_v46  ;;  %5016 = vmatmul.mubr.f32.gmra.mrb[42].mxu1 %v272_v47  ;;  %v120_v46 = vld [vmem:[%s8540_s0 + $0x258] sm:$0xff] }
  0x79   :  { %4742 = vmatprep.mubr.f32.mxu0 %v89_v48  ;;  %5018 = vmatprep.mubr.f32.mxu1 %v273_v49  ;;  %v304_v47 = vld [vmem:[%s8540_s0 + $0x818] sm:$0xff]  ;;  %v121_v48 = vld [vmem:[%s8540_s0 + $0x260] sm:$0xff] }
  0x7a   :  { %v305_v49 = vld [vmem:[%s8540_s0 + $0x820] sm:$0xff] }
  0x7c   :  { %4743 = vmatmul.mubr.f32.gmra.mrb[44].mxu0 %v90_v50  ;;  %5019 = vmatmul.mubr.f32.gmra.mrb[44].mxu1 %v274_v51  ;;  %v122_v50 = vld [vmem:[%s8540_s0 + $0x268] sm:$0xff] }
  0x7d   :  { %4745 = vmatprep.mubr.f32.mxu0 %v91_v52  ;;  %5021 = vmatprep.mubr.f32.mxu1 %v275_v53  ;;  %v306_v51 = vld [vmem:[%s8540_s0 + $0x828] sm:$0xff]  ;;  %v123_v52 = vld [vmem:[%s8540_s0 + $0x270] sm:$0xff] }
  0x7e   :  { %v307_v53 = vld [vmem:[%s8540_s0 + $0x830] sm:$0xff] }
  0x80   :  { %4746 = vmatmul.mubr.f32.gmra.mrb[46].mxu0 %v92_v54  ;;  %5022 = vmatmul.mubr.f32.gmra.mrb[46].mxu1 %v276_v55  ;;  %v124_v54 = vld [vmem:[%s8540_s0 + $0x278] sm:$0xff] }
  0x81   :  { %4748 = vmatprep.mubr.f32.mxu0 %v93_v56  ;;  %5024 = vmatprep.mubr.f32.mxu1 %v277_v57  ;;  %v308_v55 = vld [vmem:[%s8540_s0 + $0x838] sm:$0xff]  ;;  %v125_v56 = vld [vmem:[%s8540_s0 + $0x280] sm:$0xff] }
  0x82   :  { %v309_v57 = vld [vmem:[%s8540_s0 + $0x840] sm:$0xff] }
  0x84   :  { %4749 = vmatmul.mubr.f32.gmra.mrb[48].mxu0 %v94_v58  ;;  %5025 = vmatmul.mubr.f32.gmra.mrb[48].mxu1 %v278_v59  ;;  %v126_v58 = vld [vmem:[%s8540_s0 + $0x288] sm:$0xff] }
  0x85   :  { %4751 = vmatprep.mubr.f32.mxu0 %v95_v60  ;;  %5027 = vmatprep.mubr.f32.mxu1 %v279_v61  ;;  %v310_v59 = vld [vmem:[%s8540_s0 + $0x848] sm:$0xff]  ;;  %v127_v60 = vld [vmem:[%s8540_s0 + $0x290] sm:$0xff] }
  0x86   :  { %v311_v61 = vld [vmem:[%s8540_s0 + $0x850] sm:$0xff] }
  0x88   :  { %4752 = vmatmul.mubr.f32.gmra.mrb[50].mxu0 %v96_v62  ;;  %5028 = vmatmul.mubr.f32.gmra.mrb[50].mxu1 %v280_v63  ;;  %v128_v62 = vld [vmem:[%s8540_s0 + $0x298] sm:$0xff] }
  0x89   :  { %4754 = vmatprep.mubr.f32.mxu0 %v97_v0  ;;  %5030 = vmatprep.mubr.f32.mxu1 %v281_v1  ;;  %v312_v63 = vld [vmem:[%s8540_s0 + $0x858] sm:$0xff]  ;;  %v129_v0 = vld [vmem:[%s8540_s0 + $0x2a0] sm:$0xff] }
  0x8a   :  { %v313_v1 = vld [vmem:[%s8540_s0 + $0x860] sm:$0xff] }
  0x8c   :  { %4755 = vmatmul.mubr.f32.gmra.mrb[52].mxu0 %v98_v2  ;;  %5031 = vmatmul.mubr.f32.gmra.mrb[52].mxu1 %v282_v3  ;;  %v130_v2 = vld [vmem:[%s8540_s0 + $0x2a8] sm:$0xff] }
  0x8d   :  { %4757 = vmatprep.mubr.f32.mxu0 %v99_v4  ;;  %5033 = vmatprep.mubr.f32.mxu1 %v283_v5  ;;  %v314_v3 = vld [vmem:[%s8540_s0 + $0x868] sm:$0xff]  ;;  %v131_v4 = vld [vmem:[%s8540_s0 + $0x2b0] sm:$0xff] }
  0x8e   :  { %v315_v5 = vld [vmem:[%s8540_s0 + $0x870] sm:$0xff] }
  0x90   :  { %4758 = vmatmul.mubr.f32.gmra.mrb[54].mxu0 %v100_v6  ;;  %5034 = vmatmul.mubr.f32.gmra.mrb[54].mxu1 %v284_v7  ;;  %v132_v6 = vld [vmem:[%s8540_s0 + $0x2b8] sm:$0xff] }
  0x91   :  { %4760 = vmatprep.mubr.f32.mxu0 %v101_v8  ;;  %5036 = vmatprep.mubr.f32.mxu1 %v285_v9  ;;  %v316_v7 = vld [vmem:[%s8540_s0 + $0x878] sm:$0xff]  ;;  %v133_v8 = vld [vmem:[%s8540_s0 + $0x2c0] sm:$0xff] }
  0x92   :  { %v317_v9 = vld [vmem:[%s8540_s0 + $0x880] sm:$0xff] }
  0x94   :  { %4761 = vmatmul.mubr.f32.gmra.mrb[56].mxu0 %v102_v10  ;;  %5037 = vmatmul.mubr.f32.gmra.mrb[56].mxu1 %v286_v11  ;;  %v134_v10 = vld [vmem:[%s8540_s0 + $0x2c8] sm:$0xff] }
  0x95   :  { %4763 = vmatprep.mubr.f32.mxu0 %v103_v12  ;;  %5039 = vmatprep.mubr.f32.mxu1 %v287_v13  ;;  %v318_v11 = vld [vmem:[%s8540_s0 + $0x888] sm:$0xff]  ;;  %v135_v12 = vld [vmem:[%s8540_s0 + $0x2d0] sm:$0xff] }
  0x96   :  { %v319_v13 = vld [vmem:[%s8540_s0 + $0x890] sm:$0xff] }
  0x98   :  { %4764 = vmatmul.mubr.f32.gmra.mrb[58].mxu0 %v104_v14  ;;  %5040 = vmatmul.mubr.f32.gmra.mrb[58].mxu1 %v288_v15  ;;  %v136_v14 = vld [vmem:[%s8540_s0 + $0x2d8] sm:$0xff] }
  0x99   :  { %4766 = vmatprep.mubr.f32.mxu0 %v105_v16  ;;  %5042 = vmatprep.mubr.f32.mxu1 %v289_v17  ;;  %v320_v15 = vld [vmem:[%s8540_s0 + $0x898] sm:$0xff]  ;;  %v137_v16 = vld [vmem:[%s8540_s0 + $0x2e0] sm:$0xff] }
  0x9a   :  { %v321_v17 = vld [vmem:[%s8540_s0 + $0x8a0] sm:$0xff] }
  0x9c   :  { %4767 = vmatmul.mubr.f32.gmra.mrb[60].mxu0 %v106_v18  ;;  %5043 = vmatmul.mubr.f32.gmra.mrb[60].mxu1 %v290_v19  ;;  %v138_v18 = vld [vmem:[%s8540_s0 + $0x2e8] sm:$0xff] }
  0x9d   :  { %4769 = vmatprep.mubr.f32.mxu0 %v107_v20  ;;  %5045 = vmatprep.mubr.f32.mxu1 %v291_v21  ;;  %v322_v19 = vld [vmem:[%s8540_s0 + $0x8a8] sm:$0xff]  ;;  %v139_v20 = vld [vmem:[%s8540_s0 + $0x2f0] sm:$0xff] }
  0x9e   :  { %v323_v21 = vld [vmem:[%s8540_s0 + $0x8b0] sm:$0xff] }
  0xa0   :  { %4770 = vmatmul.mubr.f32.gmra.mrb[62].mxu0 %v108_v22  ;;  %5046 = vmatmul.mubr.f32.gmra.mrb[62].mxu1 %v292_v23  ;;  %v140_v22 = vld [vmem:[%s8540_s0 + $0x2f8] sm:$0xff] }
  0xa1   :  { %4772 = vmatprep.mubr.f32.mxu0 %v109_v24  ;;  %5048 = vmatprep.mubr.f32.mxu1 %v293_v25  ;;  %v324_v23 = vld [vmem:[%s8540_s0 + $0x8b8] sm:$0xff]  ;;  %v141_v24 = vld [vmem:[%s8540_s0 + $0x300] sm:$0xff] }
  0xa2   :  { %v325_v25 = vld [vmem:[%s8540_s0 + $0x8c0] sm:$0xff] }
  0xa4   :  { %4773 = vmatmul.mubr.f32.gmra.mrb[64].mxu0 %v110_v26  ;;  %5049 = vmatmul.mubr.f32.gmra.mrb[64].mxu1 %v294_v27  ;;  %v142_v26 = vld [vmem:[%s8540_s0 + $0x308] sm:$0xff] }
  0xa5   :  { %4775 = vmatprep.mubr.f32.mxu0 %v111_v28  ;;  %5051 = vmatprep.mubr.f32.mxu1 %v295_v29  ;;  %v326_v27 = vld [vmem:[%s8540_s0 + $0x8c8] sm:$0xff]  ;;  %v143_v28 = vld [vmem:[%s8540_s0 + $0x310] sm:$0xff] }
  0xa6   :  { %v327_v29 = vld [vmem:[%s8540_s0 + $0x8d0] sm:$0xff] }
  0xa8   :  { %4776 = vmatmul.mubr.f32.gmra.mrb[66].mxu0 %v112_v30  ;;  %5052 = vmatmul.mubr.f32.gmra.mrb[66].mxu1 %v296_v31  ;;  %v144_v30 = vld [vmem:[%s8540_s0 + $0x318] sm:$0xff] }
  0xa9   :  { %4778 = vmatprep.mubr.f32.mxu0 %v113_v32  ;;  %5054 = vmatprep.mubr.f32.mxu1 %v297_v33  ;;  %v328_v31 = vld [vmem:[%s8540_s0 + $0x8d8] sm:$0xff]  ;;  %v145_v32 = vld [vmem:[%s8540_s0 + $0x320] sm:$0xff] }
  0xaa   :  { %v329_v33 = vld [vmem:[%s8540_s0 + $0x8e0] sm:$0xff] }
  0xac   :  { %4779 = vmatmul.mubr.f32.gmra.mrb[68].mxu0 %v114_v34  ;;  %5055 = vmatmul.mubr.f32.gmra.mrb[68].mxu1 %v298_v35  ;;  %v146_v34 = vld [vmem:[%s8540_s0 + $0x328] sm:$0xff] }
  0xad   :  { %4781 = vmatprep.mubr.f32.mxu0 %v115_v36  ;;  %5057 = vmatprep.mubr.f32.mxu1 %v299_v37  ;;  %v330_v35 = vld [vmem:[%s8540_s0 + $0x8e8] sm:$0xff]  ;;  %v147_v36 = vld [vmem:[%s8540_s0 + $0x330] sm:$0xff] }
  0xae   :  { %v331_v37 = vld [vmem:[%s8540_s0 + $0x8f0] sm:$0xff] }
  0xb0   :  { %4782 = vmatmul.mubr.f32.gmra.mrb[70].mxu0 %v116_v38  ;;  %5058 = vmatmul.mubr.f32.gmra.mrb[70].mxu1 %v300_v39  ;;  %v148_v38 = vld [vmem:[%s8540_s0 + $0x338] sm:$0xff] }
  0xb1   :  { %4784 = vmatprep.mubr.f32.mxu0 %v117_v40  ;;  %5060 = vmatprep.mubr.f32.mxu1 %v301_v41  ;;  %v332_v39 = vld [vmem:[%s8540_s0 + $0x8f8] sm:$0xff]  ;;  %v149_v40 = vld [vmem:[%s8540_s0 + $0x340] sm:$0xff]  ;;  %v150_v41 = vld [vmem:[%s8540_s0 + $0x348] sm:$0xff] }
  0xb4   :  { %4785 = vmatmul.mubr.f32.gmra.mrb[72].mxu0 %v118_v42  ;;  %5061 = vmatmul.mubr.f32.gmra.mrb[72].mxu1 %v302_v43  ;;  %v151_v42 = vld [vmem:[%s8540_s0 + $0x350] sm:$0xff]  ;;  %v152_v43 = vld [vmem:[%s8540_s0 + $0x358] sm:$0xff] }
  0xb5   :  { %4787 = vmatprep.mubr.f32.mxu0 %v119_v44  ;;  %5063 = vmatprep.mubr.f32.mxu1 %v303_v45  ;;  %v153_v44 = vld [vmem:[%s8540_s0 + $0x360] sm:$0xff] }
  0xb8   :  { %4788 = vmatmul.mubr.f32.gmra.mrb[74].mxu0 %v120_v46  ;;  %5064 = vmatmul.mubr.f32.gmra.mrb[74].mxu1 %v304_v47 }
  0xb9   :  { %4790 = vmatprep.mubr.f32.mxu0 %v121_v48  ;;  %5066 = vmatprep.mubr.f32.mxu1 %v305_v49  ;;  %v154_v49 = vld [vmem:[%s8540_s0 + $0x368] sm:$0xff] }
  0xbc   :  { %4791 = vmatmul.mubr.f32.gmra.mrb[76].mxu0 %v122_v50  ;;  %5067 = vmatmul.mubr.f32.gmra.mrb[76].mxu1 %v306_v51  ;;  %v155_v50 = vld [vmem:[%s8540_s0 + $0x370] sm:$0xff] }
  0xbd   :  { %4793 = vmatprep.mubr.f32.mxu0 %v123_v52  ;;  %5069 = vmatprep.mubr.f32.mxu1 %v307_v53 }
  0xc0   :  { %4794 = vmatmul.mubr.f32.gmra.mrb[78].mxu0 %v124_v54  ;;  %5070 = vmatmul.mubr.f32.gmra.mrb[78].mxu1 %v308_v55  ;;  %v156_v55 = vld [vmem:[%s8540_s0 + $0x378] sm:$0xff] }
  0xc1   :  { %4796 = vmatprep.mubr.f32.mxu0 %v125_v56  ;;  %5072 = vmatprep.mubr.f32.mxu1 %v309_v57  ;;  %v157_v56 = vld [vmem:[%s8540_s0 + $0x380] sm:$0xff] }
  0xc4   :  { %4797 = vmatmul.mubr.f32.gmra.mrb[80].mxu0 %v126_v58  ;;  %5073 = vmatmul.mubr.f32.gmra.mrb[80].mxu1 %v310_v59 }
  0xc5   :  { %4799 = vmatprep.mubr.f32.mxu0 %v127_v60  ;;  %5075 = vmatprep.mubr.f32.mxu1 %v311_v61  ;;  %v158_v61 = vld [vmem:[%s8540_s0 + $0x388] sm:$0xff] }
  0xc8   :  { %4800 = vmatmul.mubr.f32.gmra.mrb[82].mxu0 %v128_v62  ;;  %5076 = vmatmul.mubr.f32.gmra.mrb[82].mxu1 %v312_v63  ;;  %v159_v62 = vld [vmem:[%s8540_s0 + $0x390] sm:$0xff] }
  0xc9   :  { %4802 = vmatprep.mubr.f32.mxu0 %v129_v0  ;;  %5078 = vmatprep.mubr.f32.mxu1 %v313_v1 }
  0xcc   :  { %4803 = vmatmul.mubr.f32.gmra.mrb[84].mxu0 %v130_v2  ;;  %5079 = vmatmul.mubr.f32.gmra.mrb[84].mxu1 %v314_v3  ;;  %v160_v3 = vld [vmem:[%s8540_s0 + $0x398] sm:$0xff] }
  0xcd   :  { %4805 = vmatprep.mubr.f32.mxu0 %v131_v4  ;;  %5081 = vmatprep.mubr.f32.mxu1 %v315_v5  ;;  %v161_v4 = vld [vmem:[%s8540_s0 + $0x3a0] sm:$0xff] }
  0xd0   :  { %4806 = vmatmul.mubr.f32.gmra.mrb[86].mxu0 %v132_v6  ;;  %5082 = vmatmul.mubr.f32.gmra.mrb[86].mxu1 %v316_v7 }
  0xd1   :  { %4808 = vmatprep.mubr.f32.mxu0 %v133_v8  ;;  %5084 = vmatprep.mubr.f32.mxu1 %v317_v9  ;;  %v162_v9 = vld [vmem:[%s8540_s0 + $0x3a8] sm:$0xff] }
  0xd4   :  { %4809 = vmatmul.mubr.f32.gmra.mrb[88].mxu0 %v134_v10  ;;  %5085 = vmatmul.mubr.f32.gmra.mrb[88].mxu1 %v318_v11  ;;  %v163_v10 = vld [vmem:[%s8540_s0 + $0x3b0] sm:$0xff] }
  0xd5   :  { %4811 = vmatprep.mubr.f32.mxu0 %v135_v12  ;;  %5087 = vmatprep.mubr.f32.mxu1 %v319_v13 }
  0xd8   :  { %4812 = vmatmul.mubr.f32.gmra.mrb[90].mxu0 %v136_v14  ;;  %5088 = vmatmul.mubr.f32.gmra.mrb[90].mxu1 %v320_v15  ;;  %v164_v15 = vld [vmem:[%s8540_s0 + $0x3b8] sm:$0xff] }
  0xd9   :  { %4814 = vmatprep.mubr.f32.mxu0 %v137_v16  ;;  %5090 = vmatprep.mubr.f32.mxu1 %v321_v17  ;;  %v165_v16 = vld [vmem:[%s8540_s0 + $0x3c0] sm:$0xff] }
  0xdc   :  { %4815 = vmatmul.mubr.f32.gmra.mrb[92].mxu0 %v138_v18  ;;  %5091 = vmatmul.mubr.f32.gmra.mrb[92].mxu1 %v322_v19 }
  0xdd   :  { %4817 = vmatprep.mubr.f32.mxu0 %v139_v20  ;;  %5093 = vmatprep.mubr.f32.mxu1 %v323_v21  ;;  %v166_v21 = vld [vmem:[%s8540_s0 + $0x3c8] sm:$0xff] }
  0xe0   :  { %4818 = vmatmul.mubr.f32.gmra.mrb[94].mxu0 %v140_v22  ;;  %5094 = vmatmul.mubr.f32.gmra.mrb[94].mxu1 %v324_v23  ;;  %v167_v22 = vld [vmem:[%s8540_s0 + $0x3d0] sm:$0xff] }
  0xe1   :  { %4820 = vmatprep.mubr.f32.mxu0 %v141_v24  ;;  %5096 = vmatprep.mubr.f32.mxu1 %v325_v25 }
  0xe4   :  { %4821 = vmatmul.mubr.f32.gmra.mrb[96].mxu0 %v142_v26  ;;  %5097 = vmatmul.mubr.f32.gmra.mrb[96].mxu1 %v326_v27  ;;  %v168_v27 = vld [vmem:[%s8540_s0 + $0x3d8] sm:$0xff] }
  0xe5   :  { %4823 = vmatprep.mubr.f32.mxu0 %v143_v28  ;;  %5099 = vmatprep.mubr.f32.mxu1 %v327_v29  ;;  %v169_v28 = vld [vmem:[%s8540_s0 + $0x3e0] sm:$0xff] }
  0xe8   :  { %4824 = vmatmul.mubr.f32.gmra.mrb[98].mxu0 %v144_v30  ;;  %5100 = vmatmul.mubr.f32.gmra.mrb[98].mxu1 %v328_v31 }
  0xe9   :  { %4826 = vmatprep.mubr.f32.mxu0 %v145_v32  ;;  %5102 = vmatprep.mubr.f32.mxu1 %v329_v33  ;;  %v170_v33 = vld [vmem:[%s8540_s0 + $0x3e8] sm:$0xff] }
  0xec   :  { %4827 = vmatmul.mubr.f32.gmra.mrb[100].mxu0 %v146_v34  ;;  %5103 = vmatmul.mubr.f32.gmra.mrb[100].mxu1 %v330_v35  ;;  %v171_v34 = vld [vmem:[%s8540_s0 + $0x3f0] sm:$0xff] }
  0xed   :  { %4829 = vmatprep.mubr.f32.mxu0 %v147_v36  ;;  %5105 = vmatprep.mubr.f32.mxu1 %v331_v37 }
  0xf0   :  { %4830 = vmatmul.mubr.f32.gmra.mrb[102].mxu0 %v148_v38  ;;  %5106 = vmatmul.mubr.f32.gmra.mrb[102].mxu1 %v332_v39  ;;  %v172_v39 = vld [vmem:[%s8540_s0 + $0x3f8] sm:$0xff] }
  0xf1   :  { %4832 = vmatprep.mubr.f32.mxu0 %v149_v40  ;;  %v173_v40 = vld [vmem:[%s8540_s0 + $0x400] sm:$0xff] }
  0xf4   :  { %4833 = vmatmul.mubr.f32.gmra.mrb[104].mxu0 %v150_v41 }
  0xf5   :  { %4835 = vmatprep.mubr.f32.mxu0 %v151_v42 }
  0xf7   :  { %v6331_v45 = vpop.f32.mrb[0].mxu0  ;;  %v6333_v46 = vpop.f32.mrb[0].mxu1 }
  0xf8   :  { %v6335_v47 = vpop.f32.mrb[1].mxu0  ;;  %4836 = vmatmul.mubr.f32.gmra.mrb[106].mxu0 %v152_v43  ;;  %v6337_v48 = vpop.f32.mrb[1].mxu1 }
  0xf9   :  { %4838 = vmatprep.mubr.f32.mxu0 %v153_v44 }
  0xfb   :  { %v6345_v51 = vpop.f32.mrb[2].mxu0  ;;  %v6347_v52 = vpop.f32.mrb[2].mxu1 }
  0xfc   :  { %v6349_v53 = vpop.f32.mrb[3].mxu0  ;;  %4839 = vmatmul.mubr.f32.gmra.mrb[108].mxu0 %v154_v49  ;;  %v6351_v54 = vpop.f32.mrb[3].mxu1  ;;  %v174_v49 = vld [vmem:[%s8540_s0 + $0x408] sm:$0xff] }
  0xfd   :  { %4841 = vmatprep.mubr.f32.mxu0 %v155_v50  ;;  %v175_v50 = vld [vmem:[%s8540_s0 + $0x410] sm:$0xff] }
  0xff   :  { %v6359_v57 = vpop.f32.mrb[4].mxu0  ;;  %v6361_v58 = vpop.f32.mrb[4].mxu1 }
 0x100   :  { %v6363_v59 = vpop.f32.mrb[5].mxu0  ;;  %4842 = vmatmul.mubr.f32.gmra.mrb[110].mxu0 %v156_v55  ;;  %v6365_v60 = vpop.f32.mrb[5].mxu1 }
 0x101   :  { %4844 = vmatprep.mubr.f32.mxu0 %v157_v56 }
 0x103   :  { %v6373_v63 = vpop.f32.mrb[6].mxu0  ;;  %v6375_v0 = vpop.f32.mrb[6].mxu1 }
 0x104   :  { %v6377_v1 = vpop.f32.mrb[7].mxu0  ;;  %4845 = vmatmul.mubr.f32.gmra.mrb[112].mxu0 %v158_v61  ;;  %v6379_v2 = vpop.f32.mrb[7].mxu1 }
 0x105   :  { %4847 = vmatprep.mubr.f32.mxu0 %v159_v62 }
 0x107   :  { %v6387_v5 = vpop.f32.mrb[8].mxu0  ;;  %v6389_v6 = vpop.f32.mrb[8].mxu1 }
 0x108   :  { %v6391_v7 = vpop.f32.mrb[9].mxu0  ;;  %4848 = vmatmul.mubr.f32.gmra.mrb[114].mxu0 %v160_v3  ;;  %v6393_v8 = vpop.f32.mrb[9].mxu1  ;;  %v176_v3 = vld [vmem:[%s8540_s0 + $0x418] sm:$0xff] }
 0x109   :  { %4850 = vmatprep.mubr.f32.mxu0 %v161_v4  ;;  %v177_v4 = vld [vmem:[%s8540_s0 + $0x420] sm:$0xff] }
 0x10b   :  { %v6401_v11 = vpop.f32.mrb[10].mxu0  ;;  %v6403_v12 = vpop.f32.mrb[10].mxu1 }
 0x10c   :  { %v6405_v13 = vpop.f32.mrb[11].mxu0  ;;  %4851 = vmatmul.mubr.f32.gmra.mrb[116].mxu0 %v162_v9  ;;  %v6407_v14 = vpop.f32.mrb[11].mxu1 }
 0x10d   :  { %4853 = vmatprep.mubr.f32.mxu0 %v163_v10 }
 0x10f   :  { %v6415_v17 = vpop.f32.mrb[12].mxu0  ;;  %v6417_v18 = vpop.f32.mrb[12].mxu1 }
 0x110   :  { %v6419_v19 = vpop.f32.mrb[13].mxu0  ;;  %4854 = vmatmul.mubr.f32.gmra.mrb[118].mxu0 %v164_v15  ;;  %v6421_v20 = vpop.f32.mrb[13].mxu1 }
 0x111   :  { %4856 = vmatprep.mubr.f32.mxu0 %v165_v16 }
 0x113   :  { %v6429_v23 = vpop.f32.mrb[14].mxu0  ;;  %v6431_v24 = vpop.f32.mrb[14].mxu1 }
 0x114   :  { %v6433_v25 = vpop.f32.mrb[15].mxu0  ;;  %4857 = vmatmul.mubr.f32.gmra.mrb[120].mxu0 %v166_v21  ;;  %v6435_v26 = vpop.f32.mrb[15].mxu1  ;;  %v178_v21 = vld [vmem:[%s8540_s0 + $0x428] sm:$0xff] }
 0x115   :  { %4859 = vmatprep.mubr.f32.mxu0 %v167_v22  ;;  %v179_v22 = vld [vmem:[%s8540_s0 + $0x430] sm:$0xff] }
 0x117   :  { %v6443_v29 = vpop.f32.mrb[16].mxu0  ;;  %v6445_v30 = vpop.f32.mrb[16].mxu1 }
 0x118   :  { %v6447_v31 = vpop.f32.mrb[17].mxu0  ;;  %4860 = vmatmul.mubr.f32.gmra.mrb[122].mxu0 %v168_v27  ;;  %v6449_v32 = vpop.f32.mrb[17].mxu1 }
 0x119   :  { %4862 = vmatprep.mubr.f32.mxu0 %v169_v28 }
 0x11b   :  { %v6457_v35 = vpop.f32.mrb[18].mxu0  ;;  %v6459_v36 = vpop.f32.mrb[18].mxu1 }
 0x11c   :  { %v6461_v37 = vpop.f32.mrb[19].mxu0  ;;  %4863 = vmatmul.mubr.f32.gmra.mrb[124].mxu0 %v170_v33  ;;  %v6463_v38 = vpop.f32.mrb[19].mxu1 }
 0x11d   :  { %4865 = vmatprep.mubr.f32.mxu0 %v171_v34 }
 0x11f   :  { %v6471_v41 = vpop.f32.mrb[20].mxu0  ;;  %v6473_v42 = vpop.f32.mrb[20].mxu1 }
 0x120   :  { %v6475_v43 = vpop.f32.mrb[21].mxu0  ;;  %4866 = vmatmul.mubr.f32.gmra.mrb[126].mxu0 %v172_v39  ;;  %v6477_v44 = vpop.f32.mrb[21].mxu1  ;;  %v180_v39 = vld [vmem:[%s8540_s0 + $0x438] sm:$0xff] }
 0x121   :  { %4868 = vmatprep.mubr.f32.mxu0 %v173_v40  ;;  %v181_v40 = vld [vmem:[%s8540_s0 + $0x440] sm:$0xff] }
 0x123   :  { %v6485_v55 = vpop.f32.mrb[22].mxu0  ;;  %v6487_v56 = vpop.f32.mrb[22].mxu1 }
 0x124   :  { %v6489_v61 = vpop.f32.mrb[23].mxu0  ;;  %4869 = vmatmul.mubr.f32.gmra.mrb[128].mxu0 %v174_v49  ;;  %v6491_v62 = vpop.f32.mrb[23].mxu1 }
 0x125   :  { %4871 = vmatprep.mubr.f32.mxu0 %v175_v50 }
 0x127   :  { %v6499_v9 = vpop.f32.mrb[24].mxu0  ;;  %v6501_v10 = vpop.f32.mrb[24].mxu1 }
 0x128   :  { %8566 = vst [vmem:[#allocation6_spill] sm:$0xff] %v6501_v10  ;;  %v6503_v15 = vpop.f32.mrb[25].mxu0  ;;  %4872 = vmatmul.mubr.f32.gmra.mrb[130].mxu0 %v176_v3  ;;  %v6505_v16 = vpop.f32.mrb[25].mxu1 }
 0x129   :  { %8567 = vst [vmem:[#allocation7_spill] sm:$0xff] %v6503_v15  ;;  %8568 = vst [vmem:[#allocation8_spill] sm:$0xff] %v6505_v16  ;;  %4874 = vmatprep.mubr.f32.mxu0 %v177_v4 }
 0x12b   :  { %v6513_v27 = vpop.f32.mrb[26].mxu0  ;;  %v6515_v28 = vpop.f32.mrb[26].mxu1 }
 0x12c   :  { %8569 = vst [vmem:[#allocation9_spill] sm:$0xff] %v6513_v27  ;;  %8570 = vst [vmem:[#allocation10_spill] sm:$0xff] %v6515_v28  ;;  %v6517_v33 = vpop.f32.mrb[27].mxu0  ;;  %4875 = vmatmul.mubr.f32.gmra.mrb[132].mxu0 %v178_v21  ;;  %v6519_v34 = vpop.f32.mrb[27].mxu1  ;;  %v182_v21 = vld [vmem:[%s8540_s0 + $0x448] sm:$0xff] }
 0x12d   :  { %8571 = vst [vmem:[#allocation11_spill] sm:$0xff] %v6517_v33  ;;  %8572 = vst [vmem:[#allocation12_spill] sm:$0xff] %v6519_v34  ;;  %4877 = vmatprep.mubr.f32.mxu0 %v179_v22  ;;  %v183_v22 = vld [vmem:[%s8540_s0 + $0x450] sm:$0xff] }
 0x12f   :  { %v6527_v49 = vpop.f32.mrb[28].mxu0  ;;  %v6529_v50 = vpop.f32.mrb[28].mxu1 }
 0x130   :  { %8573 = vst [vmem:[#allocation13_spill] sm:$0xff] %v6527_v49  ;;  %8574 = vst [vmem:[#allocation14_spill] sm:$0xff] %v6529_v50  ;;  %v6531_v3 = vpop.f32.mrb[29].mxu0  ;;  %4878 = vmatmul.mubr.f32.gmra.mrb[134].mxu0 %v180_v39  ;;  %v6533_v4 = vpop.f32.mrb[29].mxu1  ;;  %v184_v39 = vld [vmem:[%s8540_s0 + $0x458] sm:$0xff] }
 0x131   :  { %8575 = vst [vmem:[#allocation15_spill] sm:$0xff] %v6531_v3  ;;  %8576 = vst [vmem:[#allocation16_spill] sm:$0xff] %v6533_v4  ;;  %4880 = vmatprep.mubr.f32.mxu0 %v181_v40  ;;  %v185_v40 = vld [vmem:[%s8540_s0 + $0x460] sm:$0xff] }
 0x133   :  { %v6541_v34 = vpop.f32.mrb[30].mxu0  ;;  %v6543_v33 = vpop.f32.mrb[30].mxu1 }
 0x134   :  { %8577 = vst [vmem:[#allocation17_spill] sm:$0xff] %v6541_v34  ;;  %8578 = vst [vmem:[#allocation18_spill] sm:$0xff] %v6543_v33  ;;  %v6545_v49 = vpop.f32.mrb[31].mxu0  ;;  %4881 = vmatmul.mubr.f32.gmra.mrb[136].mxu0 %v182_v21  ;;  %v6547_v50 = vpop.f32.mrb[31].mxu1  ;;  %v186_v21 = vld [vmem:[%s8540_s0 + $0x468] sm:$0xff] }
 0x135   :  { %8579 = vst [vmem:[#allocation19_spill] sm:$0xff] %v6545_v49  ;;  %8580 = vst [vmem:[#allocation20_spill] sm:$0xff] %v6547_v50  ;;  %4883 = vmatprep.mubr.f32.mxu0 %v183_v22  ;;  %v187_v22 = vld [vmem:[%s8540_s0 + $0x470] sm:$0xff] }
 0x137   :  { %v6555_v4 = vpop.f32.mrb[32].mxu0  ;;  %v6557_v3 = vpop.f32.mrb[32].mxu1 }
 0x138   :  { %8581 = vst [vmem:[#allocation21_spill] sm:$0xff] %v6555_v4  ;;  %8582 = vst [vmem:[#allocation22_spill] sm:$0xff] %v6557_v3  ;;  %v6559_v34 = vpop.f32.mrb[33].mxu0  ;;  %4884 = vmatmul.mubr.f32.gmra.mrb[138].mxu0 %v184_v39  ;;  %v6561_v49 = vpop.f32.mrb[33].mxu1  ;;  %v188_v39 = vld [vmem:[%s8540_s0 + $0x478] sm:$0xff] }
 0x139   :  { %8583 = vst [vmem:[#allocation23_spill] sm:$0xff] %v6559_v34  ;;  %8584 = vst [vmem:[#allocation24_spill] sm:$0xff] %v6561_v49  ;;  %4886 = vmatprep.mubr.f32.mxu0 %v185_v40  ;;  %v189_v40 = vld [vmem:[%s8540_s0 + $0x480] sm:$0xff] }
 0x13b   :  { %v6569_v50 = vpop.f32.mrb[34].mxu0  ;;  %v6571_v33 = vpop.f32.mrb[34].mxu1 }
 0x13c   :  { %8585 = vst [vmem:[#allocation25_spill] sm:$0xff] %v6569_v50  ;;  %8586 = vst [vmem:[#allocation26_spill] sm:$0xff] %v6571_v33  ;;  %v6573_v4 = vpop.f32.mrb[35].mxu0  ;;  %4887 = vmatmul.mubr.f32.gmra.mrb[140].mxu0 %v186_v21  ;;  %v6575_v3 = vpop.f32.mrb[35].mxu1  ;;  %v190_v21 = vld [vmem:[%s8540_s0 + $0x488] sm:$0xff] }
 0x13d   :  { %8587 = vst [vmem:[#allocation27_spill] sm:$0xff] %v6573_v4  ;;  %8588 = vst [vmem:[#allocation28_spill] sm:$0xff] %v6575_v3  ;;  %4889 = vmatprep.mubr.f32.mxu0 %v187_v22  ;;  %v191_v22 = vld [vmem:[%s8540_s0 + $0x490] sm:$0xff] }
 0x13f   :  { %v6583_v49 = vpop.f32.mrb[36].mxu0  ;;  %v6585_v34 = vpop.f32.mrb[36].mxu1 }
 0x140   :  { %8589 = vst [vmem:[#allocation29_spill] sm:$0xff] %v6583_v49  ;;  %8590 = vst [vmem:[#allocation30_spill] sm:$0xff] %v6585_v34  ;;  %v6587_v50 = vpop.f32.mrb[37].mxu0  ;;  %4890 = vmatmul.mubr.f32.gmra.mrb[142].mxu0 %v188_v39  ;;  %v6589_v33 = vpop.f32.mrb[37].mxu1  ;;  %v192_v39 = vld [vmem:[%s8540_s0 + $0x498] sm:$0xff] }
 0x141   :  { %8591 = vst [vmem:[#allocation31_spill] sm:$0xff] %v6587_v50  ;;  %8592 = vst [vmem:[#allocation32_spill] sm:$0xff] %v6589_v33  ;;  %4892 = vmatprep.mubr.f32.mxu0 %v189_v40  ;;  %v193_v40 = vld [vmem:[%s8540_s0 + $0x4a0] sm:$0xff] }
 0x143   :  { %v6597_v3 = vpop.f32.mrb[38].mxu0  ;;  %v6599_v4 = vpop.f32.mrb[38].mxu1 }
 0x144   :  { %8593 = vst [vmem:[#allocation33_spill] sm:$0xff] %v6597_v3  ;;  %8594 = vst [vmem:[#allocation34_spill] sm:$0xff] %v6599_v4  ;;  %v6601_v49 = vpop.f32.mrb[39].mxu0  ;;  %4893 = vmatmul.mubr.f32.gmra.mrb[144].mxu0 %v190_v21  ;;  %v6603_v34 = vpop.f32.mrb[39].mxu1  ;;  %v194_v21 = vld [vmem:[%s8540_s0 + $0x4a8] sm:$0xff] }
 0x145   :  { %8595 = vst [vmem:[#allocation35_spill] sm:$0xff] %v6601_v49  ;;  %8596 = vst [vmem:[#allocation36_spill] sm:$0xff] %v6603_v34  ;;  %4895 = vmatprep.mubr.f32.mxu0 %v191_v22  ;;  %v195_v22 = vld [vmem:[%s8540_s0 + $0x4b0] sm:$0xff] }
 0x147   :  { %v6611_v33 = vpop.f32.mrb[40].mxu0  ;;  %v6613_v50 = vpop.f32.mrb[40].mxu1 }
 0x148   :  { %8597 = vst [vmem:[#allocation37_spill] sm:$0xff] %v6611_v33  ;;  %8598 = vst [vmem:[#allocation38_spill] sm:$0xff] %v6613_v50  ;;  %v6615_v3 = vpop.f32.mrb[41].mxu0  ;;  %4896 = vmatmul.mubr.f32.gmra.mrb[146].mxu0 %v192_v39  ;;  %v6617_v4 = vpop.f32.mrb[41].mxu1  ;;  %v196_v39 = vld [vmem:[%s8540_s0 + $0x4b8] sm:$0xff] }
 0x149   :  { %8599 = vst [vmem:[#allocation39_spill] sm:$0xff] %v6615_v3  ;;  %8600 = vst [vmem:[#allocation40_spill] sm:$0xff] %v6617_v4  ;;  %4898 = vmatprep.mubr.f32.mxu0 %v193_v40  ;;  %v197_v40 = vld [vmem:[%s8540_s0 + $0x4c0] sm:$0xff] }
 0x14b   :  { %v6625_v34 = vpop.f32.mrb[42].mxu0  ;;  %v6627_v49 = vpop.f32.mrb[42].mxu1 }
 0x14c   :  { %8601 = vst [vmem:[#allocation41_spill] sm:$0xff] %v6625_v34  ;;  %8602 = vst [vmem:[#allocation42_spill] sm:$0xff] %v6627_v49  ;;  %v6629_v33 = vpop.f32.mrb[43].mxu0  ;;  %4899 = vmatmul.mubr.f32.gmra.mrb[148].mxu0 %v194_v21  ;;  %v6631_v50 = vpop.f32.mrb[43].mxu1  ;;  %v198_v21 = vld [vmem:[%s8540_s0 + $0x4c8] sm:$0xff] }
 0x14d   :  { %8603 = vst [vmem:[#allocation43_spill] sm:$0xff] %v6629_v33  ;;  %8604 = vst [vmem:[#allocation44_spill] sm:$0xff] %v6631_v50  ;;  %4901 = vmatprep.mubr.f32.mxu0 %v195_v22  ;;  %v199_v22 = vld [vmem:[%s8540_s0 + $0x4d0] sm:$0xff] }
 0x14f   :  { %v6639_v4 = vpop.f32.mrb[44].mxu0  ;;  %v6641_v3 = vpop.f32.mrb[44].mxu1 }
 0x150   :  { %8605 = vst [vmem:[#allocation45_spill] sm:$0xff] %v6639_v4  ;;  %8606 = vst [vmem:[#allocation46_spill] sm:$0xff] %v6641_v3  ;;  %v6643_v34 = vpop.f32.mrb[45].mxu0  ;;  %4902 = vmatmul.mubr.f32.gmra.mrb[150].mxu0 %v196_v39  ;;  %v6645_v49 = vpop.f32.mrb[45].mxu1  ;;  %v200_v39 = vld [vmem:[%s8540_s0 + $0x4d8] sm:$0xff] }
 0x151   :  { %8607 = vst [vmem:[#allocation47_spill] sm:$0xff] %v6643_v34  ;;  %8608 = vst [vmem:[#allocation48_spill] sm:$0xff] %v6645_v49  ;;  %4904 = vmatprep.mubr.f32.mxu0 %v197_v40  ;;  %v201_v40 = vld [vmem:[%s8540_s0 + $0x4e0] sm:$0xff] }
 0x153   :  { %v6653_v50 = vpop.f32.mrb[46].mxu0  ;;  %v6655_v33 = vpop.f32.mrb[46].mxu1 }
 0x154   :  { %8609 = vst [vmem:[#allocation49_spill] sm:$0xff] %v6653_v50  ;;  %8610 = vst [vmem:[#allocation50_spill] sm:$0xff] %v6655_v33  ;;  %v6657_v4 = vpop.f32.mrb[47].mxu0  ;;  %4905 = vmatmul.mubr.f32.gmra.mrb[152].mxu0 %v198_v21  ;;  %v6659_v3 = vpop.f32.mrb[47].mxu1  ;;  %v202_v21 = vld [vmem:[%s8540_s0 + $0x4e8] sm:$0xff] }
 0x155   :  { %8611 = vst [vmem:[#allocation51_spill] sm:$0xff] %v6657_v4  ;;  %8612 = vst [vmem:[#allocation52_spill] sm:$0xff] %v6659_v3  ;;  %4907 = vmatprep.mubr.f32.mxu0 %v199_v22  ;;  %v203_v22 = vld [vmem:[%s8540_s0 + $0x4f0] sm:$0xff] }
 0x157   :  { %v6667_v49 = vpop.f32.mrb[48].mxu0  ;;  %v6669_v34 = vpop.f32.mrb[48].mxu1 }
 0x158   :  { %8613 = vst [vmem:[#allocation53_spill] sm:$0xff] %v6667_v49  ;;  %8614 = vst [vmem:[#allocation54_spill] sm:$0xff] %v6669_v34  ;;  %v6671_v50 = vpop.f32.mrb[49].mxu0  ;;  %4908 = vmatmul.mubr.f32.gmra.mrb[154].mxu0 %v200_v39  ;;  %v6673_v33 = vpop.f32.mrb[49].mxu1  ;;  %v204_v39 = vld [vmem:[%s8540_s0 + $0x4f8] sm:$0xff] }
 0x159   :  { %8615 = vst [vmem:[#allocation55_spill] sm:$0xff] %v6671_v50  ;;  %8616 = vst [vmem:[#allocation56_spill] sm:$0xff] %v6673_v33  ;;  %4910 = vmatprep.mubr.f32.mxu0 %v201_v40  ;;  %v205_v40 = vld [vmem:[%s8540_s0 + $0x500] sm:$0xff] }
 0x15b   :  { %v6681_v3 = vpop.f32.mrb[50].mxu0  ;;  %v6683_v4 = vpop.f32.mrb[50].mxu1 }
 0x15c   :  { %8617 = vst [vmem:[#allocation57_spill] sm:$0xff] %v6681_v3  ;;  %8618 = vst [vmem:[#allocation58_spill] sm:$0xff] %v6683_v4  ;;  %v6685_v49 = vpop.f32.mrb[51].mxu0  ;;  %4911 = vmatmul.mubr.f32.gmra.mrb[156].mxu0 %v202_v21  ;;  %v6687_v34 = vpop.f32.mrb[51].mxu1  ;;  %v206_v21 = vld [vmem:[%s8540_s0 + $0x508] sm:$0xff] }
 0x15d   :  { %8619 = vst [vmem:[#allocation59_spill] sm:$0xff] %v6685_v49  ;;  %8620 = vst [vmem:[#allocation60_spill] sm:$0xff] %v6687_v34  ;;  %4913 = vmatprep.mubr.f32.mxu0 %v203_v22  ;;  %v207_v22 = vld [vmem:[%s8540_s0 + $0x510] sm:$0xff] }
 0x15f   :  { %v6695_v33 = vpop.f32.mrb[52].mxu0  ;;  %v6697_v50 = vpop.f32.mrb[52].mxu1 }
 0x160   :  { %8621 = vst [vmem:[#allocation61_spill] sm:$0xff] %v6695_v33  ;;  %8622 = vst [vmem:[#allocation62_spill] sm:$0xff] %v6697_v50  ;;  %v6699_v3 = vpop.f32.mrb[53].mxu0  ;;  %4914 = vmatmul.mubr.f32.gmra.mrb[158].mxu0 %v204_v39  ;;  %v6701_v4 = vpop.f32.mrb[53].mxu1  ;;  %v208_v39 = vld [vmem:[%s8540_s0 + $0x518] sm:$0xff] }
 0x161   :  { %8623 = vst [vmem:[#allocation63_spill] sm:$0xff] %v6699_v3  ;;  %8624 = vst [vmem:[#allocation64_spill] sm:$0xff] %v6701_v4  ;;  %4916 = vmatprep.mubr.f32.mxu0 %v205_v40  ;;  %v209_v40 = vld [vmem:[%s8540_s0 + $0x520] sm:$0xff] }
 0x163   :  { %v6709_v34 = vpop.f32.mrb[54].mxu0  ;;  %v6711_v49 = vpop.f32.mrb[54].mxu1 }
 0x164   :  { %8625 = vst [vmem:[#allocation65_spill] sm:$0xff] %v6709_v34  ;;  %8626 = vst [vmem:[#allocation66_spill] sm:$0xff] %v6711_v49  ;;  %v6713_v33 = vpop.f32.mrb[55].mxu0  ;;  %4917 = vmatmul.mubr.f32.gmra.mrb[160].mxu0 %v206_v21  ;;  %v6715_v50 = vpop.f32.mrb[55].mxu1  ;;  %v210_v21 = vld [vmem:[%s8540_s0 + $0x528] sm:$0xff] }
 0x165   :  { %8627 = vst [vmem:[#allocation67_spill] sm:$0xff] %v6713_v33  ;;  %8628 = vst [vmem:[#allocation68_spill] sm:$0xff] %v6715_v50  ;;  %4919 = vmatprep.mubr.f32.mxu0 %v207_v22  ;;  %v211_v22 = vld [vmem:[%s8540_s0 + $0x530] sm:$0xff] }
 0x167   :  { %v6723_v4 = vpop.f32.mrb[56].mxu0  ;;  %v6725_v3 = vpop.f32.mrb[56].mxu1 }
 0x168   :  { %8629 = vst [vmem:[#allocation69_spill] sm:$0xff] %v6723_v4  ;;  %8630 = vst [vmem:[#allocation70_spill] sm:$0xff] %v6725_v3  ;;  %v6727_v34 = vpop.f32.mrb[57].mxu0  ;;  %4920 = vmatmul.mubr.f32.gmra.mrb[162].mxu0 %v208_v39  ;;  %v6729_v49 = vpop.f32.mrb[57].mxu1  ;;  %v212_v39 = vld [vmem:[%s8540_s0 + $0x538] sm:$0xff] }
 0x169   :  { %8631 = vst [vmem:[#allocation71_spill] sm:$0xff] %v6727_v34  ;;  %8632 = vst [vmem:[#allocation72_spill] sm:$0xff] %v6729_v49  ;;  %4922 = vmatprep.mubr.f32.mxu0 %v209_v40  ;;  %v213_v40 = vld [vmem:[%s8540_s0 + $0x540] sm:$0xff] }
 0x16b   :  { %v6737_v50 = vpop.f32.mrb[58].mxu0  ;;  %v6739_v33 = vpop.f32.mrb[58].mxu1 }
 0x16c   :  { %8633 = vst [vmem:[#allocation73_spill] sm:$0xff] %v6737_v50  ;;  %8634 = vst [vmem:[#allocation74_spill] sm:$0xff] %v6739_v33  ;;  %v6741_v4 = vpop.f32.mrb[59].mxu0  ;;  %4923 = vmatmul.mubr.f32.gmra.mrb[164].mxu0 %v210_v21  ;;  %v6743_v3 = vpop.f32.mrb[59].mxu1  ;;  %v214_v21 = vld [vmem:[%s8540_s0 + $0x548] sm:$0xff] }
 0x16d   :  { %8635 = vst [vmem:[#allocation75_spill] sm:$0xff] %v6741_v4  ;;  %8636 = vst [vmem:[#allocation76_spill] sm:$0xff] %v6743_v3  ;;  %4925 = vmatprep.mubr.f32.mxu0 %v211_v22  ;;  %v6765_v22 = vld [vmem:[%s8542_s2] ss:$0 sm:$0xff]  ;;  %v215_v3 = vld [vmem:[%s8540_s0 + $0x550] sm:$0xff] }
 0x16e   :  { %v6832_v4 = vadd.f32 %v6359_v57, %v6765_v22  ;;  %v6852_v57 = vadd.f32 %v6765_v22, %v6365_v60  ;;  %v6870_v60 = vadd.f32 %v6765_v22, %v6379_v2  ;;  %v220_v2 = vld [vmem:[%s8540_s0 + $0x578] sm:$0xff]  ;;  %v6932_v27 = vadd.f32 %v6765_v22, %v6407_v14  ;;  %v223_v14 = vld [vmem:[%s8540_s0 + $0x590] sm:$0xff] }
 0x16f   :  { %v6751_v49 = vpop.f32.mrb[60].mxu0  ;;  %v6753_v34 = vpop.f32.mrb[60].mxu1 }
 0x170   :  { %8637 = vst [vmem:[#allocation77_spill] sm:$0xff] %v6751_v49  ;;  %8638 = vst [vmem:[#allocation78_spill] sm:$0xff] %v6753_v34  ;;  %v6755_v50 = vpop.f32.mrb[61].mxu0  ;;  %4926 = vmatmul.mubr.f32.gmra.mrb[166].mxu0 %v212_v39  ;;  %v6757_v33 = vpop.f32.mrb[61].mxu1  ;;  %v6784_v49 = vadd.f32 %v6333_v46, %v6765_v22 }
 0x171   :  { %8639 = vst [vmem:[#allocation79_spill] sm:$0xff] %v6755_v50  ;;  %8640 = vst [vmem:[#allocation80_spill] sm:$0xff] %v6757_v33  ;;  %4928 = vmatprep.mubr.f32.mxu0 %v213_v40  ;;  %v6780_v33 = vadd.f32 %v6331_v45, %v6765_v22  ;;  %v217_v45 = vld [vmem:[%s8540_s0 + $0x560] sm:$0xff] }
 0x173   :  { %v6770_v34 = vpop.f32.mrb[62].mxu0  ;;  %v6772_v50 = vpop.f32.mrb[62].mxu1 }
 0x174   :  { %8641 = vst [vmem:[#allocation81_spill] sm:$0xff] %v6770_v34  ;;  %8642 = vst [vmem:[#allocation82_spill] sm:$0xff] %v6772_v50  ;;  %v6774_v39 = vpop.f32.mrb[63].mxu0  ;;  %4929 = vmatmul.mubr.f32.gmra.mrb[168].mxu0 %v214_v21  ;;  %v6776_v40 = vpop.f32.mrb[63].mxu1  ;;  %v216_v34 = vld [vmem:[%s8540_s0 + $0x558] sm:$0xff]  ;;  %v6791_v50 = vadd.f32 %v6765_v22, %v6335_v47  ;;  %v6795_v21 = vadd.f32 %v6765_v22, %v6337_v48  ;;  %v6810_v47 = vadd.f32 %v6347_v52, %v6765_v22  ;;  %v218_v52 = vld [vmem:[%s8540_s0 + $0x568] sm:$0xff] }
 0x175   :  { %8643 = vst [vmem:[#allocation83_spill] sm:$0xff] %v6774_v39  ;;  %8644 = vst [vmem:[#allocation84_spill] sm:$0xff] %v6776_v40  ;;  %4931 = vmatprep.mubr.f32.mxu0 %v215_v3  ;;  %v6806_v3 = vadd.f32 %v6345_v51, %v6765_v22  ;;  %v6824_v51 = vadd.f32 %v6765_v22, %v6351_v54  ;;  %v219_v54 = vld [vmem:[%s8540_s0 + $0x570] sm:$0xff] }
 0x177   :  { %v6800_v40 = vpop.f32.mrb[64].mxu0  ;;  %v6802_v46 = vpop.f32.mrb[64].mxu1 }
 0x178   :  { %8645 = vst [vmem:[#allocation85_spill] sm:$0xff] %v6800_v40  ;;  %8646 = vst [vmem:[#allocation86_spill] sm:$0xff] %v6802_v46  ;;  %v6812_v39 = vpop.f32.mrb[65].mxu0  ;;  %4932 = vmatmul.mubr.f32.gmra.mrb[170].mxu0 %v216_v34  ;;  %v6814_v48 = vpop.f32.mrb[65].mxu1  ;;  %v6819_v40 = vadd.f32 %v6765_v22, %v6349_v53  ;;  %v6837_v46 = vadd.f32 %v6361_v58, %v6765_v22  ;;  %v6848_v34 = vadd.f32 %v6373_v63, %v6765_v22 }
 0x179   :  { %8647 = vst [vmem:[#allocation87_spill] sm:$0xff] %v6812_v39  ;;  %8648 = vst [vmem:[#allocation88_spill] sm:$0xff] %v6814_v48  ;;  %4934 = vmatprep.mubr.f32.mxu0 %v217_v45  ;;  %v6844_v45 = vadd.f32 %v6765_v22, %v6363_v59  ;;  %v6856_v58 = vadd.f32 %v6375_v0, %v6765_v22  ;;  %v6865_v59 = vadd.f32 %v6765_v22, %v6377_v1 }
 0x17a   :  { %v6879_v39 = vadd.f32 %v6387_v5, %v6765_v22  ;;  %v6884_v63 = vadd.f32 %v6389_v6, %v6765_v22  ;;  %v6897_v1 = vadd.f32 %v6765_v22, %v6393_v8  ;;  %v221_v6 = vld [vmem:[%s8540_s0 + $0x580] sm:$0xff]  ;;  %v6913_v8 = vadd.f32 %v6401_v11, %v6765_v22 }
 0x17b   :  { %v6858_v53 = vpop.f32.mrb[66].mxu0  ;;  %v6860_v48 = vpop.f32.mrb[66].mxu1  ;;  %v6927_v5 = vadd.f32 %v6765_v22, %v6405_v13  ;;  %v6945_v11 = vadd.f32 %v6417_v18, %v6765_v22  ;;  %v6964_v18 = vadd.f32 %v6431_v24, %v6765_v22 }
 0x17c   :  { %8649 = vst [vmem:[#allocation89_spill] sm:$0xff] %v6858_v53  ;;  %8650 = vst [vmem:[#allocation90_spill] sm:$0xff] %v6860_v48  ;;  %v6872_v28 = vpop.f32.mrb[67].mxu0  ;;  %4935 = vmatmul.mubr.f32.gmra.mrb[172].mxu0 %v218_v52  ;;  %v6874_v0 = vpop.f32.mrb[67].mxu1  ;;  %v6892_v53 = vadd.f32 %v6765_v22, %v6391_v7  ;;  %v6940_v52 = vadd.f32 %v6415_v17, %v6765_v22  ;;  %v6960_v17 = vadd.f32 %v6765_v22, %v6421_v20 }
 0x17d   :  { %8651 = vst [vmem:[#allocation91_spill] sm:$0xff] %v6872_v28  ;;  %8652 = vst [vmem:[#allocation92_spill] sm:$0xff] %v6874_v0  ;;  %4937 = vmatprep.mubr.f32.mxu0 %v219_v54  ;;  %v6918_v54 = vadd.f32 %v6403_v12, %v6765_v22  ;;  %v222_v12 = vld [vmem:[%s8540_s0 + $0x588] sm:$0xff]  ;;  %v6978_v20 = vadd.f32 %v6765_v22, %v6435_v26  ;;  %v224_v26 = vld [vmem:[%s8540_s0 + $0x598] sm:$0xff] }
 0x17f   :  { %v6906_v7 = vpop.f32.mrb[68].mxu0  ;;  %v6908_v28 = vpop.f32.mrb[68].mxu1  ;;  %8659 = vst [vmem:[#allocation99_spill] sm:$0xff] %v6978_v20  ;;  %v8669_v20 = vmax.f32 %v6795_v21, 0.0 }
 0x180   :  { %8653 = vst [vmem:[#allocation93_spill] sm:$0xff] %v6906_v7  ;;  %8654 = vst [vmem:[#allocation94_spill] sm:$0xff] %v6908_v28  ;;  %v6920_v0 = vpop.f32.mrb[69].mxu0  ;;  %4938 = vmatmul.mubr.f32.gmra.mrb[174].mxu0 %v220_v2  ;;  %v6922_v48 = vpop.f32.mrb[69].mxu1  ;;  %v6956_v2 = vadd.f32 %v6429_v23, %v6765_v22  ;;  %v6987_v28 = vadd.f32 %v6443_v29, %v6765_v22  ;;  %v6992_v23 = vadd.f32 %v6445_v30, %v6765_v22  ;;  %v225_v30 = vld [vmem:[%s8540_s0 + $0x5a0] sm:$0xff]  ;;  %v226_v7 = vld [vmem:[%s8540_s0 + $0x5a8] sm:$0xff] }
 0x181   :  { %8655 = vst [vmem:[#allocation95_spill] sm:$0xff] %v6920_v0  ;;  %8656 = vst [vmem:[#allocation96_spill] sm:$0xff] %v6922_v48  ;;  %4940 = vmatprep.mubr.f32.mxu0 %v221_v6  ;;  %v6952_v6 = vadd.f32 %v6765_v22, %v6419_v19  ;;  %v6973_v19 = vadd.f32 %v6765_v22, %v6433_v25  ;;  %v7005_v25 = vadd.f32 %v6765_v22, %v6449_v32 }
 0x182   :  { %8662 = vst [vmem:[#allocation102_spill] sm:$0xff] %v6987_v28  ;;  %8663 = vst [vmem:[#allocation103_spill] sm:$0xff] %v6992_v23 }
 0x183   :  { %v6966_v13 = vpop.f32.mrb[70].mxu0  ;;  %v6968_v48 = vpop.f32.mrb[70].mxu1  ;;  %8665 = vst [vmem:[#allocation105_spill] sm:$0xff] %v7005_v25 }
 0x184   :  { %8657 = vst [vmem:[#allocation97_spill] sm:$0xff] %v6966_v13  ;;  %8658 = vst [vmem:[#allocation98_spill] sm:$0xff] %v6968_v48  ;;  %v6980_v0 = vpop.f32.mrb[71].mxu0  ;;  %4941 = vmatmul.mubr.f32.gmra.mrb[176].mxu0 %v222_v12  ;;  %v6982_v24 = vpop.f32.mrb[71].mxu1  ;;  %v7000_v13 = vadd.f32 %v6765_v22, %v6447_v31 }
 0x185   :  { %8660 = vst [vmem:[#allocation100_spill] sm:$0xff] %v6980_v0  ;;  %8661 = vst [vmem:[#allocation101_spill] sm:$0xff] %v6982_v24  ;;  %4943 = vmatprep.mubr.f32.mxu0 %v223_v14  ;;  %v227_v14 = vld [vmem:[%s8540_s0 + $0x5b0] sm:$0xff] }
 0x186   :  { %8664 = vst [vmem:[#allocation104_spill] sm:$0xff] %v7000_v13 }
 0x187   :  { %v4786_v31 = vpop.f32.mrb[72].mxu0  ;;  %v5062_v0 = vpop.f32.mrb[72].mxu1 }
 0x188   :  { %v788_v32 = vadd.f32 %v4786_v31, %v6765_v22  ;;  %v1708_v16 = vadd.f32 %v5062_v0, %v6765_v22  ;;  %v782_v15 = vpop.f32.mrb[73].mxu0  ;;  %4944 = vmatmul.mubr.f32.gmra.mrb[178].mxu0 %v224_v26  ;;  %v1702_v10 = vpop.f32.mrb[73].mxu1  ;;  %v8666_v0 = vmax.f32 %v6780_v33, 0.0 }
 0x189   :  { %v783_v12 = vadd.f32 %v6765_v22, %v782_v15  ;;  %v1703_v48 = vadd.f32 %v6765_v22, %v1702_v10  ;;  %4946 = vmatprep.mubr.f32.mxu0 %v225_v30  ;;  %v7032_v15 = vadd.f32 %v6457_v35, %v6765_v22  ;;  %v7036_v10 = vadd.f32 %v6459_v36, %v6765_v22 }
 0x18a   :  { %v1934_v29 = vmax.f32 %v788_v32, 0.0  ;;  %v2118_v26 = vmax.f32 %v1708_v16, 0.0  ;;  %v8667_v16 = vmax.f32 %v6784_v49, 0.0 }
 0x18b   :  { %v1933_v30 = vmax.f32 %v783_v12, 0.0  ;;  %v2117_v24 = vmax.f32 %v1703_v48, 0.0  ;;  %v4789_v23 = vpop.f32.mrb[74].mxu0  ;;  %v5065_v31 = vpop.f32.mrb[74].mxu1  ;;  %v8668_v12 = vmax.f32 %v6791_v50, 0.0  ;;  %v7067_v50 = vadd.f32 %v6765_v22, %v6463_v38 }
 0x18c   :  { %v7040_v32 = vmax.f32 %v8666_v0, %v1934_v29  ;;  %v7044_v25 = vmax.f32 %v8667_v16, %v2118_v26  ;;  %v798_v13 = vadd.f32 %v4789_v23, %v6765_v22  ;;  %v1718_v35 = vadd.f32 %v5065_v31, %v6765_v22  ;;  %v792_v28 = vpop.f32.mrb[75].mxu0  ;;  %4947 = vmatmul.mubr.f32.gmra.mrb[180].mxu0 %v226_v7  ;;  %v1712_v36 = vpop.f32.mrb[75].mxu1  ;;  %v228_v23 = vld [vmem:[%s8540_s0 + $0x5b8] sm:$0xff]  ;;  %s5567_s0 = smov 32  }
 0x18d   :  { %v7050_v48 = vmax.f32 %v8668_v12, %v1933_v30  ;;  %v7054_v33 = vmax.f32 %v8669_v20, %v2117_v24  ;;  %v793_v29 = vadd.f32 %v6765_v22, %v792_v28  ;;  %v1713_v49 = vadd.f32 %v6765_v22, %v1712_v36  ;;  %4949 = vmatprep.mubr.f32.mxu0 %v227_v14 }
 0x18e   :  { %v7063_v7 = vadd.f32 %v6765_v22, %v6461_v37  ;;  %v1936_v21 = vmax.f32 %v798_v13, 0.0  ;;  %v2120_v20 = vmax.f32 %v1718_v35, 0.0  ;;  %v8670_v30 = vmax.f32 %v6806_v3, 0.0 }
 0x18f   :  { %v1935_v31 = vmax.f32 %v793_v29, 0.0  ;;  %v2119_v14 = vmax.f32 %v1713_v49, 0.0  ;;  %v4792_v0 = vpop.f32.mrb[76].mxu0  ;;  %v5068_v26 = vpop.f32.mrb[76].mxu1  ;;  %v8671_v37 = vmax.f32 %v6810_v47, 0.0  ;;  %v8672_v29 = vmax.f32 %v6819_v40, 0.0 }
 0x190   :  { %v7073_v16 = vmax.f32 %v8670_v30, %v1936_v21  ;;  %v808_v38 = vadd.f32 %v4792_v0, %v6765_v22  ;;  %v1728_v13 = vadd.f32 %v5068_v26, %v6765_v22  ;;  %v802_v35 = vpop.f32.mrb[77].mxu0  ;;  %4950 = vmatmul.mubr.f32.gmra.mrb[182].mxu0 %v228_v23  ;;  %v1722_v12 = vpop.f32.mrb[77].mxu1  ;;  %v8673_v28 = vmax.f32 %v6824_v51, 0.0 }
 0x191   :  { %v7077_v36 = vmax.f32 %v8671_v37, %v2120_v20  ;;  %v7083_v49 = vmax.f32 %v8672_v29, %v1935_v31  ;;  %v803_v21 = vadd.f32 %v6765_v22, %v802_v35  ;;  %v1723_v47 = vadd.f32 %v6765_v22, %v1722_v12 }
 0x192   :  { %v7087_v3 = vmax.f32 %v8673_v28, %v2119_v14  ;;  %v1938_v26 = vmax.f32 %v808_v38, 0.0  ;;  %v2122_v30 = vmax.f32 %v1728_v13, 0.0  ;;  %v7095_v23 = vadd.f32 %v6471_v41, %v6765_v22 }
 0x193   :  { %v7099_v40 = vadd.f32 %v6473_v42, %v6765_v22  ;;  %v1937_v51 = vmax.f32 %v803_v21, 0.0  ;;  %v2121_v28 = vmax.f32 %v1723_v47, 0.0  ;;  %v4795_v31 = vpop.f32.mrb[78].mxu0  ;;  %v5071_v14 = vpop.f32.mrb[78].mxu1  ;;  %v8674_v37 = vmax.f32 %v6832_v4, 0.0 }
 0x194   :  { %v8675_v12 = vmax.f32 %v6837_v46, 0.0  ;;  %v818_v13 = vadd.f32 %v4795_v31, %v6765_v22  ;;  %v1738_v41 = vadd.f32 %v5071_v14, %v6765_v22  ;;  %v812_v29 = vpop.f32.mrb[79].mxu0  ;;  %v1732_v0 = vpop.f32.mrb[79].mxu1  ;;  %v8677_v42 = vmax.f32 %v6844_v45, 0.0 }
 0x195   :  { %v7103_v35 = vmax.f32 %v8674_v37, %v1938_v26  ;;  %v8678_v47 = vmax.f32 %v6852_v57, 0.0  ;;  %v813_v4 = vadd.f32 %v6765_v22, %v812_v29  ;;  %v1733_v46 = vadd.f32 %v6765_v22, %v1732_v0 }
 0x196   :  { %v7107_v38 = vmax.f32 %v8675_v12, %v2122_v30  ;;  %v7113_v21 = vmax.f32 %v8677_v42, %v1937_v51  ;;  %v7123_v26 = vadd.f32 %v6765_v22, %v6475_v43  ;;  %v7127_v30 = vadd.f32 %v6765_v22, %v6477_v44 }
 0x197   :  { %v7117_v20 = vmax.f32 %v8678_v47, %v2121_v28  ;;  %v1940_v31 = vmax.f32 %v818_v13, 0.0  ;;  %v2124_v45 = vmax.f32 %v1738_v41, 0.0  ;;  %v1939_v28 = vmax.f32 %v813_v4, 0.0  ;;  %v4798_v37 = vpop.f32.mrb[80].mxu0  ;;  %v5074_v12 = vpop.f32.mrb[80].mxu1 }
 0x198   :  { %8676 = vst [vmem:[#allocation106_spill] sm:$0xff] %v7107_v38  ;;  %v2123_v14 = vmax.f32 %v1733_v46, 0.0  ;;  %v8679_v0 = vmax.f32 %v6848_v34, 0.0  ;;  %v8680_v43 = vmax.f32 %v6856_v58, 0.0  ;;  %v828_v44 = vadd.f32 %v4798_v37, %v6765_v22  ;;  %v822_v41 = vpop.f32.mrb[81].mxu0  ;;  %v1742_v47 = vpop.f32.mrb[81].mxu1 }
 0x199   :  { %v1748_v13 = vadd.f32 %v5074_v12, %v6765_v22  ;;  %v8682_v57 = vmax.f32 %v6865_v59, 0.0  ;;  %v8684_v46 = vmax.f32 %v6870_v60, 0.0  ;;  %v823_v34 = vadd.f32 %v6765_v22, %v822_v41 }
 0x19a   :  { %v7133_v29 = vmax.f32 %v8679_v0, %v1940_v31  ;;  %v7137_v42 = vmax.f32 %v8680_v43, %v2124_v45  ;;  %v1743_v58 = vadd.f32 %v6765_v22, %v1742_v47  ;;  %v7153_v31 = vadd.f32 %v6485_v55, %v6765_v22 }
 0x19b   :  { %v7143_v4 = vmax.f32 %v8682_v57, %v1939_v28  ;;  %v7147_v51 = vmax.f32 %v8684_v46, %v2123_v14  ;;  %v7157_v45 = vadd.f32 %v6487_v56, %v6765_v22  ;;  %v1942_v37 = vmax.f32 %v828_v44, 0.0  ;;  %v4801_v12 = vpop.f32.mrb[82].mxu0  ;;  %v5077_v0 = vpop.f32.mrb[82].mxu1 }
 0x19c   :  { %8681 = vst [vmem:[#allocation107_spill] sm:$0xff] %v7137_v42  ;;  %v2126_v59 = vmax.f32 %v1748_v13, 0.0  ;;  %v1941_v28 = vmax.f32 %v823_v34, 0.0  ;;  %v2125_v14 = vmax.f32 %v1743_v58, 0.0  ;;  %v8685_v43 = vmax.f32 %v6879_v39, 0.0  ;;  %v832_v13 = vpop.f32.mrb[83].mxu0 }
 0x19d   :  { %8683 = vst [vmem:[#allocation108_spill] sm:$0xff] %v7143_v4  ;;  %v8687_v55 = vmax.f32 %v6884_v63, 0.0  ;;  %v838_v56 = vadd.f32 %v4801_v12, %v6765_v22  ;;  %v1758_v44 = vadd.f32 %v5077_v0, %v6765_v22  ;;  %v1752_v46 = vpop.f32.mrb[83].mxu1  ;;  %v8688_v60 = vmax.f32 %v6892_v53, 0.0  ;;  %v8797_v42 = vld [vmem:[#allocation61_spill] sm:$0xff] }
 0x19e   :  { %v7163_v41 = vmax.f32 %v8685_v43, %v1942_v37  ;;  %v8690_v58 = vmax.f32 %v6897_v1, 0.0  ;;  %v833_v39 = vadd.f32 %v6765_v22, %v832_v13  ;;  %v1753_v63 = vadd.f32 %v6765_v22, %v1752_v46 }
 0x19f   :  { %v7167_v47 = vmax.f32 %v8687_v55, %v2126_v59  ;;  %v7173_v34 = vmax.f32 %v8688_v60, %v1941_v28  ;;  %v1944_v12 = vmax.f32 %v838_v56, 0.0  ;;  %v2128_v0 = vmax.f32 %v1758_v44, 0.0  ;;  %v4804_v28 = vpop.f32.mrb[84].mxu0  ;;  %v2719_v55 = vld [vmem:[%s8543_s3 + $0x80] sm:$0xff]  ;;  %v2720_v56 = vld [vmem:[%s8543_s3 + $0x88] sm:$0xff] }
 0x1a0   :  { %8686 = vst [vmem:[#allocation109_spill] sm:$0xff] %v7163_v41  ;;  %v7177_v57 = vmax.f32 %v8690_v58, %v2125_v14  ;;  %v7185_v43 = vadd.f32 %v6765_v22, %v6489_v61  ;;  %v7189_v53 = vadd.f32 %v6765_v22, %v6491_v62  ;;  %v1943_v1 = vmax.f32 %v833_v39, 0.0  ;;  %v5080_v14 = vpop.f32.mrb[84].mxu1  ;;  %v842_v39 = vpop.f32.mrb[85].mxu0  ;;  %v2703_v59 = vld [vmem:[%s8543_s3] sm:$0xff] }
 0x1a1   :  { %8689 = vst [vmem:[#allocation110_spill] sm:$0xff] %v7173_v34  ;;  %v2127_v60 = vmax.f32 %v1753_v63, 0.0  ;;  %v8691_v44 = vmax.f32 %v6913_v8, 0.0  ;;  %v8693_v13 = vmax.f32 %v6918_v54, 0.0  ;;  %v848_v46 = vadd.f32 %v4804_v28, %v6765_v22  ;;  %v1762_v63 = vpop.f32.mrb[85].mxu1  ;;  %v2704_v8 = vld [vmem:[%s8543_s3 + $0x8] sm:$0xff] }
 0x1a2   :  { %v1768_v58 = vadd.f32 %v5080_v14, %v6765_v22  ;;  %v8696_v54 = vmax.f32 %v6932_v27, 0.0  ;;  %v843_v28 = vadd.f32 %v6765_v22, %v842_v39  ;;  %v1763_v14 = vadd.f32 %v6765_v22, %v1762_v63 }
 0x1a3   :  { %v7199_v61 = vmax.f32 %v8691_v44, %v1944_v12  ;;  %v7203_v62 = vmax.f32 %v8693_v13, %v2128_v0  ;;  %v8694_v12 = vmax.f32 %v6927_v5, 0.0  ;;  %v1946_v13 = vmax.f32 %v848_v46, 0.0 }
 0x1a4   :  { %v7219_v0 = vmax.f32 %v8696_v54, %v2127_v60  ;;  %v2130_v37 = vmax.f32 %v1768_v58, 0.0  ;;  %v5296_v24 = vpack.c.bf16 %v2720_v56, %v2719_v55  ;;  %v1945_v4 = vmax.f32 %v843_v28, 0.0 }
 0x1a5   :  { %8692 = vst [vmem:[#allocation111_spill] sm:$0xff] %v7199_v61  ;;  %v7215_v44 = vmax.f32 %v8694_v12, %v1943_v1  ;;  %v5298_v61 = vpack.c.bf16 %v2704_v8, %v2703_v59  ;;  %v2129_v5 = vmax.f32 %v1763_v14, 0.0  ;;  %v4807_v1 = vpop.f32.mrb[86].mxu0  ;;  %v5083_v12 = vpop.f32.mrb[86].mxu1  ;;  %v8697_v27 = vmax.f32 %v6940_v52, 0.0  ;;  %v8703_v14 = vld [vmem:[#allocation6_spill] sm:$0xff] }
 0x1a6   :  { %v8699_v39 = vmax.f32 %v6945_v11, 0.0  ;;  %v858_v46 = vadd.f32 %v4807_v1, %v6765_v22  ;;  %v1778_v59 = vadd.f32 %v5083_v12, %v6765_v22  ;;  %v852_v55 = vpop.f32.mrb[87].mxu0  ;;  %v1772_v56 = vpop.f32.mrb[87].mxu1  ;;  %5297 = vmatprep.subr.bf16.mxu1 %v5296_v24  ;;  %v8700_v58 = vmax.f32 %v6952_v6, 0.0 }
 0x1a7   :  { %8695 = vst [vmem:[#allocation112_spill] sm:$0xff] %v7215_v44  ;;  %v7227_v60 = vmax.f32 %v8697_v27, %v1946_v13  ;;  %v8702_v8 = vmax.f32 %v6960_v17, 0.0  ;;  %v853_v28 = vadd.f32 %v6765_v22, %v852_v55  ;;  %v1773_v11 = vadd.f32 %v6765_v22, %v1772_v56  ;;  %5299 = vmatpush3.bf16.msra.mxu1 %v5298_v61  ;;  %v8704_v13 = vld [vmem:[#allocation7_spill] sm:$0xff]  ;;  %v4810_v27 = vpop.f32.mrb[88].mxu0 }
 0x1a8   :  { %v7231_v54 = vmax.f32 %v8699_v39, %v2130_v37  ;;  %v7237_v63 = vmax.f32 %v8700_v58, %v1945_v4  ;;  %v7247_v37 = vadd.f32 %v6499_v9, %v6765_v22  ;;  %v7251_v24 = vadd.f32 %v8703_v14, %v6765_v22  ;;  %v5086_v39 = vpop.f32.mrb[88].mxu1 }
 0x1a9   :  { %8698 = vst [vmem:[#allocation113_spill] sm:$0xff] %v7227_v60  ;;  %v7241_v52 = vmax.f32 %v8702_v8, %v2129_v5  ;;  %v1948_v6 = vmax.f32 %v858_v46, 0.0  ;;  %v2132_v4 = vmax.f32 %v1778_v59, 0.0  ;;  %v7255_v17 = vadd.f32 %v6765_v22, %v8704_v13  ;;  %v8705_v5 = vld [vmem:[#allocation8_spill] sm:$0xff]  ;;  %v862_v8 = vpop.f32.mrb[89].mxu0  ;;  %v1782_v14 = vpop.f32.mrb[89].mxu1 }
 0x1aa   :  { %8701 = vst [vmem:[#allocation114_spill] sm:$0xff] %v7237_v63  ;;  %v7259_v1 = vadd.f32 %v6765_v22, %v8705_v5  ;;  %v1947_v12 = vmax.f32 %v853_v28, 0.0  ;;  %v2131_v61 = vmax.f32 %v1773_v11, 0.0  ;;  %v8706_v9 = vmax.f32 %v6956_v2, 0.0  ;;  %v8711_v11 = vld [vmem:[#allocation99_spill] sm:$0xff] }
 0x1ab   :  { %v8708_v56 = vmax.f32 %v6964_v18, 0.0  ;;  %v868_v59 = vadd.f32 %v4810_v27, %v6765_v22  ;;  %v1788_v58 = vadd.f32 %v5086_v39, %v6765_v22  ;;  %v8709_v13 = vmax.f32 %v6973_v19, 0.0 }
 0x1ac   :  { %v7263_v55 = vmax.f32 %v8706_v9, %v1948_v6  ;;  %v8712_v5 = vmax.f32 %v8711_v11, 0.0  ;;  %v863_v2 = vadd.f32 %v6765_v22, %v862_v8  ;;  %v1783_v18 = vadd.f32 %v6765_v22, %v1782_v14  ;;  %v5089_v11 = vpop.f32.mrb[90].mxu1  ;;  %v8716_v8 = vld [vmem:[#allocation103_spill] sm:$0xff]  ;;  %v8718_v6 = vld [vmem:[#allocation104_spill] sm:$0xff] }
 0x1ad   :  { %v7267_v46 = vmax.f32 %v8708_v56, %v2132_v4  ;;  %v7273_v28 = vmax.f32 %v8709_v13, %v1947_v12  ;;  %v1950_v27 = vmax.f32 %v868_v59, 0.0  ;;  %v2134_v39 = vmax.f32 %v1788_v58, 0.0  ;;  %v4813_v13 = vpop.f32.mrb[90].mxu0  ;;  %v1792_v9 = vpop.f32.mrb[91].mxu1 }
 0x1ae   :  { %8707 = vst [vmem:[#allocation6_spill] sm:$0xff] %v7263_v55  ;;  %v7277_v41 = vmax.f32 %v8712_v5, %v2131_v61  ;;  %v1949_v12 = vmax.f32 %v863_v2, 0.0  ;;  %v2133_v56 = vmax.f32 %v1783_v18, 0.0  ;;  %v8713_v61 = vld [vmem:[#allocation102_spill] sm:$0xff]  ;;  %v8717_v14 = vmax.f32 %v8716_v8, 0.0  ;;  %v872_v58 = vpop.f32.mrb[91].mxu0 }
 0x1af   :  { %8710 = vst [vmem:[#allocation7_spill] sm:$0xff] %v7273_v28  ;;  %v8714_v5 = vmax.f32 %v8713_v61, 0.0  ;;  %v878_v4 = vadd.f32 %v4813_v13, %v6765_v22  ;;  %v1798_v59 = vadd.f32 %v5089_v11, %v6765_v22  ;;  %v8719_v19 = vmax.f32 %v8718_v6, 0.0  ;;  %v8721_v18 = vld [vmem:[#allocation105_spill] sm:$0xff]  ;;  %v8724_v13 = vld [vmem:[#allocation10_spill] sm:$0xff] }
 0x1b0   :  { %v7291_v28 = vmax.f32 %v8717_v14, %v2134_v39  ;;  %v8722_v55 = vmax.f32 %v8721_v18, 0.0  ;;  %v1793_v61 = vadd.f32 %v6765_v22, %v1792_v9  ;;  %v8723_v39 = vld [vmem:[#allocation9_spill] sm:$0xff]  ;;  %v7311_v11 = vadd.f32 %v8724_v13, %v6765_v22  ;;  %v5092_v18 = vpop.f32.mrb[92].mxu1 }
 0x1b1   :  { %v7287_v34 = vmax.f32 %v8714_v5, %v1950_v27  ;;  %v7297_v2 = vmax.f32 %v8719_v19, %v1949_v12  ;;  %v873_v27 = vadd.f32 %v6765_v22, %v872_v58  ;;  %v7307_v5 = vadd.f32 %v8723_v39, %v6765_v22  ;;  %v8725_v19 = vld [vmem:[#allocation11_spill] sm:$0xff]  ;;  %v4816_v58 = vpop.f32.mrb[92].mxu0  ;;  %v1802_v60 = vpop.f32.mrb[93].mxu1 }
 0x1b2   :  { %v7301_v63 = vmax.f32 %v8722_v55, %v2133_v56  ;;  %v1952_v8 = vmax.f32 %v878_v4, 0.0  ;;  %v2136_v6 = vmax.f32 %v1798_v59, 0.0  ;;  %v7315_v12 = vadd.f32 %v6765_v22, %v8725_v19  ;;  %v8726_v55 = vld [vmem:[#allocation12_spill] sm:$0xff] }
 0x1b3   :  { %8715 = vst [vmem:[#allocation8_spill] sm:$0xff] %v7287_v34  ;;  %8720 = vst [vmem:[#allocation99_spill] sm:$0xff] %v7297_v2  ;;  %v7319_v56 = vadd.f32 %v6765_v22, %v8726_v55  ;;  %v1951_v14 = vmax.f32 %v873_v27, 0.0  ;;  %v2135_v9 = vmax.f32 %v1793_v61, 0.0  ;;  %v8727_v39 = vmax.f32 %v7032_v15, 0.0  ;;  %v882_v34 = vpop.f32.mrb[93].mxu0 }
 0x1b4   :  { %v8729_v13 = vmax.f32 %v7036_v10, 0.0  ;;  %v888_v59 = vadd.f32 %v4816_v58, %v6765_v22  ;;  %v1808_v19 = vadd.f32 %v5092_v18, %v6765_v22  ;;  %v8730_v55 = vmax.f32 %v7063_v7, 0.0 }
 0x1b5   :  { %v7323_v2 = vmax.f32 %v8727_v39, %v1952_v8  ;;  %v8732_v61 = vmax.f32 %v7067_v50, 0.0  ;;  %v883_v15 = vadd.f32 %v6765_v22, %v882_v34  ;;  %v1803_v10 = vadd.f32 %v6765_v22, %v1802_v60  ;;  %v5095_v50 = vpop.f32.mrb[94].mxu1 }
 0x1b6   :  { %v7327_v4 = vmax.f32 %v8729_v13, %v2136_v6  ;;  %v7333_v27 = vmax.f32 %v8730_v55, %v1951_v14  ;;  %v1954_v58 = vmax.f32 %v888_v59, 0.0  ;;  %v2138_v18 = vmax.f32 %v1808_v19, 0.0  ;;  %v4819_v55 = vpop.f32.mrb[94].mxu0  ;;  %v1812_v39 = vpop.f32.mrb[95].mxu1 }
 0x1b7   :  { %8728 = vst [vmem:[#allocation102_spill] sm:$0xff] %v7323_v2  ;;  %v7337_v44 = vmax.f32 %v8732_v61, %v2135_v9  ;;  %v1953_v14 = vmax.f32 %v883_v15, 0.0  ;;  %v2137_v13 = vmax.f32 %v1803_v10, 0.0  ;;  %v8733_v9 = vmax.f32 %v7095_v23, 0.0  ;;  %v892_v19 = vpop.f32.mrb[95].mxu0 }
 0x1b8   :  { %8731 = vst [vmem:[#allocation103_spill] sm:$0xff] %v7333_v27  ;;  %v8735_v34 = vmax.f32 %v7099_v40, 0.0  ;;  %v898_v6 = vadd.f32 %v4819_v55, %v6765_v22  ;;  %v1818_v59 = vadd.f32 %v5095_v50, %v6765_v22  ;;  %v8736_v7 = vmax.f32 %v7123_v26, 0.0  ;;  %v8739_v26 = vld [vmem:[#allocation13_spill] sm:$0xff]  ;;  %v8740_v55 = vld [vmem:[#allocation15_spill] sm:$0xff] }
 0x1b9   :  { %v7347_v61 = vmax.f32 %v8733_v9, %v1954_v58  ;;  %v8738_v10 = vmax.f32 %v7127_v30, 0.0  ;;  %v893_v23 = vadd.f32 %v6765_v22, %v892_v19  ;;  %v1813_v40 = vadd.f32 %v6765_v22, %v1812_v39  ;;  %v2721_v58 = vld [vmem:[%s8543_s3 + $0x90] sm:$0xff] }
 0x1ba   :  { %v7351_v60 = vmax.f32 %v8735_v34, %v2138_v18  ;;  %v7357_v15 = vmax.f32 %v8736_v7, %v1953_v14  ;;  %v2722_v18 = vld [vmem:[%s8543_s3 + $0x98] sm:$0xff]  ;;  %v7373_v7 = vadd.f32 %v8739_v26, %v6765_v22  ;;  %v1956_v14 = vmax.f32 %v898_v6, 0.0 }
 0x1bb   :  { %8734 = vst [vmem:[#allocation104_spill] sm:$0xff] %v7347_v61  ;;  %v7361_v8 = vmax.f32 %v8738_v10, %v2137_v13  ;;  %v2140_v30 = vmax.f32 %v1818_v59, 0.0  ;;  %v5300_v13 = vpack.c.bf16 %v2722_v18, %v2721_v58  ;;  %v7377_v50 = vadd.f32 %v6765_v22, %v8740_v55  ;;  %v8741_v39 = vld [vmem:[#allocation14_spill] sm:$0xff]  ;;  %v4822_v10 = vpop.f32.mrb[96].mxu0 }
 0x1bc   :  { %8737 = vst [vmem:[#allocation105_spill] sm:$0xff] %v7357_v15  ;;  %v7381_v9 = vadd.f32 %v8741_v39, %v6765_v22  ;;  %v1955_v34 = vmax.f32 %v893_v23, 0.0  ;;  %v2139_v19 = vmax.f32 %v1813_v40, 0.0  ;;  %v5098_v15 = vpop.f32.mrb[96].mxu1  ;;  %v8742_v61 = vmax.f32 %v7153_v31, 0.0  ;;  %v902_v26 = vpop.f32.mrb[97].mxu0 }
 0x1bd   :  { %v8744_v6 = vmax.f32 %v7157_v45, 0.0  ;;  %v908_v58 = vadd.f32 %v4822_v10, %v6765_v22  ;;  %v1828_v18 = vadd.f32 %v5098_v15, %v6765_v22  ;;  %v1822_v55 = vpop.f32.mrb[97].mxu1  ;;  %5301 = vmatprep.subr.bf16.mxu1 %v5300_v13  ;;  %v2705_v23 = vld [vmem:[%s8543_s3 + $0x10] sm:$0xff]  ;;  %v2706_v31 = vld [vmem:[%s8543_s3 + $0x18] sm:$0xff]  ;;  %v8747_v40 = vmax.f32 %v7189_v53, 0.0  ;;  %v8748_v13 = vld [vmem:[#allocation16_spill] sm:$0xff] }
 0x1be   :  { %v7385_v27 = vmax.f32 %v8742_v61, %v1956_v14  ;;  %v8745_v61 = vmax.f32 %v7185_v43, 0.0  ;;  %v903_v15 = vadd.f32 %v6765_v22, %v902_v26  ;;  %v1483_v39 = vadd.f32 %v6765_v22, %v8748_v13  ;;  %v5101_v53 = vpop.f32.mrb[98].mxu1 }
 0x1bf   :  { %v7389_v59 = vmax.f32 %v8744_v6, %v2140_v30  ;;  %v7405_v14 = vmax.f32 %v8747_v40, %v2139_v19  ;;  %v1823_v30 = vadd.f32 %v6765_v22, %v1822_v55  ;;  %v1958_v10 = vmax.f32 %v908_v58, 0.0 }
 0x1c0   :  { %8743 = vst [vmem:[#allocation9_spill] sm:$0xff] %v7385_v27  ;;  %v7401_v45 = vmax.f32 %v8745_v61, %v1955_v34  ;;  %v2142_v6 = vmax.f32 %v1828_v18, 0.0  ;;  %v5302_v27 = vpack.c.bf16 %v2706_v31, %v2705_v23  ;;  %v1890_v2 = vmax.f32 %v7373_v7, 0.0  ;;  %v1832_v7 = vpop.f32.mrb[99].mxu1 }
 0x1c1   :  { %v2074_v43 = vmax.f32 %v7381_v9, 0.0  ;;  %v1957_v34 = vmax.f32 %v903_v15, 0.0  ;;  %v2141_v61 = vmax.f32 %v1823_v30, 0.0  ;;  %v8749_v19 = vmax.f32 %v7247_v37, 0.0 }
 0x1c2   :  { %8746 = vst [vmem:[#allocation10_spill] sm:$0xff] %v7401_v45  ;;  %v4825_v45 = vpop.f32.mrb[98].mxu0  ;;  %v8751_v26 = vmax.f32 %v7251_v24, 0.0  ;;  %v1838_v18 = vadd.f32 %v5101_v53, %v6765_v22  ;;  %5303 = vmatpush3.bf16.msra.mxu1 %v5302_v27  ;;  %v8752_v9 = vmax.f32 %v7255_v17, 0.0  ;;  %v8754_v15 = vmax.f32 %v7259_v1, 0.0  ;;  %v8755_v53 = vld [vmem:[#allocation17_spill] sm:$0xff] }
 0x1c3   :  { %v7415_v40 = vmax.f32 %v8749_v19, %v1958_v10  ;;  %v918_v58 = vadd.f32 %v4825_v45, %v6765_v22  ;;  %v912_v23 = vpop.f32.mrb[99].mxu0  ;;  %v1833_v24 = vadd.f32 %v6765_v22, %v1832_v7  ;;  %v1889_v13 = vmax.f32 %v7377_v50, 0.0  ;;  %v8756_v17 = vld [vmem:[#allocation18_spill] sm:$0xff] }
 0x1c4   :  { %v7419_v55 = vmax.f32 %v8751_v26, %v2142_v6  ;;  %v7425_v31 = vmax.f32 %v8752_v9, %v1957_v34  ;;  %v7429_v37 = vmax.f32 %v8754_v15, %v2141_v61  ;;  %v913_v30 = vadd.f32 %v6765_v22, %v912_v23  ;;  %v4828_v1 = vpop.f32.mrb[100].mxu0  ;;  %v5104_v61 = vpop.f32.mrb[100].mxu1 }
 0x1c5   :  { %8750 = vst [vmem:[#allocation11_spill] sm:$0xff] %v7415_v40  ;;  %v2073_v45 = vmax.f32 %v1483_v39, 0.0  ;;  %v1960_v10 = vmax.f32 %v918_v58, 0.0  ;;  %v2144_v6 = vmax.f32 %v1838_v18, 0.0  ;;  %v578_v27 = vadd.f32 %v8755_v53, %v6765_v22  ;;  %v922_v18 = vpop.f32.mrb[101].mxu0  ;;  %v1842_v15 = vpop.f32.mrb[101].mxu1 }
 0x1c6   :  { %8753 = vst [vmem:[#allocation12_spill] sm:$0xff] %v7425_v31  ;;  %v1498_v34 = vadd.f32 %v8756_v17, %v6765_v22  ;;  %v1959_v19 = vmax.f32 %v913_v30, 0.0  ;;  %v2143_v26 = vmax.f32 %v1833_v24, 0.0  ;;  %v8757_v9 = vmax.f32 %v7307_v5, 0.0 }
 0x1c7   :  { %v8759_v7 = vmax.f32 %v7311_v11, 0.0  ;;  %v928_v39 = vadd.f32 %v4828_v1, %v6765_v22  ;;  %v1848_v58 = vadd.f32 %v5104_v61, %v6765_v22  ;;  %v8760_v53 = vmax.f32 %v7315_v12, 0.0  ;;  %v8764_v1 = vld [vmem:[#allocation20_spill] sm:$0xff] }
 0x1c8   :  { %v7440_v23 = vmax.f32 %v8757_v9, %v1960_v10  ;;  %v8762_v24 = vmax.f32 %v7319_v56, 0.0  ;;  %v923_v5 = vadd.f32 %v6765_v22, %v922_v18  ;;  %v1843_v11 = vadd.f32 %v6765_v22, %v1842_v15  ;;  %v8763_v10 = vld [vmem:[#allocation19_spill] sm:$0xff]  ;;  %v5107_v56 = vpop.f32.mrb[102].mxu1 }
 0x1c9   :  { %v7444_v50 = vmax.f32 %v8759_v7, %v2144_v6  ;;  %v7450_v30 = vmax.f32 %v8760_v53, %v1959_v19  ;;  %v573_v6 = vadd.f32 %v6765_v22, %v8763_v10  ;;  %v1493_v61 = vadd.f32 %v6765_v22, %v8764_v1  ;;  %v1852_v31 = vpop.f32.mrb[103].mxu1  ;;  %v8767_v1 = vld [vmem:[#allocation23_spill] sm:$0xff] }
 0x1ca   :  { %8758 = vst [vmem:[#allocation13_spill] sm:$0xff] %v7440_v23  ;;  %v7454_v17 = vmax.f32 %v8762_v24, %v2143_v26  ;;  %v1962_v9 = vmax.f32 %v928_v39, 0.0  ;;  %v2146_v7 = vmax.f32 %v1848_v58, 0.0  ;;  %v1892_v23 = vmax.f32 %v578_v27, 0.0 }
 0x1cb   :  { %8761 = vst [vmem:[#allocation15_spill] sm:$0xff] %v7450_v30  ;;  %v2076_v12 = vmax.f32 %v1498_v34, 0.0  ;;  %v1961_v19 = vmax.f32 %v923_v5, 0.0  ;;  %v2145_v53 = vmax.f32 %v1843_v11, 0.0  ;;  %v4831_v30 = vpop.f32.mrb[102].mxu0  ;;  %v1858_v15 = vadd.f32 %v5107_v56, %v6765_v22 }
 0x1cc   :  { %v7462_v26 = vmax.f32 %v1890_v2, %v1962_v9  ;;  %v7464_v24 = vmax.f32 %v2074_v43, %v2146_v7  ;;  %v938_v18 = vadd.f32 %v4831_v30, %v6765_v22  ;;  %v932_v10 = vpop.f32.mrb[103].mxu0  ;;  %v1853_v34 = vadd.f32 %v6765_v22, %v1852_v31  ;;  %v8766_v2 = vld [vmem:[#allocation21_spill] sm:$0xff] }
 0x1cd   :  { %v7468_v40 = vmax.f32 %v1889_v13, %v1961_v19  ;;  %v7470_v39 = vmax.f32 %v2073_v45, %v2145_v53  ;;  %v933_v27 = vadd.f32 %v6765_v22, %v932_v10  ;;  %v1891_v58 = vmax.f32 %v573_v6, 0.0  ;;  %v4834_v13 = vpop.f32.mrb[104].mxu0 }
 0x1ce   :  { %v588_v5 = vadd.f32 %v8766_v2, %v6765_v22  ;;  %v1964_v43 = vmax.f32 %v938_v18, 0.0  ;;  %v2148_v11 = vmax.f32 %v1858_v15, 0.0  ;;  %v583_v30 = vadd.f32 %v6765_v22, %v8767_v1  ;;  %v942_v31 = vpop.f32.mrb[105].mxu0  ;;  %v8770_v2 = vld [vmem:[#allocation25_spill] sm:$0xff]  ;;  %v8771_v1 = vld [vmem:[#allocation27_spill] sm:$0xff] }
 0x1cf   :  { %8765 = vst [vmem:[#allocation14_spill] sm:$0xff] %v7470_v39  ;;  %v2075_v9 = vmax.f32 %v1493_v61, 0.0  ;;  %v1963_v7 = vmax.f32 %v933_v27, 0.0  ;;  %v2147_v56 = vmax.f32 %v1853_v34, 0.0  ;;  %v948_v53 = vadd.f32 %v4834_v13, %v6765_v22  ;;  %v8774_v13 = vld [vmem:[#allocation29_spill] sm:$0xff] }
 0x1d0   :  { %v7478_v19 = vmax.f32 %v1892_v23, %v1964_v43  ;;  %v7480_v45 = vmax.f32 %v2076_v12, %v2148_v11  ;;  %v943_v18 = vadd.f32 %v6765_v22, %v942_v31  ;;  %v1894_v15 = vmax.f32 %v588_v5, 0.0  ;;  %v4837_v43 = vpop.f32.mrb[106].mxu0 }
 0x1d1   :  { %v7483_v6 = vmax.f32 %v1891_v58, %v1963_v7  ;;  %v7485_v10 = vmax.f32 %v2075_v9, %v2147_v56  ;;  %v598_v61 = vadd.f32 %v8770_v2, %v6765_v22  ;;  %v1966_v27 = vmax.f32 %v948_v53, 0.0  ;;  %v952_v7 = vpop.f32.mrb[107].mxu0  ;;  %v8775_v2 = vld [vmem:[#allocation31_spill] sm:$0xff] }
 0x1d2   :  { %8768 = vst [vmem:[#allocation16_spill] sm:$0xff] %v7478_v19  ;;  %v1893_v34 = vmax.f32 %v583_v30, 0.0  ;;  %v593_v23 = vadd.f32 %v6765_v22, %v8771_v1  ;;  %v1965_v12 = vmax.f32 %v943_v18, 0.0  ;;  %v958_v58 = vadd.f32 %v4837_v43, %v6765_v22 }
 0x1d3   :  { %8769 = vst [vmem:[#allocation17_spill] sm:$0xff] %v7483_v6  ;;  %v7492_v11 = vmax.f32 %v1894_v15, %v1966_v27  ;;  %v953_v56 = vadd.f32 %v6765_v22, %v952_v7  ;;  %v1896_v5 = vmax.f32 %v598_v61, 0.0  ;;  %v608_v31 = vadd.f32 %v8774_v13, %v6765_v22  ;;  %v4840_v6 = vpop.f32.mrb[108].mxu0  ;;  %v2723_v61 = vld [vmem:[%s8543_s3 + $0xa0] sm:$0xff] }
 0x1d4   :  { %v7495_v9 = vmax.f32 %v1893_v34, %v1965_v12  ;;  %v1968_v53 = vmax.f32 %v958_v58, 0.0  ;;  %v1895_v30 = vmax.f32 %v593_v23, 0.0  ;;  %v603_v1 = vadd.f32 %v6765_v22, %v8775_v2  ;;  %v962_v43 = vpop.f32.mrb[109].mxu0  ;;  %v2724_v23 = vld [vmem:[%s8543_s3 + $0xa8] sm:$0xff]  ;;  %v2707_v58 = vld [vmem:[%s8543_s3 + $0x20] sm:$0xff] }
 0x1d5   :  { %8772 = vst [vmem:[#allocation18_spill] sm:$0xff] %v7492_v11  ;;  %v1967_v18 = vmax.f32 %v953_v56, 0.0  ;;  %v968_v27 = vadd.f32 %v4840_v6, %v6765_v22  ;;  %v963_v12 = vadd.f32 %v6765_v22, %v962_v43  ;;  %v1898_v7 = vmax.f32 %v608_v31, 0.0  ;;  %v8778_v6 = vld [vmem:[#allocation33_spill] sm:$0xff]  ;;  %v8779_v2 = vld [vmem:[#allocation35_spill] sm:$0xff] }
 0x1d6   :  { %8773 = vst [vmem:[#allocation19_spill] sm:$0xff] %v7495_v9  ;;  %v7502_v15 = vmax.f32 %v1896_v5, %v1968_v53  ;;  %v618_v56 = vadd.f32 %v8778_v6, %v6765_v22  ;;  %v5304_v13 = vpack.c.bf16 %v2724_v23, %v2723_v61  ;;  %v2708_v53 = vld [vmem:[%s8543_s3 + $0x28] sm:$0xff] }
 0x1d7   :  { %v7505_v34 = vmax.f32 %v1895_v30, %v1967_v18  ;;  %v1970_v5 = vmax.f32 %v968_v27, 0.0  ;;  %v1897_v30 = vmax.f32 %v603_v1, 0.0  ;;  %v613_v18 = vadd.f32 %v6765_v22, %v8779_v2  ;;  %v8782_v1 = vld [vmem:[#allocation37_spill] sm:$0xff] }
 0x1d8   :  { %8776 = vst [vmem:[#allocation20_spill] sm:$0xff] %v7502_v15  ;;  %v1969_v43 = vmax.f32 %v963_v12, 0.0  ;;  %v5306_v15 = vpack.c.bf16 %v2708_v53, %v2707_v58  ;;  %5305 = vmatprep.subr.bf16.mxu1 %v5304_v13  ;;  %v1900_v61 = vmax.f32 %v618_v56, 0.0  ;;  %v628_v23 = vadd.f32 %v8782_v1, %v6765_v22  ;;  %v8783_v12 = vld [vmem:[#allocation39_spill] sm:$0xff] }
 0x1d9   :  { %8777 = vst [vmem:[#allocation21_spill] sm:$0xff] %v7505_v34  ;;  %v4843_v34 = vpop.f32.mrb[110].mxu0  ;;  %v7524_v9 = vmax.f32 %v1898_v7, %v1970_v5  ;;  %v1899_v2 = vmax.f32 %v613_v18, 0.0  ;;  %v623_v58 = vadd.f32 %v6765_v22, %v8783_v12  ;;  %v7543_v56 = vld [vmem:[%s8542_s2] ss:$0 sm:$0xff]  ;;  %v8786_v18 = vld [vmem:[#allocation41_spill] sm:$0xff] }
 0x1da   :  { %v978_v31 = vadd.f32 %v4843_v34, %v6765_v22  ;;  %v972_v11 = vpop.f32.mrb[111].mxu0  ;;  %v7527_v6 = vmax.f32 %v1897_v30, %v1969_v43  ;;  %5307 = vmatpush3.bf16.msra.mxu1 %v5306_v15  ;;  %v1902_v15 = vmax.f32 %v628_v23, 0.0  ;;  %v638_v43 = vadd.f32 %v7543_v56, %v8786_v18 }
 0x1db   :  { %8780 = vst [vmem:[#allocation23_spill] sm:$0xff] %v7524_v9  ;;  %v973_v27 = vadd.f32 %v6765_v22, %v972_v11  ;;  %v4846_v5 = vpop.f32.mrb[112].mxu0 }
 0x1dc   :  { %8781 = vst [vmem:[#allocation25_spill] sm:$0xff] %v7527_v6  ;;  %v1972_v19 = vmax.f32 %v978_v31, 0.0  ;;  %v988_v34 = vadd.f32 %v4846_v5, %v6765_v22  ;;  %v982_v13 = vpop.f32.mrb[113].mxu0 }
 0x1dd   :  { %v1971_v7 = vmax.f32 %v973_v27, 0.0  ;;  %v983_v11 = vadd.f32 %v6765_v22, %v982_v13  ;;  %v1901_v27 = vmax.f32 %v623_v58, 0.0  ;;  %v4849_v12 = vpop.f32.mrb[114].mxu0  ;;  %v1904_v13 = vmax.f32 %v638_v43, 0.0 }
 0x1de   :  { %v7534_v53 = vmax.f32 %v1900_v61, %v1972_v19  ;;  %v1974_v31 = vmax.f32 %v988_v34, 0.0  ;;  %v8787_v19 = vld [vmem:[#allocation43_spill] sm:$0xff]  ;;  %v998_v22 = vadd.f32 %v7543_v56, %v4849_v12  ;;  %v992_v23 = vpop.f32.mrb[115].mxu0 }
 0x1df   :  { %v7537_v30 = vmax.f32 %v1899_v2, %v1971_v7  ;;  %v633_v61 = vadd.f32 %v7543_v56, %v8787_v19  ;;  %v1973_v1 = vmax.f32 %v983_v11, 0.0  ;;  %v993_v5 = vadd.f32 %v7543_v56, %v992_v23  ;;  %v8789_v19 = vld [vmem:[#allocation47_spill] sm:$0xff] }
 0x1e0   :  { %8784 = vst [vmem:[#allocation27_spill] sm:$0xff] %v7534_v53  ;;  %v7549_v2 = vmax.f32 %v1902_v15, %v1974_v31  ;;  %v1976_v18 = vmax.f32 %v998_v22, 0.0  ;;  %v643_v11 = vadd.f32 %v7543_v56, %v8789_v19  ;;  %v4852_v31 = vpop.f32.mrb[116].mxu0 }
 0x1e1   :  { %8785 = vst [vmem:[#allocation29_spill] sm:$0xff] %v7537_v30  ;;  %v2189_v7 = vmax.f32 %v1901_v27, %v1973_v1  ;;  %v8788_v30 = vld [vmem:[#allocation45_spill] sm:$0xff]  ;;  %v1903_v34 = vmax.f32 %v633_v61, 0.0  ;;  %v1975_v15 = vmax.f32 %v993_v5, 0.0  ;;  %v1008_v27 = vadd.f32 %v7543_v56, %v4852_v31  ;;  %v1002_v43 = vpop.f32.mrb[117].mxu0 }
 0x1e2   :  { %v648_v53 = vadd.f32 %v7543_v56, %v8788_v30  ;;  %v7560_v6 = vmax.f32 %v1904_v13, %v1976_v18  ;;  %v1003_v30 = vadd.f32 %v7543_v56, %v1002_v43  ;;  %v8790_v61 = vld [vmem:[#allocation49_spill] sm:$0xff] }
 0x1e3   :  { %v2333_v12 = vmax.f32 %v2189_v7, %v7054_v33  ;;  %v2191_v1 = vmax.f32 %v1903_v34, %v1975_v15  ;;  %v658_v23 = vadd.f32 %v7543_v56, %v8790_v61  ;;  %v1978_v19 = vmax.f32 %v1008_v27, 0.0  ;;  %v8791_v7 = vld [vmem:[#allocation51_spill] sm:$0xff]  ;;  %v4855_v31 = vpop.f32.mrb[118].mxu0  ;;  %v8792_v43 = vld [vmem:[#allocation53_spill] sm:$0xff] }
 0x1e4   :  { %v1906_v22 = vmax.f32 %v648_v53, 0.0  ;;  %v1905_v33 = vmax.f32 %v643_v11, 0.0  ;;  %v653_v13 = vadd.f32 %v7543_v56, %v8791_v7  ;;  %v1977_v18 = vmax.f32 %v1003_v30, 0.0  ;;  %v1012_v53 = vpop.f32.mrb[119].mxu0  ;;  %v8793_v27 = vld [vmem:[#allocation55_spill] sm:$0xff] }
 0x1e5   :  { %2551 = vrot.lane.b32.xlu1 %v2333_v12, %s5563_s1  ;;  %v2335_v34 = vmax.f32 %v2191_v1, %v7087_v3  ;;  %v1018_v12 = vadd.f32 %v7543_v56, %v4855_v31  ;;  %v668_v61 = vadd.f32 %v7543_v56, %v8792_v43  ;;  %v663_v58 = vadd.f32 %v7543_v56, %v8793_v27 }
 0x1e6   :  { %v7572_v15 = vmax.f32 %v1906_v22, %v1978_v19  ;;  %v2193_v5 = vmax.f32 %v1905_v33, %v1977_v18  ;;  %v1013_v11 = vadd.f32 %v7543_v56, %v1012_v53  ;;  %v1908_v30 = vmax.f32 %v658_v23, 0.0 }
 0x1e7   :  { %v1980_v7 = vmax.f32 %v1018_v12, 0.0  ;;  %v1907_v1 = vmax.f32 %v653_v13, 0.0  ;;  %v4858_v19 = vpop.f32.mrb[120].mxu0  ;;  %v1910_v18 = vmax.f32 %v668_v61, 0.0  ;;  %v1909_v53 = vmax.f32 %v663_v58, 0.0  ;;  %v2725_v13 = vld [vmem:[%s8543_s3 + $0xb0] sm:$0xff] }
 0x1e8   :  { %v1979_v22 = vmax.f32 %v1013_v11, 0.0  ;;  %v2337_v31 = vmax.f32 %v2193_v5, %v7117_v20  ;;  %v1028_v27 = vadd.f32 %v7543_v56, %v4858_v19  ;;  %v1022_v33 = vpop.f32.mrb[121].mxu0  ;;  %v2726_v20 = vld [vmem:[%s8543_s3 + $0xb8] sm:$0xff]  ;;  %v2709_v5 = vld [vmem:[%s8543_s3 + $0x30] sm:$0xff] }
 0x1e9   :  { %2561 = vrot.lane.b32.xlu1 %v2335_v34, %s5564_s14  ;;  %v7584_v43 = vmax.f32 %v1908_v30, %v1980_v7  ;;  %v1023_v23 = vadd.f32 %v7543_v56, %v1022_v33  ;;  %v8795_v58 = vld [vmem:[#allocation57_spill] sm:$0xff]  ;;  %v5308_v61 = vpack.c.bf16 %v2726_v20, %v2725_v13  ;;  %v2710_v11 = vld [vmem:[%s8543_s3 + $0x38] sm:$0xff] }
 0x1ea   :  { %v7587_v9 = vmax.f32 %v1907_v1, %v1979_v22  ;;  %v678_v34 = vadd.f32 %v7543_v56, %v8795_v58  ;;  %v1982_v12 = vmax.f32 %v1028_v27, 0.0  ;;  %v8796_v7 = vld [vmem:[#allocation59_spill] sm:$0xff]  ;;  %v5310_v33 = vpack.c.bf16 %v2710_v11, %v2709_v5 }
 0x1eb   :  { %8794 = vst [vmem:[#allocation31_spill] sm:$0xff] %v7584_v43  ;;  %v673_v1 = vadd.f32 %v7543_v56, %v8796_v7  ;;  %v1981_v22 = vmax.f32 %v1023_v23, 0.0  ;;  %v4861_v19 = vpop.f32.mrb[122].mxu0  ;;  %5309 = vmatprep.subr.bf16.mxu1 %v5308_v61  ;;  %v688_v7 = vadd.f32 %v7543_v56, %v8797_v42 }
 0x1ec   :  { %v2198_v3 = vmax.f32 %v1910_v18, %v1982_v12  ;;  %v1038_v27 = vadd.f32 %v7543_v56, %v4861_v19  ;;  %v1032_v13 = vpop.f32.mrb[123].mxu0  ;;  %5311 = vmatpush3.bf16.msra.mxu1 %v5310_v33  ;;  %v1912_v30 = vmax.f32 %v678_v34, 0.0 }
 0x1ed   :  { %2571 = vrot.lane.b32.xlu1 %v2337_v31, %s5565_s15  ;;  %v2197_v20 = vmax.f32 %v1909_v53, %v1981_v22  ;;  %v1033_v58 = vadd.f32 %v7543_v56, %v1032_v13  ;;  %v1911_v38 = vmax.f32 %v673_v1, 0.0  ;;  %v8798_v31 = vld [vmem:[#allocation63_spill] sm:$0xff] }
 0x1ee   :  { %v2342_v23 = vmax.f32 %v2198_v3, %v7167_v47  ;;  %v1984_v43 = vmax.f32 %v1038_v27, 0.0  ;;  %v683_v18 = vadd.f32 %v7543_v56, %v8798_v31  ;;  %v1914_v47 = vmax.f32 %v688_v7, 0.0  ;;  %v8799_v3 = vld [vmem:[#allocation65_spill] sm:$0xff] }
 0x1ef   :  { %v2341_v5 = vmax.f32 %v2197_v20, %v7177_v57  ;;  %v1983_v12 = vmax.f32 %v1033_v58, 0.0  ;;  %v4864_v61 = vpop.f32.mrb[124].mxu0  ;;  %v698_v1 = vadd.f32 %v7543_v56, %v8799_v3 }
 0x1f0   :  { %v7619_v53 = vmax.f32 %v1912_v30, %v1984_v43  ;;  %v1048_v11 = vadd.f32 %v7543_v56, %v4864_v61  ;;  %v1042_v22 = vpop.f32.mrb[125].mxu0  ;;  %2590 = vst.msk [vmem:[#allocation2 + $0x40] sm:$0xff] %vm2365_vm0, %v2342_v23  ;;  %v1913_v43 = vmax.f32 %v683_v18, 0.0  ;;  %v8800_v30 = vld [vmem:[#allocation67_spill] sm:$0xff]  ;;  %v8801_v18 = vld [vmem:[#allocation69_spill] sm:$0xff] }
 0x1f1   :  { %v2199_v34 = vmax.f32 %v1911_v38, %v1983_v12  ;;  %v1043_v42 = vadd.f32 %v7543_v56, %v1042_v22  ;;  %2589 = vst.msk [vmem:[#allocation2 + $0x18] sm:$0xff] %vm2365_vm0, %v2341_v5  ;;  %v693_v31 = vadd.f32 %v7543_v56, %v8800_v30  ;;  %v1916_v5 = vmax.f32 %v698_v1, 0.0  ;;  %v8802_v22 = vld [vmem:[#allocation71_spill] sm:$0xff] }
 0x1f2   :  { %v1986_v19 = vmax.f32 %v1048_v11, 0.0  ;;  %v708_v12 = vadd.f32 %v7543_v56, %v8801_v18 }
 0x1f3   :  { %v1985_v33 = vmax.f32 %v1043_v42, 0.0  ;;  %v4867_v27 = vpop.f32.mrb[126].mxu0  ;;  %v2343_v38 = vmax.f32 %v2199_v34, %v7219_v0  ;;  %v1915_v0 = vmax.f32 %v693_v31, 0.0  ;;  %v703_v34 = vadd.f32 %v7543_v56, %v8802_v22  ;;  %v8803_v31 = vld [vmem:[#allocation73_spill] sm:$0xff] }
 0x1f4   :  { %v7632_v13 = vmax.f32 %v1914_v47, %v1986_v19  ;;  %v1058_v20 = vadd.f32 %v7543_v56, %v4867_v27  ;;  %v1052_v58 = vpop.f32.mrb[127].mxu0  ;;  %v1918_v27 = vmax.f32 %v708_v12, 0.0 }
 0x1f5   :  { %v2201_v7 = vmax.f32 %v1913_v43, %v1985_v33  ;;  %v1053_v23 = vadd.f32 %v7543_v56, %v1052_v58  ;;  %2593 = vrot.lane.b32.xlu1 %v2343_v38, %s5566_s24  ;;  %v718_v38 = vadd.f32 %v7543_v56, %v8803_v31 }
 0x1f6   :  { %v1988_v61 = vmax.f32 %v1058_v20, 0.0 }
 0x1f7   :  { %v1987_v42 = vmax.f32 %v1053_v23, 0.0  ;;  %v4870_v47 = vpop.f32.mrb[128].mxu0  ;;  %v2345_v3 = vmax.f32 %v2201_v7, %v7241_v52  ;;  %v1917_v52 = vmax.f32 %v703_v34, 0.0  ;;  %v8804_v7 = vld [vmem:[#allocation75_spill] sm:$0xff]  ;;  %v1920_v34 = vmax.f32 %v718_v38, 0.0 }
 0x1f8   :  { %v7644_v19 = vmax.f32 %v1916_v5, %v1988_v61  ;;  %v1068_v43 = vadd.f32 %v7543_v56, %v4870_v47  ;;  %v1062_v1 = vpop.f32.mrb[129].mxu0  ;;  %v713_v23 = vadd.f32 %v7543_v56, %v8804_v7  ;;  %v2727_v38 = vld [vmem:[%s8543_s3 + $0xc0] sm:$0xff] }
 0x1f9   :  { %v2203_v30 = vmax.f32 %v1915_v0, %v1987_v42  ;;  %v1063_v33 = vadd.f32 %v7543_v56, %v1062_v1  ;;  %2603 = vrot.lane.b32.xlu1 %v2345_v3, %s5567_s0  ;;  %v8805_v42 = vld [vmem:[#allocation77_spill] sm:$0xff] }
 0x1fa   :  { %v1990_v20 = vmax.f32 %v1068_v43, 0.0  ;;  %v728_v47 = vadd.f32 %v7543_v56, %v8805_v42 }
 0x1fb   :  { %v1989_v5 = vmax.f32 %v1063_v33, 0.0  ;;  %v4873_v18 = vpop.f32.mrb[130].mxu0  ;;  %v2347_v61 = vmax.f32 %v2203_v30, %v7277_v41  ;;  %v1919_v41 = vmax.f32 %v713_v23, 0.0  ;;  %v8806_v30 = vld [vmem:[#allocation79_spill] sm:$0xff]  ;;  %v2728_v23 = vld [vmem:[%s8543_s3 + $0xc8] sm:$0xff] }
 0x1fc   :  { %v7656_v0 = vmax.f32 %v1918_v27, %v1990_v20  ;;  %v1078_v22 = vadd.f32 %v7543_v56, %v4873_v18  ;;  %v1072_v12 = vpop.f32.mrb[131].mxu0  ;;  %v723_v27 = vadd.f32 %v7543_v56, %v8806_v30  ;;  %v5312_v42 = vpack.c.bf16 %v2728_v23, %v2727_v38 }
 0x1fd   :  { %v2205_v3 = vmax.f32 %v1917_v52, %v1989_v5  ;;  %v1073_v43 = vadd.f32 %v7543_v56, %v1072_v12  ;;  %2613 = vrot.lane.b32.xlu1 %v2347_v61, %s5568_s25  ;;  %v2711_v61 = vld [vmem:[%s8543_s3 + $0x40] sm:$0xff] }
 0x1fe   :  { %v1992_v1 = vmax.f32 %v1078_v22, 0.0  ;;  %v1922_v22 = vmax.f32 %v728_v47, 0.0  ;;  %v1921_v33 = vmax.f32 %v723_v27, 0.0  ;;  %v8808_v47 = vld [vmem:[#allocation83_spill] sm:$0xff]  ;;  %5313 = vmatprep.subr.bf16.mxu1 %v5312_v42 }
 0x1ff   :  { %v1991_v31 = vmax.f32 %v1073_v43, 0.0  ;;  %v4876_v20 = vpop.f32.mrb[132].mxu0  ;;  %v2349_v7 = vmax.f32 %v2205_v3, %v7301_v63  ;;  %v2712_v3 = vld [vmem:[%s8543_s3 + $0x48] sm:$0xff] }
 0x200   :  { %v7668_v18 = vmax.f32 %v1920_v34, %v1992_v1  ;;  %v1088_v52 = vadd.f32 %v7543_v56, %v4876_v20  ;;  %v1082_v5 = vpop.f32.mrb[133].mxu0  ;;  %v8807_v43 = vld [vmem:[#allocation81_spill] sm:$0xff]  ;;  %v5314_v20 = vpack.c.bf16 %v2712_v3, %v2711_v61 }
 0x201   :  { %v2207_v12 = vmax.f32 %v1919_v41, %v1991_v31  ;;  %v1083_v63 = vadd.f32 %v7543_v56, %v1082_v5  ;;  %2623 = vrot.lane.b32.xlu0 %v2349_v7, %s5563_s1  ;;  %v738_v34 = vadd.f32 %v7543_v56, %v8807_v43  ;;  %v733_v41 = vadd.f32 %v7543_v56, %v8808_v47  ;;  %v8809_v61 = vld [vmem:[#allocation85_spill] sm:$0xff] }
 0x202   :  { %v1994_v1 = vmax.f32 %v1088_v52, 0.0  ;;  %5315 = vmatpush3.bf16.msra.mxu1 %v5314_v20  ;;  %v748_v3 = vadd.f32 %v7543_v56, %v8809_v61 }
 0x203   :  { %v1993_v31 = vmax.f32 %v1083_v63, 0.0  ;;  %v4879_v5 = vpop.f32.mrb[134].mxu0  ;;  %v2351_v7 = vmax.f32 %v2207_v12, %v7337_v44  ;;  %v1924_v27 = vmax.f32 %v738_v34, 0.0  ;;  %v1923_v12 = vmax.f32 %v733_v41, 0.0  ;;  %v8814_v44 = vld [vmem:[#allocation95_spill] sm:$0xff] }
 0x204   :  { %v7692_v38 = vmax.f32 %v1922_v22, %v1994_v1  ;;  %v1098_v23 = vadd.f32 %v7543_v56, %v4879_v5  ;;  %v1092_v58 = vpop.f32.mrb[135].mxu0  ;;  %v8810_v22 = vld [vmem:[#allocation87_spill] sm:$0xff] }
 0x205   :  { %v2209_v52 = vmax.f32 %v1921_v33, %v1993_v31  ;;  %v1093_v43 = vadd.f32 %v7543_v56, %v1092_v58  ;;  %2633 = vrot.lane.b32.xlu0 %v2351_v7, %s5564_s14  ;;  %v743_v42 = vadd.f32 %v7543_v56, %v8810_v22  ;;  %v1926_v7 = vmax.f32 %v748_v3, 0.0 }
 0x206   :  { %v1996_v63 = vmax.f32 %v1098_v23, 0.0  ;;  %v8811_v23 = vld [vmem:[#allocation89_spill] sm:$0xff] }
 0x207   :  { %v1995_v1 = vmax.f32 %v1093_v43, 0.0  ;;  %v4882_v47 = vpop.f32.mrb[136].mxu0  ;;  %v2353_v33 = vmax.f32 %v2209_v52, %v7361_v8  ;;  %v758_v41 = vadd.f32 %v7543_v56, %v8811_v23  ;;  %v1925_v22 = vmax.f32 %v743_v42, 0.0  ;;  %v8812_v8 = vld [vmem:[#allocation91_spill] sm:$0xff]  ;;  %v8813_v23 = vld [vmem:[#allocation93_spill] sm:$0xff] }
 0x208   :  { %v7704_v20 = vmax.f32 %v1924_v27, %v1996_v63  ;;  %v1108_v58 = vadd.f32 %v7543_v56, %v4882_v47  ;;  %v1102_v34 = vpop.f32.mrb[137].mxu0  ;;  %v753_v52 = vadd.f32 %v7543_v56, %v8812_v8  ;;  %v768_v42 = vadd.f32 %v7543_v56, %v8813_v23 }
 0x209   :  { %v2211_v31 = vmax.f32 %v1923_v12, %v1995_v1  ;;  %v1103_v5 = vadd.f32 %v7543_v56, %v1102_v34  ;;  %2643 = vrot.lane.b32.xlu0 %v2353_v33, %s5565_s15 }
 0x20a   :  { %v1998_v61 = vmax.f32 %v1108_v58, 0.0  ;;  %v1928_v58 = vmax.f32 %v758_v41, 0.0  ;;  %v1927_v43 = vmax.f32 %v753_v52, 0.0  ;;  %v1930_v52 = vmax.f32 %v768_v42, 0.0 }
 0x20b   :  { %v1997_v27 = vmax.f32 %v1103_v5, 0.0  ;;  %v4885_v63 = vpop.f32.mrb[138].mxu0  ;;  %v2355_v12 = vmax.f32 %v2211_v31, %v7405_v14  ;;  %v763_v14 = vadd.f32 %v7543_v56, %v8814_v44 }
 0x20c   :  { %v2214_v1 = vmax.f32 %v1926_v7, %v1998_v61  ;;  %v1118_v47 = vadd.f32 %v7543_v56, %v4885_v63  ;;  %v1112_v33 = vpop.f32.mrb[139].mxu0 }
 0x20d   :  { %v2213_v3 = vmax.f32 %v1925_v22, %v1997_v27  ;;  %v1113_v34 = vadd.f32 %v7543_v56, %v1112_v33  ;;  %2653 = vrot.lane.b32.xlu0 %v2355_v12, %s5569_s19  ;;  %v8815_v12 = vld [vmem:[#allocation97_spill] sm:$0xff]  ;;  %v8816_v33 = vld [vmem:[#allocation100_spill] sm:$0xff] }
 0x20e   :  { %v2358_v8 = vmax.f32 %v2214_v1, %v7419_v55  ;;  %v2000_v5 = vmax.f32 %v1118_v47, 0.0  ;;  %v778_v44 = vadd.f32 %v7543_v56, %v8815_v12  ;;  %v1929_v47 = vmax.f32 %v763_v14, 0.0 }
 0x20f   :  { %v2357_v31 = vmax.f32 %v2213_v3, %v7429_v37  ;;  %v1999_v7 = vmax.f32 %v1113_v34, 0.0  ;;  %v4888_v61 = vpop.f32.mrb[140].mxu0  ;;  %v773_v3 = vadd.f32 %v7543_v56, %v8816_v33 }
 0x210   :  { %v7725_v22 = vmax.f32 %v1928_v58, %v2000_v5  ;;  %v1128_v27 = vadd.f32 %v7543_v56, %v4888_v61  ;;  %v1122_v63 = vpop.f32.mrb[141].mxu0  ;;  %2662 = vst.msk [vmem:[#allocation2 + $0x48] sm:$0xff] %vm2365_vm0, %v2358_v8  ;;  %v1932_v61 = vmax.f32 %v778_v44, 0.0  ;;  %v2729_v44 = vld [vmem:[%s8543_s3 + $0xd0] sm:$0xff] }
 0x211   :  { %v7729_v41 = vmax.f32 %v1927_v43, %v1999_v7  ;;  %v1123_v55 = vadd.f32 %v7543_v56, %v1122_v63  ;;  %2661 = vst.msk [vmem:[#allocation2 + $0x20] sm:$0xff] %vm2365_vm0, %v2357_v31  ;;  %v8818_v7 = vld [vmem:[#allocation22_spill] sm:$0xff]  ;;  %v8821_v63 = vld [vmem:[#allocation28_spill] sm:$0xff] }
 0x212   :  { %v2002_v37 = vmax.f32 %v1128_v27, 0.0  ;;  %v1508_v14 = vadd.f32 %v7543_v56, %v8818_v7  ;;  %v1513_v30 = vadd.f32 %v7543_v56, %v8821_v63 }
 0x213   :  { %v2001_v34 = vmax.f32 %v1123_v55, 0.0  ;;  %v4891_v58 = vpop.f32.mrb[142].mxu0  ;;  %v8819_v55 = vld [vmem:[#allocation24_spill] sm:$0xff] }
 0x214   :  { %v7741_v23 = vmax.f32 %v1930_v52, %v2002_v37  ;;  %v1138_v42 = vadd.f32 %v7543_v56, %v4891_v58  ;;  %v1132_v8 = vpop.f32.mrb[143].mxu0  ;;  %v1503_v12 = vadd.f32 %v7543_v56, %v8819_v55  ;;  %v1931_v52 = vmax.f32 %v773_v3, 0.0 }
 0x215   :  { %v7744_v5 = vmax.f32 %v1929_v47, %v2001_v34  ;;  %v1133_v31 = vadd.f32 %v7543_v56, %v1132_v8  ;;  %v2078_v55 = vmax.f32 %v1508_v14, 0.0  ;;  %v8820_v47 = vld [vmem:[#allocation26_spill] sm:$0xff]  ;;  %v2079_v39 = vmax.f32 %v1513_v30, 0.0 }
 0x216   :  { %v2004_v27 = vmax.f32 %v1138_v42, 0.0  ;;  %v2730_v42 = vld [vmem:[%s8543_s3 + $0xd8] sm:$0xff]  ;;  %v2077_v43 = vmax.f32 %v1503_v12, 0.0 }
 0x217   :  { %8817 = vst [vmem:[#allocation33_spill] sm:$0xff] %v7744_v5  ;;  %v2003_v37 = vmax.f32 %v1133_v31, 0.0  ;;  %v4894_v33 = vpop.f32.mrb[144].mxu0  ;;  %v5316_v31 = vpack.c.bf16 %v2730_v42, %v2729_v44  ;;  %v2714_v14 = vld [vmem:[%s8543_s3 + $0x58] sm:$0xff]  ;;  %v8823_v5 = vld [vmem:[#allocation32_spill] sm:$0xff] }
 0x218   :  { %v7755_v34 = vmax.f32 %v1932_v61, %v2004_v27  ;;  %v1148_v58 = vadd.f32 %v7543_v56, %v4894_v33  ;;  %v1142_v8 = vpop.f32.mrb[145].mxu0  ;;  %v1518_v61 = vadd.f32 %v7543_v56, %v8820_v47  ;;  %v8824_v30 = vld [vmem:[#allocation34_spill] sm:$0xff] }
 0x219   :  { %v7764_v7 = vmax.f32 %v1931_v52, %v2003_v37  ;;  %v1143_v3 = vadd.f32 %v7543_v56, %v1142_v8  ;;  %5317 = vmatprep.subr.bf16.mxu1 %v5316_v31  ;;  %v2713_v52 = vld [vmem:[%s8543_s3 + $0x50] sm:$0xff]  ;;  %v1523_v37 = vadd.f32 %v7543_v56, %v8823_v5 }
 0x21a   :  { %v2006_v27 = vmax.f32 %v1148_v58, 0.0  ;;  %v5318_v8 = vpack.c.bf16 %v2714_v14, %v2713_v52  ;;  %v2080_v42 = vmax.f32 %v1518_v61, 0.0 }
 0x21b   :  { %v2005_v1 = vmax.f32 %v1143_v3, 0.0  ;;  %v4897_v11 = vpop.f32.mrb[146].mxu0  ;;  %v8822_v3 = vld [vmem:[#allocation30_spill] sm:$0xff] }
 0x21c   :  { %v2222_v47 = vmax.f32 %v2006_v27, %v2078_v55  ;;  %v1158_v12 = vadd.f32 %v7543_v56, %v4897_v11  ;;  %v1152_v58 = vpop.f32.mrb[147].mxu0  ;;  %v1528_v31 = vadd.f32 %v7543_v56, %v8822_v3  ;;  %5319 = vmatpush3.bf16.msra.mxu1 %v5318_v8 }
 0x21d   :  { %v2221_v63 = vmax.f32 %v2005_v1, %v2077_v43  ;;  %v1153_v44 = vadd.f32 %v7543_v56, %v1152_v58  ;;  %v8825_v58 = vld [vmem:[#allocation36_spill] sm:$0xff] }
 0x21e   :  { %v2294_v33 = vmax.f32 %v7040_v32, %v2222_v47  ;;  %v2008_v57 = vmax.f32 %v1158_v12, 0.0  ;;  %v2082_v32 = vmax.f32 %v1528_v31, 0.0  ;;  %v1538_v47 = vadd.f32 %v7543_v56, %v8824_v30 }
 0x21f   :  { %v2293_v55 = vmax.f32 %v7050_v48, %v2221_v63  ;;  %v2007_v11 = vmax.f32 %v1153_v44, 0.0  ;;  %v4900_v27 = vpop.f32.mrb[148].mxu0  ;;  %v2081_v12 = vmax.f32 %v1523_v37, 0.0  ;;  %v8826_v37 = vld [vmem:[#allocation38_spill] sm:$0xff] }
 0x220   :  { %v2224_v52 = vmax.f32 %v2008_v57, %v2080_v42  ;;  %v1168_v1 = vadd.f32 %v7543_v56, %v4900_v27  ;;  %v1162_v43 = vpop.f32.mrb[149].mxu0  ;;  %2367 = vst.msk [vmem:[#allocation2 + $0x28] sm:$0xff] %vm2365_vm0, %v2294_v33  ;;  %v1533_v57 = vadd.f32 %v7543_v56, %v8825_v58  ;;  %v8828_v58 = vld [vmem:[#allocation42_spill] sm:$0xff] }
 0x221   :  { %v2223_v61 = vmax.f32 %v2007_v11, %v2079_v39  ;;  %v1163_v14 = vadd.f32 %v7543_v56, %v1162_v43  ;;  %2366 = vst.msk [vmem:[#allocation2] sm:$0xff] %vm2365_vm0, %v2293_v55  ;;  %v1548_v55 = vadd.f32 %v7543_v56, %v8826_v37 }
 0x222   :  { %v2010_v5 = vmax.f32 %v1168_v1, 0.0  ;;  %v2296_v48 = vmax.f32 %v7073_v16, %v2224_v52  ;;  %v2084_v16 = vmax.f32 %v1538_v47, 0.0  ;;  %v2083_v52 = vmax.f32 %v1533_v57, 0.0 }
 0x223   :  { %v2009_v8 = vmax.f32 %v1163_v14, 0.0  ;;  %v4903_v63 = vpop.f32.mrb[150].mxu0  ;;  %v2295_v33 = vmax.f32 %v7083_v49, %v2223_v61  ;;  %v8827_v49 = vld [vmem:[#allocation40_spill] sm:$0xff] }
 0x224   :  { %v2226_v39 = vmax.f32 %v2010_v5, %v2082_v32  ;;  %v1178_v44 = vadd.f32 %v7543_v56, %v4903_v63  ;;  %v1172_v42 = vpop.f32.mrb[151].mxu0  ;;  %2372 = vrot.lane.b32.xlu1 %v2296_v48, %s5566_s24  ;;  %v1543_v1 = vadd.f32 %v7543_v56, %v8827_v49 }
 0x225   :  { %v2225_v3 = vmax.f32 %v2009_v8, %v2081_v12  ;;  %v1173_v31 = vadd.f32 %v7543_v56, %v1172_v42  ;;  %2370 = vrot.lane.b32.xlu0 %v2295_v33, %s5566_s24  ;;  %v2086_v12 = vmax.f32 %v1548_v55, 0.0  ;;  %v8829_v33 = vld [vmem:[#allocation44_spill] sm:$0xff] }
 0x226   :  { %v2012_v11 = vmax.f32 %v1178_v44, 0.0  ;;  %v2298_v27 = vmax.f32 %v7103_v35, %v2226_v39  ;;  %v1558_v35 = vadd.f32 %v7543_v56, %v8828_v58  ;;  %v2085_v63 = vmax.f32 %v1543_v1, 0.0  ;;  %v8830_v42 = vld [vmem:[#allocation108_spill] sm:$0xff]  ;;  %v8832_v1 = vld [vmem:[#allocation109_spill] sm:$0xff] }
 0x227   :  { %v2011_v43 = vmax.f32 %v1173_v31, 0.0  ;;  %v4906_v61 = vpop.f32.mrb[152].mxu0  ;;  %v2297_v14 = vmax.f32 %v7113_v21, %v2225_v3  ;;  %v1553_v21 = vadd.f32 %v7543_v56, %v8829_v33 }
 0x228   :  { %v2228_v32 = vmax.f32 %v2012_v11, %v2084_v16  ;;  %v1188_v30 = vadd.f32 %v7543_v56, %v4906_v61  ;;  %v1182_v5 = vpop.f32.mrb[153].mxu0  ;;  %2383 = vrot.lane.b32.xlu1 %v2298_v27, %s5567_s0  ;;  %v2088_v27 = vmax.f32 %v1558_v35, 0.0 }
 0x229   :  { %v2227_v47 = vmax.f32 %v2011_v43, %v2083_v52  ;;  %v1183_v48 = vadd.f32 %v7543_v56, %v1182_v5  ;;  %v2087_v61 = vmax.f32 %v1553_v21, 0.0  ;;  %v8835_v21 = vld [vmem:[#allocation50_spill] sm:$0xff] }
 0x22a   :  { %v2014_v57 = vmax.f32 %v1188_v30, 0.0  ;;  %v2300_v8 = vmax.f32 %v7133_v29, %v2228_v32  ;;  %v8831_v29 = vld [vmem:[#allocation46_spill] sm:$0xff]  ;;  %v8833_v32 = vld [vmem:[#allocation48_spill] sm:$0xff] }
 0x22b   :  { %v2013_v39 = vmax.f32 %v1183_v48, 0.0  ;;  %v4909_v44 = vpop.f32.mrb[154].mxu0  ;;  %v2299_v3 = vmax.f32 %v8830_v42, %v2227_v47  ;;  %v1568_v52 = vadd.f32 %v7543_v56, %v8831_v29  ;;  %v1563_v30 = vadd.f32 %v7543_v56, %v8833_v32  ;;  %v8834_v48 = vld [vmem:[#allocation110_spill] sm:$0xff]  ;;  %v8836_v42 = vld [vmem:[#allocation111_spill] sm:$0xff]  ;;  %v8838_v29 = vld [vmem:[#allocation112_spill] sm:$0xff] }
 0x22c   :  { %v2230_v31 = vmax.f32 %v2014_v57, %v2086_v12  ;;  %v1198_v16 = vadd.f32 %v7543_v56, %v4909_v44  ;;  %v1192_v37 = vpop.f32.mrb[155].mxu0  ;;  %2381 = vrot.lane.b32.xlu1 %v2297_v14, %s5567_s0 }
 0x22d   :  { %v7820_v55 = vmax.f32 %v2013_v39, %v2085_v63  ;;  %v1193_v11 = vadd.f32 %v7543_v56, %v1192_v37  ;;  %v2090_v33 = vmax.f32 %v1568_v52, 0.0  ;;  %v1578_v39 = vadd.f32 %v7543_v56, %v8835_v21  ;;  %v8837_v37 = vld [vmem:[#allocation52_spill] sm:$0xff]  ;;  %v8840_v21 = vld [vmem:[#allocation113_spill] sm:$0xff] }
 0x22e   :  { %v2016_v49 = vmax.f32 %v1198_v16, 0.0  ;;  %v2302_v43 = vmax.f32 %v8832_v1, %v2230_v31  ;;  %v2089_v16 = vmax.f32 %v1563_v30, 0.0  ;;  %v2732_v52 = vld [vmem:[%s8543_s3 + $0xe8] sm:$0xff]  ;;  %v2715_v1 = vld [vmem:[%s8543_s3 + $0x60] sm:$0xff] }
 0x22f   :  { %v2015_v5 = vmax.f32 %v1193_v11, 0.0  ;;  %v4912_v47 = vpop.f32.mrb[156].mxu0  ;;  %v2301_v14 = vmax.f32 %v8834_v48, %v7820_v55  ;;  %v1573_v55 = vadd.f32 %v7543_v56, %v8837_v37 }
 0x230   :  { %v2232_v12 = vmax.f32 %v2016_v49, %v2088_v27  ;;  %v1208_v58 = vadd.f32 %v7543_v56, %v4912_v47  ;;  %v1202_v57 = vpop.f32.mrb[157].mxu0  ;;  %2394 = vrot.lane.b32.xlu1 %v2300_v8, %s5568_s25  ;;  %v2731_v49 = vld [vmem:[%s8543_s3 + $0xe0] sm:$0xff]  ;;  %v2716_v47 = vld [vmem:[%s8543_s3 + $0x68] sm:$0xff] }
 0x231   :  { %v7832_v35 = vmax.f32 %v2015_v5, %v2087_v61  ;;  %v1203_v63 = vadd.f32 %v7543_v56, %v1202_v57  ;;  %v5320_v5 = vpack.c.bf16 %v2732_v52, %v2731_v49  ;;  %v2092_v57 = vmax.f32 %v1578_v39, 0.0 }
 0x232   :  { %v2018_v44 = vmax.f32 %v1208_v58, 0.0  ;;  %v2304_v31 = vmax.f32 %v8836_v42, %v2232_v12  ;;  %v5322_v58 = vpack.c.bf16 %v2716_v47, %v2715_v1  ;;  %v8841_v42 = vld [vmem:[#allocation56_spill] sm:$0xff] }
 0x233   :  { %v2017_v11 = vmax.f32 %v1203_v63, 0.0  ;;  %v4915_v27 = vpop.f32.mrb[158].mxu0  ;;  %v2303_v8 = vmax.f32 %v8838_v29, %v7832_v35  ;;  %v8839_v35 = vld [vmem:[#allocation54_spill] sm:$0xff]  ;;  %5321 = vmatprep.subr.bf16.mxu1 %v5320_v5 }
 0x234   :  { %v2234_v61 = vmax.f32 %v2018_v44, %v2090_v33  ;;  %v1218_v32 = vadd.f32 %v7543_v56, %v4915_v27  ;;  %v1212_v30 = vpop.f32.mrb[159].mxu0  ;;  %2392 = vrot.lane.b32.xlu1 %v2299_v3, %s5568_s25  ;;  %2416 = vrot.lane.b32.xlu0 %v2304_v31, %s5564_s14  ;;  %v1588_v63 = vadd.f32 %v7543_v56, %v8839_v35  ;;  %v2091_v3 = vmax.f32 %v1573_v55, 0.0  ;;  %v8844_v5 = vld [vmem:[#allocation6_spill] sm:$0xff] }
 0x235   :  { %v7857_v48 = vmax.f32 %v2017_v11, %v2089_v16  ;;  %v1213_v12 = vadd.f32 %v7543_v56, %v1212_v30  ;;  %v1583_v31 = vadd.f32 %v7543_v56, %v8841_v42  ;;  %v8842_v16 = vld [vmem:[#allocation114_spill] sm:$0xff]  ;;  %5323 = vmatpush3.bf16.msra.mxu1 %v5322_v58 }
 0x236   :  { %v2020_v33 = vmax.f32 %v1218_v32, 0.0  ;;  %v2306_v44 = vmax.f32 %v8840_v21, %v2234_v61  ;;  %v2094_v1 = vmax.f32 %v1588_v63, 0.0  ;;  %v8843_v61 = vld [vmem:[#allocation58_spill] sm:$0xff] }
 0x237   :  { %v2019_v37 = vmax.f32 %v1213_v12, 0.0  ;;  %v4918_v27 = vpop.f32.mrb[160].mxu0  ;;  %v2305_v11 = vmax.f32 %v8842_v16, %v7857_v48  ;;  %v1598_v32 = vadd.f32 %v7543_v56, %v8843_v61  ;;  %v2093_v48 = vmax.f32 %v1583_v31, 0.0  ;;  %v8845_v12 = vld [vmem:[#allocation60_spill] sm:$0xff] }
 0x238   :  { %v2236_v29 = vmax.f32 %v2020_v33, %v2092_v57  ;;  %v1228_v39 = vadd.f32 %v7543_v56, %v4918_v27  ;;  %v1222_v49 = vpop.f32.mrb[161].mxu0  ;;  %2405 = vrot.lane.b32.xlu1 %v2302_v43, %s5563_s1  ;;  %2427 = vrot.lane.b32.xlu0 %v2306_v44, %s5565_s15  ;;  %v1593_v58 = vadd.f32 %v7543_v56, %v8845_v12  ;;  %v8846_v43 = vld [vmem:[#allocation7_spill] sm:$0xff]  ;;  %v8848_v16 = vld [vmem:[#allocation8_spill] sm:$0xff] }
 0x239   :  { %v7870_v52 = vmax.f32 %v2019_v37, %v2091_v3  ;;  %v1223_v55 = vadd.f32 %v7543_v56, %v1222_v49  ;;  %v2096_v31 = vmax.f32 %v1598_v32, 0.0  ;;  %v8847_v37 = vld [vmem:[#allocation62_spill] sm:$0xff] }
 0x23a   :  { %v2022_v30 = vmax.f32 %v1228_v39, 0.0  ;;  %v2308_v47 = vmax.f32 %v8844_v5, %v2236_v29  ;;  %v1608_v27 = vadd.f32 %v7543_v56, %v8847_v37  ;;  %v2095_v49 = vmax.f32 %v1593_v58, 0.0  ;;  %v8854_v37 = vld [vmem:[#allocation103_spill] sm:$0xff] }
 0x23b   :  { %v2021_v57 = vmax.f32 %v1223_v55, 0.0  ;;  %v4921_v35 = vpop.f32.mrb[162].mxu0  ;;  %v2307_v33 = vmax.f32 %v8846_v43, %v7870_v52  ;;  %v8849_v52 = vld [vmem:[#allocation64_spill] sm:$0xff] }
 0x23c   :  { %v2238_v21 = vmax.f32 %v2022_v30, %v2094_v1  ;;  %v1238_v44 = vadd.f32 %v7543_v56, %v4921_v35  ;;  %v1232_v3 = vpop.f32.mrb[163].mxu0  ;;  %2403 = vrot.lane.b32.xlu1 %v2301_v14, %s5563_s1  ;;  %2438 = vrot.lane.b32.xlu0 %v2308_v47, %s5569_s19  ;;  %v1603_v55 = vadd.f32 %v7543_v56, %v8849_v52  ;;  %v8850_v1 = vld [vmem:[#allocation99_spill] sm:$0xff]  ;;  %v2098_v58 = vmax.f32 %v1608_v27, 0.0 }
 0x23d   :  { %v2237_v63 = vmax.f32 %v2021_v57, %v2093_v48  ;;  %v1233_v42 = vadd.f32 %v7543_v56, %v1232_v3  ;;  %v8851_v57 = vld [vmem:[#allocation66_spill] sm:$0xff] }
 0x23e   :  { %v2310_v29 = vmax.f32 %v8848_v16, %v2238_v21  ;;  %v2024_v39 = vmax.f32 %v1238_v44, 0.0  ;;  %v1618_v35 = vadd.f32 %v7543_v56, %v8851_v57  ;;  %v8852_v21 = vld [vmem:[#allocation102_spill] sm:$0xff]  ;;  %v2097_v3 = vmax.f32 %v1603_v55, 0.0  ;;  %v8858_v57 = vld [vmem:[#allocation105_spill] sm:$0xff] }
 0x23f   :  { %v2309_v61 = vmax.f32 %v8850_v1, %v2237_v63  ;;  %v2023_v30 = vmax.f32 %v1233_v42, 0.0  ;;  %v4924_v14 = vpop.f32.mrb[164].mxu0  ;;  %v8853_v63 = vld [vmem:[#allocation68_spill] sm:$0xff]  ;;  %v8855_v55 = vld [vmem:[#allocation70_spill] sm:$0xff] }
 0x240   :  { %v2240_v5 = vmax.f32 %v2024_v39, %v2096_v31  ;;  %v1248_v47 = vadd.f32 %v7543_v56, %v4924_v14  ;;  %v1242_v48 = vpop.f32.mrb[165].mxu0  ;;  %2414 = vrot.lane.b32.xlu1 %v2303_v8, %s5564_s14  ;;  %2446 = vst.msk [vmem:[#allocation2 + $0x30] sm:$0xff] %vm2365_vm0, %v2310_v29  ;;  %v1613_v42 = vadd.f32 %v7543_v56, %v8853_v63  ;;  %v2100_v1 = vmax.f32 %v1618_v35, 0.0  ;;  %v8856_v14 = vld [vmem:[#allocation104_spill] sm:$0xff] }
 0x241   :  { %v2239_v32 = vmax.f32 %v2023_v30, %v2095_v49  ;;  %v1243_v12 = vadd.f32 %v7543_v56, %v1242_v48  ;;  %2445 = vst.msk [vmem:[#allocation2 + $0x8] sm:$0xff] %vm2365_vm0, %v2309_v61  ;;  %v1628_v61 = vadd.f32 %v7543_v56, %v8855_v55  ;;  %v8857_v48 = vld [vmem:[#allocation72_spill] sm:$0xff]  ;;  %v8862_v55 = vld [vmem:[#allocation10_spill] sm:$0xff] }
 0x242   :  { %v2026_v43 = vmax.f32 %v1248_v47, 0.0  ;;  %v2312_v44 = vmax.f32 %v8852_v21, %v2240_v5  ;;  %v2099_v47 = vmax.f32 %v1613_v42, 0.0  ;;  %v8859_v42 = vld [vmem:[#allocation74_spill] sm:$0xff] }
 0x243   :  { %v2025_v31 = vmax.f32 %v1243_v12, 0.0  ;;  %v4927_v8 = vpop.f32.mrb[166].mxu0  ;;  %v2311_v16 = vmax.f32 %v8854_v37, %v2239_v32  ;;  %v1623_v32 = vadd.f32 %v7543_v56, %v8857_v48  ;;  %v2102_v63 = vmax.f32 %v1628_v61, 0.0  ;;  %v8860_v37 = vld [vmem:[#allocation9_spill] sm:$0xff]  ;;  %v2734_v61 = vld [vmem:[%s8543_s3 + $0xf8] sm:$0xff] }
 0x244   :  { %v2242_v29 = vmax.f32 %v2026_v43, %v2098_v58  ;;  %v1258_v39 = vadd.f32 %v7543_v56, %v4927_v8  ;;  %v1252_v49 = vpop.f32.mrb[167].mxu0  ;;  %2425 = vrot.lane.b32.xlu1 %v2305_v11, %s5565_s15  ;;  %2451 = vrot.lane.b32.xlu0 %v2312_v44, %s5566_s24 }
 0x245   :  { %v2241_v27 = vmax.f32 %v2025_v31, %v2097_v3  ;;  %v1253_v52 = vadd.f32 %v7543_v56, %v1252_v49  ;;  %v1638_v31 = vadd.f32 %v7543_v56, %v8859_v42  ;;  %v8861_v49 = vld [vmem:[#allocation76_spill] sm:$0xff] }
 0x246   :  { %v2028_v30 = vmax.f32 %v1258_v39, 0.0  ;;  %v2314_v5 = vmax.f32 %v8856_v14, %v2242_v29  ;;  %v2101_v39 = vmax.f32 %v1623_v32, 0.0 }
 0x247   :  { %v2027_v12 = vmax.f32 %v1253_v52, 0.0  ;;  %v4930_v58 = vpop.f32.mrb[168].mxu0  ;;  %v2313_v11 = vmax.f32 %v8858_v57, %v2241_v27  ;;  %v1633_v27 = vadd.f32 %v7543_v56, %v8861_v49  ;;  %v8863_v57 = vld [vmem:[#allocation78_spill] sm:$0xff] }
 0x248   :  { %v2244_v43 = vmax.f32 %v2028_v30, %v2100_v1  ;;  %v1268_v21 = vadd.f32 %v7543_v56, %v4930_v58  ;;  %v1262_v44 = vpop.f32.mrb[169].mxu0  ;;  %2436 = vrot.lane.b32.xlu1 %v2307_v33, %s5569_s19  ;;  %2449 = vrot.lane.b32.xlu0 %v2311_v16, %s5566_s24  ;;  %v2733_v16 = vld [vmem:[%s8543_s3 + $0xf0] sm:$0xff]  ;;  %v2104_v58 = vmax.f32 %v1638_v31, 0.0 }
 0x249   :  { %v2243_v35 = vmax.f32 %v2027_v12, %v2099_v47  ;;  %v1263_v3 = vadd.f32 %v7543_v56, %v1262_v44  ;;  %v5324_v48 = vpack.c.bf16 %v2734_v61, %v2733_v16  ;;  %v8864_v44 = vld [vmem:[#allocation11_spill] sm:$0xff]  ;;  %v2717_v31 = vld [vmem:[%s8543_s3 + $0x70] sm:$0xff] }
 0x24a   :  { %v2030_v8 = vmax.f32 %v1268_v21, 0.0  ;;  %v2316_v29 = vmax.f32 %v8860_v37, %v2244_v43  ;;  %v1648_v43 = vadd.f32 %v7543_v56, %v8863_v57  ;;  %v8870_v57 = vld [vmem:[#allocation84_spill] sm:$0xff] }
 0x24b   :  { %v2029_v52 = vmax.f32 %v1263_v3, 0.0  ;;  %v4933_v1 = vpop.f32.mrb[170].mxu0  ;;  %v2315_v33 = vmax.f32 %v8862_v55, %v2243_v35  ;;  %5325 = vmatprep.subr.bf16.mxu1 %v5324_v48  ;;  %v2103_v3 = vmax.f32 %v1633_v27, 0.0 }
 0x24c   :  { %v2246_v30 = vmax.f32 %v2030_v8, %v2102_v63  ;;  %v1278_v14 = vadd.f32 %v7543_v56, %v4933_v1  ;;  %v1272_v47 = vpop.f32.mrb[171].mxu0  ;;  %2459 = vrot.lane.b32.xlu1 %v2313_v11, %s5567_s0  ;;  %2461 = vrot.lane.b32.xlu0 %v2314_v5, %s5567_s0  ;;  %v8865_v63 = vld [vmem:[#allocation80_spill] sm:$0xff]  ;;  %v8867_v1 = vmax.f32 %v7587_v9, %v7147_v51 }
 0x24d   :  { %v7930_v32 = vmax.f32 %v2029_v52, %v2101_v39  ;;  %v1273_v12 = vadd.f32 %v7543_v56, %v1272_v47  ;;  %v1643_v42 = vadd.f32 %v7543_v56, %v8865_v63  ;;  %v8866_v5 = vld [vmem:[#allocation12_spill] sm:$0xff]  ;;  %v2718_v39 = vld [vmem:[%s8543_s3 + $0x78] sm:$0xff]  ;;  %v1653_v51 = vadd.f32 %v7543_v56, %v8870_v57 }
 0x24e   :  { %v2032_v21 = vmax.f32 %v1278_v14, 0.0  ;;  %v2318_v35 = vmax.f32 %v8864_v44, %v2246_v30  ;;  %v5326_v55 = vpack.c.bf16 %v2718_v39, %v2717_v31  ;;  %v2106_v30 = vmax.f32 %v1648_v43, 0.0  ;;  %v8868_v14 = vld [vmem:[#allocation82_spill] sm:$0xff]  ;;  %v7968_v43 = vld [vmem:[%s8542_s2] ss:$0 sm:$0xff]  ;;  %s5539_s2 = scalar_lea.vmem %s4154_s21, 32 }
 0x24f   :  { %v2031_v11 = vmax.f32 %v1273_v12, 0.0  ;;  %v4936_v8 = vpop.f32.mrb[172].mxu0  ;;  %v2317_v37 = vmax.f32 %v8866_v5, %v7930_v32  ;;  %v1658_v47 = vadd.f32 %v7543_v56, %v8868_v14  ;;  %v8869_v32 = vld [vmem:[#allocation13_spill] sm:$0xff]  ;;  %v8872_v5 = vld [vmem:[#allocation86_spill] sm:$0xff]  ;;  %p5540_p0 = scmp.ne.s32.totalorder %s4154_s21, %s5539_s2  ;;  %p5545_p2 = scmp.lt.s32.totalorder %s5539_s2, %s5539_s2 }
 0x250   :  { %v7946_v49 = vmax.f32 %v2032_v21, %v2104_v58  ;;  %v1288_v27 = vadd.f32 %v7543_v56, %v4936_v8  ;;  %v1282_v52 = vpop.f32.mrb[173].mxu0  ;;  %2581 = vrot.lane.b32.xlu1 %v8867_v1, %s5569_s19  ;;  %2471 = vrot.lane.b32.xlu0 %v2316_v29, %s5568_s25  ;;  %v2105_v58 = vmax.f32 %v1643_v42, 0.0  ;;  %v8871_v21 = vld [vmem:[#allocation15_spill] sm:$0xff]  ;;  %v1668_v31 = vadd.f32 %v7968_v43, %v8872_v5  ;;  %v8874_v57 = vld [vmem:[#allocation90_spill] sm:$0xff] }
 0x251   :  { %v7954_v16 = vmax.f32 %v2031_v11, %v2103_v3  ;;  %v1283_v61 = vadd.f32 %v7543_v56, %v1282_v52  ;;  %5327 = vmatpush3.bf16.msra.mxu1 %v5326_v55  ;;  %v2108_v8 = vmax.f32 %v1658_v47, 0.0  ;;  %v8873_v52 = vld [vmem:[#allocation88_spill] sm:$0xff]  ;;  %p5546_p3 = por %p5545_p2, %p5544_p1 }
 0x252   :  { %v2034_v48 = vmax.f32 %v1288_v27, 0.0  ;;  %v2320_v12 = vmax.f32 %v8869_v32, %v7946_v49  ;;  %v2107_v27 = vmax.f32 %v1653_v51, 0.0  ;;  %v1663_v1 = vadd.f32 %v7968_v43, %v8873_v52 }
 0x253   :  { %v2033_v9 = vmax.f32 %v1283_v61, 0.0  ;;  %v4939_v29 = vpop.f32.mrb[174].mxu0  ;;  %v2319_v44 = vmax.f32 %v8871_v21, %v7954_v16  ;;  %v1678_v51 = vadd.f32 %v7968_v43, %v8874_v57  ;;  %p5547_p4 = pnand %p5546_p3, %p5540_p0 }
 0x254   :  { %v2250_v3 = vmax.f32 %v2034_v48, %v2106_v30  ;;  %v1298_v63 = vadd.f32 %v7968_v43, %v4939_v29  ;;  %v1292_v11 = vpop.f32.mrb[175].mxu0  ;;  %2469 = vrot.lane.b32.xlu0 %v2315_v33, %s5568_s25  ;;  %v8875_v29 = vld [vmem:[#allocation16_spill] sm:$0xff] }
 0x255   :  { %v7972_v42 = vmax.f32 %v2033_v9, %v2105_v58  ;;  %v1293_v56 = vadd.f32 %v7968_v43, %v1292_v11  ;;  %v2110_v58 = vmax.f32 %v1668_v31, 0.0  ;;  %v8876_v11 = vld [vmem:[#allocation92_spill] sm:$0xff] }
 0x256   :  { %v2036_v39 = vmax.f32 %v1298_v63, 0.0  ;;  %v2322_v49 = vmax.f32 %v7462_v26, %v2250_v3  ;;  %v2109_v63 = vmax.f32 %v1663_v1, 0.0 }
 0x257   :  { %v7980_v55 = vpop.permute.xlu1 %2551  ;;  %v2035_v61 = vmax.f32 %v1293_v56, 0.0  ;;  %v4942_v30 = vpop.f32.mrb[176].mxu0  ;;  %v2321_v33 = vmax.f32 %v7468_v40, %v7972_v42  ;;  %v1673_v56 = vadd.f32 %v7968_v43, %v8876_v11  ;;  %v8881_v11 = vld [vmem:[#allocation19_spill] sm:$0xff]  ;;  %v8893_v42 = vmax.f32 %v7619_v53, %v7203_v62 }
 0x258   :  { %v2252_v14 = vmax.f32 %v2036_v39, %v2108_v8  ;;  %v1308_v47 = vadd.f32 %v7968_v43, %v4942_v30  ;;  %v1302_v48 = vpop.f32.mrb[177].mxu0  ;;  %2501 = vrot.lane.b32.xlu1 %v2322_v49, %s5565_s15  ;;  %2481 = vrot.lane.b32.xlu0 %v2318_v35, %s5563_s1  ;;  %v8877_v39 = vld [vmem:[#allocation17_spill] sm:$0xff]  ;;  %v2112_v30 = vmax.f32 %v1678_v51, 0.0  ;;  %v8882_v51 = vmax.f32 %v7549_v2, %v7044_v25 }
 0x259   :  { %v7987_v26 = vmax.f32 %v2035_v61, %v2107_v27  ;;  %v1303_v32 = vadd.f32 %v7968_v43, %v1302_v48  ;;  %v8879_v48 = vld [vmem:[#allocation18_spill] sm:$0xff]  ;;  %v8885_v25 = vld [vmem:[#allocation101_spill] sm:$0xff]  ;;  %v8897_v53 = vmax.f32 %v7644_v19, %v7267_v46  ;;  %v8902_v46 = vmax.f32 %v7725_v22, %v7444_v50 }
 0x25a   :  { %v2038_v9 = vmax.f32 %v1308_v47, 0.0  ;;  %v2324_v3 = vmax.f32 %v8875_v29, %v2252_v14  ;;  %v8878_v14 = vld [vmem:[#allocation94_spill] sm:$0xff]  ;;  %v1693_v2 = vadd.f32 %v7968_v43, %v8885_v25  ;;  %v8903_v19 = vmax.f32 %v7668_v18, %v7327_v4  ;;  %v8909_v18 = vld [vmem:[#allocation33_spill] sm:$0xff] }
 0x25b   :  { %v2037_v8 = vmax.f32 %v1303_v32, 0.0  ;;  %v4945_v5 = vpop.f32.mrb[178].mxu0  ;;  %v8000_v31 = vpop.permute.xlu1 %2561  ;;  %v1688_v47 = vadd.f32 %v7968_v43, %v8878_v14  ;;  %v8906_v50 = vmax.f32 %v7692_v38, %v7351_v60  ;;  %v8907_v4 = vmax.f32 %v7704_v20, %v7389_v59  ;;  %v8910_v60 = vld [vmem:[#allocation14_spill] sm:$0xff] }
 0x25c   :  { %v2254_v49 = vmax.f32 %v2038_v9, %v2110_v58  ;;  %v1318_v27 = vadd.f32 %v7968_v43, %v4945_v5  ;;  %v1312_v52 = vpop.f32.mrb[179].mxu0  ;;  %2511 = vrot.lane.b32.xlu1 %v2324_v3, %s5569_s19  ;;  %2479 = vrot.lane.b32.xlu0 %v2317_v37, %s5563_s1  ;;  %v2111_v58 = vmax.f32 %v1673_v56, 0.0  ;;  %v8880_v9 = vld [vmem:[#allocation96_spill] sm:$0xff]  ;;  %v8911_v38 = vmax.f32 %v8909_v18, %v8910_v60 }
 0x25d   :  { %v2253_v61 = vmax.f32 %v2037_v8, %v2109_v63  ;;  %v1313_v1 = vadd.f32 %v7968_v43, %v1312_v52  ;;  %v1683_v29 = vadd.f32 %v7968_v43, %v8880_v9  ;;  %v8883_v52 = vld [vmem:[#allocation98_spill] sm:$0xff]  ;;  %v8912_v59 = vmax.f32 %v7764_v7, %v7485_v10 }
 0x25e   :  { %v2326_v32 = vmax.f32 %v8879_v48, %v2254_v49  ;;  %v2040_v57 = vmax.f32 %v1318_v27, 0.0  ;;  %v2114_v27 = vmax.f32 %v1688_v47, 0.0 }
 0x25f   :  { %v2325_v3 = vmax.f32 %v8881_v11, %v2253_v61  ;;  %v2039_v5 = vmax.f32 %v1313_v1, 0.0  ;;  %v4948_v37 = vpop.f32.mrb[180].mxu0  ;;  %v1698_v61 = vadd.f32 %v7968_v43, %v8883_v52  ;;  %v2113_v48 = vmax.f32 %v1683_v29, 0.0 }
 0x260   :  { %v2256_v35 = vmax.f32 %v2040_v57, %v2112_v30  ;;  %v1328_v63 = vadd.f32 %v7968_v43, %v4948_v37  ;;  %v1322_v8 = vpop.f32.mrb[181].mxu0  ;;  %2553 = vrot.lane.b32.xlu1 %v8882_v51, %s5563_s1  ;;  %2491 = vrot.lane.b32.xlu0 %v2320_v12, %s5564_s14  ;;  %2518 = vst.msk [vmem:[#allocation2 + $0x38] sm:$0xff] %vm2365_vm0, %v2326_v32  ;;  %v8884_v30 = vld [vmem:[#allocation20_spill] sm:$0xff]  ;;  %v8025_v12 = vpop.permute.xlu1 %2571 }
 0x261   :  { %v8016_v56 = vmax.f32 %v2039_v5, %v2111_v58  ;;  %v1323_v49 = vadd.f32 %v7968_v43, %v1322_v8  ;;  %2517 = vst.msk [vmem:[#allocation2 + $0x10] sm:$0xff] %vm2365_vm0, %v2325_v3  ;;  %v8886_v58 = vld [vmem:[#allocation21_spill] sm:$0xff]  ;;  %v8887_v5 = vmax.f32 %v7560_v6, %v7077_v36  ;;  %v2751_v37 = vld [vmem:[%s8543_s3 + $0x180] sm:$0xff]  ;;  %v2116_v8 = vmax.f32 %v1698_v61, 0.0 }
 0x262   :  { %v2042_v1 = vmax.f32 %v1328_v63, 0.0  ;;  %v2328_v14 = vmax.f32 %v8884_v30, %v2256_v35  ;;  %v2752_v63 = vld [vmem:[%s8543_s3 + $0x188] sm:$0xff]  ;;  %v8888_v6 = vld [vmem:[#allocation23_spill] sm:$0xff] }
 0x263   :  { %v2041_v32 = vmax.f32 %v1323_v49, 0.0  ;;  %v4951_v57 = vpop.f32.mrb[182].mxu0  ;;  %v2327_v9 = vmax.f32 %v8886_v58, %v8016_v56  ;;  %v5328_v56 = vpack.c.bf16 %v2752_v63, %v2751_v37  ;;  %v2115_v49 = vmax.f32 %v1693_v2, 0.0  ;;  %v8890_v61 = vld [vmem:[#allocation27_spill] sm:$0xff]  ;;  %v8895_v2 = vld [vmem:[#allocation106_spill] sm:$0xff] }
 0x264   :  { %v2258_v11 = vmax.f32 %v2042_v1, %v2114_v27  ;;  %v1338_v47 = vadd.f32 %v7968_v43, %v4951_v57  ;;  %v1332_v3 = vpop.f32.mrb[183].mxu0  ;;  %2563 = vrot.lane.b32.xlu1 %v8887_v5, %s5564_s14  ;;  %2489 = vrot.lane.b32.xlu0 %v2319_v44, %s5564_s14  ;;  %v8889_v44 = vld [vmem:[#allocation25_spill] sm:$0xff]  ;;  %v8896_v62 = vmax.f32 %v7572_v15, %v8895_v2 }
 0x265   :  { %v2257_v35 = vmax.f32 %v2041_v32, %v2113_v48  ;;  %v1333_v29 = vadd.f32 %v7968_v43, %v1332_v3  ;;  %5329 = vmatprep.subr.bf16.mxu1 %v5328_v56  ;;  %v8891_v48 = vld [vmem:[#allocation29_spill] sm:$0xff]  ;;  %v8901_v58 = vmax.f32 %v7656_v0, %v7291_v28  ;;  %v8905_v28 = vmax.f32 %v7755_v34, %v7480_v45 }
 0x266   :  { %v2044_v36 = vmax.f32 %v1338_v47, 0.0  ;;  %v2330_v51 = vmax.f32 %v8888_v6, %v2258_v11  ;;  %v8904_v11 = vmax.f32 %v7741_v23, %v7464_v24  ;;  %v8908_v24 = vmax.f32 %v7729_v41, %v7454_v17 }
 0x267   :  { %v2043_v16 = vmax.f32 %v1333_v29, 0.0  ;;  %v2594_v21 = vpop.permute.xlu1 %2593  ;;  %v2329_v27 = vmax.f32 %v8889_v44, %v2257_v35 }
 0x268   :  { %v2260_v43 = vmax.f32 %v2044_v36, %v2116_v8  ;;  %2599 = vst.msk [vmem:[#allocation2 + $0x18] sm:$0xff] %vm2376_vm1, %v2594_v21  ;;  %2523 = vrot.lane.b32.xlu1 %v2328_v14, %s5566_s24  ;;  %2499 = vrot.lane.b32.xlu0 %v2321_v33, %s5565_s15  ;;  %v8892_v14 = vmax.f32 %v8877_v39, %v7987_v26 }
 0x269   :  { %v2259_v52 = vmax.f32 %v2043_v16, %v2115_v49  ;;  %v8894_v26 = vmax.f32 %v7632_v13, %v7231_v54  ;;  %v8898_v54 = vld [vmem:[#allocation31_spill] sm:$0xff] }
 0x26a   :  { %v2332_v1 = vmax.f32 %v8890_v61, %v2260_v43  ;;  %v8899_v13 = vld [vmem:[#allocation107_spill] sm:$0xff] }
 0x26b   :  { %v2604_v30 = vpop.permute.xlu1 %2603  ;;  %v2331_v25 = vmax.f32 %v8891_v48, %v2259_v52  ;;  %v8900_v57 = vmax.f32 %v8898_v54, %v8899_v13  ;;  %v2738_v54 = vld [vmem:[%s8543_s3 + $0x118] sm:$0xff] }
 0x26c   :  { %2609 = vst.msk [vmem:[#allocation2 + $0x18] sm:$0xff] %vm2387_vm2, %v2604_v30  ;;  %2533 = vrot.lane.b32.xlu1 %v2330_v51, %s5567_s0  ;;  %2509 = vrot.lane.b32.xlu0 %v8892_v14, %s5569_s19  ;;  %v2735_v14 = vld [vmem:[%s8543_s3 + $0x100] sm:$0xff] }
 0x26f   :  { %v2614_v40 = vpop.permute.xlu1 %2613 }
 0x270   :  { %2619 = vst.msk [vmem:[#allocation2 + $0x18] sm:$0xff] %vm2398_vm3, %v2614_v40  ;;  %2543 = vrot.lane.b32.xlu1 %v2332_v1, %s5568_s25  ;;  %2595 = vrot.lane.b32.xlu0 %v8893_v42, %s5566_s24  ;;  %v2736_v40 = vld [vmem:[%s8543_s3 + $0x108] sm:$0xff]  ;;  %v2753_v42 = vld [vmem:[%s8543_s3 + $0x190] sm:$0xff] }
 0x273   :  { %v2624_v33 = vpop.permute.xlu0 %2623 }
 0x274   :  { %2629 = vst.msk [vmem:[#allocation2 + $0x18] sm:$0xff] %vm2409_vm4, %v2624_v33  ;;  %2541 = vrot.lane.b32.xlu1 %v2331_v25, %s5568_s25  ;;  %2605 = vrot.lane.b32.xlu0 %v8894_v26, %s5567_s0  ;;  %v2754_v33 = vld [vmem:[%s8543_s3 + $0x198] sm:$0xff]  ;;  %v5330_v26 = vpack.c.bf16 %v2736_v40, %v2735_v14  ;;  %v2749_v14 = vld [vmem:[%s8543_s3 + $0x170] sm:$0xff] }
 0x275   :  { %v2750_v40 = vld [vmem:[%s8543_s3 + $0x178] sm:$0xff] }
 0x277   :  { %v2634_v39 = vpop.permute.xlu0 %2633 }
 0x278   :  { %2639 = vst.msk [vmem:[#allocation2 + $0x18] sm:$0xff] %vm2420_vm5, %v2634_v39  ;;  %2573 = vrot.lane.b32.xlu1 %v8896_v62, %s5565_s15  ;;  %2615 = vrot.lane.b32.xlu0 %v8897_v53, %s5568_s25  ;;  %v5332_v53 = vpack.c.bf16 %v2754_v33, %v2753_v42  ;;  %v5358_v42 = vpack.c.bf16 %v2750_v40, %v2749_v14  ;;  %v3118_v40 = vld [vmem:[%s8547_s7 + $0x20] sm:$0xff] }
 0x27b   :  { %v2644_v32 = vpop.permute.xlu0 %2643 }
 0x27c   :  { %2649 = vst.msk [vmem:[#allocation2 + $0x18] sm:$0xff] %vm2431_vm6, %v2644_v32  ;;  %2583 = vrot.lane.b32.xlu1 %v8900_v57, %s5569_s19  ;;  %2625 = vrot.lane.b32.xlu0 %v8901_v58, %s5563_s1  ;;  %v2737_v32 = vld [vmem:[%s8543_s3 + $0x110] sm:$0xff]  ;;  %v2755_v57 = vld [vmem:[%s8543_s3 + $0x1a0] sm:$0xff] }
 0x27d   :  { %v2756_v58 = vld [vmem:[%s8543_s3 + $0x1a8] sm:$0xff] }
 0x27f   :  { %v2654_v15 = vpop.permute.xlu0 %2653 }
 0x280   :  { %2659 = vst.msk [vmem:[#allocation2 + $0x18] sm:$0xff] %vm2442_vm7, %v2654_v15  ;;  %2667 = vrot.lane.b32.xlu1 %v8902_v46, %s5566_s24  ;;  %2635 = vrot.lane.b32.xlu0 %v8903_v19, %s5564_s14  ;;  %v5334_v46 = vpack.c.bf16 %v2738_v54, %v2737_v32  ;;  %v2772_v32 = vld [vmem:[%s8543_s3 + $0x228] sm:$0xff] }
 0x284   :  { %2677 = vrot.lane.b32.xlu1 %v8904_v11, %s5567_s0  ;;  %2521 = vrot.lane.b32.xlu0 %v2327_v9, %s5566_s24 }
 0x287   :  { %v2696_v18 = vld [vmem:[#allocation2 + $0x18] sm:$0xff] }
 0x288   :  { %2687 = vrot.lane.b32.xlu1 %v8905_v28, %s5568_s25  ;;  %2531 = vrot.lane.b32.xlu0 %v2329_v27, %s5567_s0  ;;  %v5336_v28 = vpack.c.bf16 %v2756_v58, %v2755_v57 }
 0x28c   :  { %2645 = vrot.lane.b32.xlu0 %v8906_v50, %s5565_s15  ;;  %v2739_v50 = vld [vmem:[%s8543_s3 + $0x120] sm:$0xff] }
 0x290   :  { %2655 = vrot.lane.b32.xlu0 %v8907_v4, %s5569_s19  ;;  %v2740_v4 = vld [vmem:[%s8543_s3 + $0x128] sm:$0xff] }
 0x291   :  { %v5338_v60 = vpack.c.bf16 %v2740_v4, %v2739_v50  ;;  %v3016_v4 = vld [vmem:[%s8545_s5] sm:$0xff] }
 0x294   :  { %2665 = vrot.lane.b32.xlu0 %v8908_v24, %s5566_s24 }
 0x296   :  { %v2373_v0 = vpop.permute.xlu1 %2372 }
 0x297   :  { %2378 = vst.msk [vmem:[#allocation2 + $0x28] sm:$0xff] %vm2376_vm1, %v2373_v0  ;;  %v2371_v45 = vpop.permute.xlu0 %2370  ;;  %v2757_v0 = vld [vmem:[%s8543_s3 + $0x1b0] sm:$0xff] }
 0x298   :  { %2377 = vst.msk [vmem:[#allocation2] sm:$0xff] %vm2376_vm1, %v2371_v45  ;;  %2675 = vrot.lane.b32.xlu0 %v8911_v38, %s5567_s0  ;;  %v2758_v45 = vld [vmem:[%s8543_s3 + $0x1b8] sm:$0xff] }
 0x29a   :  { %v2384_v22 = vpop.permute.xlu1 %2383 }
 0x29b   :  { %2389 = vst.msk [vmem:[#allocation2 + $0x28] sm:$0xff] %vm2387_vm2, %v2384_v22 }
 0x29c   :  { %2685 = vrot.lane.b32.xlu0 %v8912_v59, %s5568_s25  ;;  %v5340_v59 = vpack.c.bf16 %v2758_v45, %v2757_v0  ;;  %v3018_v45 = vld [vmem:[%s8545_s5 + $0x10] sm:$0xff] }
 0x29e   :  { %v2382_v17 = vpop.permute.xlu1 %2381 }
 0x29f   :  { %2388 = vst.msk [vmem:[#allocation2] sm:$0xff] %vm2387_vm2, %v2382_v17  ;;  %v2741_v17 = vld [vmem:[%s8543_s3 + $0x130] sm:$0xff] }
 0x2a2   :  { %v2395_v20 = vpop.permute.xlu1 %2394 }
 0x2a3   :  { %2400 = vst.msk [vmem:[#allocation2 + $0x28] sm:$0xff] %vm2398_vm3, %v2395_v20  ;;  %v2742_v20 = vld [vmem:[%s8543_s3 + $0x138] sm:$0xff] }
 0x2a6   :  { %v2393_v41 = vpop.permute.xlu1 %2392  ;;  %v2417_v23 = vpop.permute.xlu0 %2416 }
 0x2a7   :  { %2399 = vst.msk [vmem:[#allocation2] sm:$0xff] %vm2398_vm3, %v2393_v41  ;;  %v2759_v41 = vld [vmem:[%s8543_s3 + $0x1c0] sm:$0xff] }
 0x2aa   :  { %v2406_v34 = vpop.permute.xlu1 %2405  ;;  %v2428_v9 = vpop.permute.xlu0 %2427 }
 0x2ab   :  { %2411 = vst.msk [vmem:[#allocation2 + $0x28] sm:$0xff] %vm2409_vm4, %v2406_v34  ;;  %v5342_v34 = vpack.c.bf16 %v2742_v20, %v2741_v17  ;;  %v3022_v17 = vld [vmem:[%s8545_s5 + $0x30] sm:$0xff]  ;;  %v3023_v20 = vld [vmem:[%s8545_s5 + $0x38] sm:$0xff] }
 0x2ac   :  { %2422 = vst.msk [vmem:[#allocation2 + $0x28] sm:$0xff] %vm2420_vm5, %v2417_v23  ;;  %v2760_v23 = vld [vmem:[%s8543_s3 + $0x1c8] sm:$0xff] }
 0x2ad   :  { %2433 = vst.msk [vmem:[#allocation2 + $0x28] sm:$0xff] %vm2431_vm6, %v2428_v9 }
 0x2ae   :  { %v2404_v10 = vpop.permute.xlu1 %2403  ;;  %v2439_v7 = vpop.permute.xlu0 %2438 }
 0x2af   :  { %2410 = vst.msk [vmem:[#allocation2] sm:$0xff] %vm2409_vm4, %v2404_v10 }
 0x2b0   :  { %2444 = vst.msk [vmem:[#allocation2 + $0x28] sm:$0xff] %vm2442_vm7, %v2439_v7  ;;  %v5344_v7 = vpack.c.bf16 %v2760_v23, %v2759_v41  ;;  %v5388_v41 = vpack.c.bf16 %v3023_v20, %v3022_v17  ;;  %v3114_v23 = vld [vmem:[%s8547_s7] sm:$0xff] }
 0x2b2   :  { %v2415_v47 = vpop.permute.xlu1 %2414 }
 0x2b3   :  { %2421 = vst.msk [vmem:[#allocation2] sm:$0xff] %vm2420_vm5, %v2415_v47  ;;  %v2743_v47 = vld [vmem:[%s8543_s3 + $0x140] sm:$0xff] }
 0x2b6   :  { %v2426_v3 = vpop.permute.xlu1 %2425  ;;  %v2452_v5 = vpop.permute.xlu0 %2451 }
 0x2b7   :  { %2432 = vst.msk [vmem:[#allocation2] sm:$0xff] %vm2431_vm6, %v2426_v3  ;;  %v2698_v24 = vld [vmem:[#allocation2 + $0x28] sm:$0xff] }
 0x2b8   :  { %2456 = vst.msk [vmem:[#allocation2 + $0x30] sm:$0xff] %vm2376_vm1, %v2452_v5  ;;  %v2744_v3 = vld [vmem:[%s8543_s3 + $0x148] sm:$0xff]  ;;  %v2761_v5 = vld [vmem:[%s8543_s3 + $0x1d0] sm:$0xff] }
 0x2ba   :  { %v2437_v35 = vpop.permute.xlu1 %2436  ;;  %v2450_v29 = vpop.permute.xlu0 %2449 }
 0x2bb   :  { %2443 = vst.msk [vmem:[#allocation2] sm:$0xff] %vm2442_vm7, %v2437_v35  ;;  %v2762_v35 = vld [vmem:[%s8543_s3 + $0x1d8] sm:$0xff] }
 0x2bc   :  { %2455 = vst.msk [vmem:[#allocation2 + $0x8] sm:$0xff] %vm2376_vm1, %v2450_v29  ;;  %v5346_v29 = vpack.c.bf16 %v2744_v3, %v2743_v47 }
 0x2be   :  { %v2460_v37 = vpop.permute.xlu1 %2459  ;;  %v2462_v63 = vpop.permute.xlu0 %2461 }
 0x2bf   :  { %2465 = vst.msk [vmem:[#allocation2 + $0x8] sm:$0xff] %vm2387_vm2, %v2460_v37  ;;  %2466 = vst.msk [vmem:[#allocation2 + $0x30] sm:$0xff] %vm2387_vm2, %v2462_v63 }
 0x2c2   :  { %v2472_v8 = vpop.permute.xlu0 %2471  ;;  %v8149_v36 = vpop.permute.xlu1 %2581  ;;  %v2693_v13 = vld [vmem:[#allocation2] sm:$0xff] }
 0x2c3   :  { %2476 = vst.msk [vmem:[#allocation2 + $0x30] sm:$0xff] %vm2398_vm3, %v2472_v8  ;;  %v5348_v8 = vpack.c.bf16 %v2762_v35, %v2761_v5 }
 0x2c6   :  { %v2470_v6 = vpop.permute.xlu0 %2469 }
 0x2c7   :  { %2475 = vst.msk [vmem:[#allocation2 + $0x8] sm:$0xff] %vm2398_vm3, %v2470_v6  ;;  %v2745_v6 = vld [vmem:[%s8543_s3 + $0x150] sm:$0xff] }
 0x2ca   :  { %v2502_v51 = vpop.permute.xlu1 %2501  ;;  %v2482_v56 = vpop.permute.xlu0 %2481 }
 0x2cb   :  { %2486 = vst.msk [vmem:[#allocation2 + $0x30] sm:$0xff] %vm2409_vm4, %v2482_v56  ;;  %v2763_v56 = vld [vmem:[%s8543_s3 + $0x1e0] sm:$0xff] }
 0x2ce   :  { %v2512_v49 = vpop.permute.xlu1 %2511  ;;  %v2480_v16 = vpop.permute.xlu0 %2479 }
 0x2cf   :  { %2485 = vst.msk [vmem:[#allocation2 + $0x8] sm:$0xff] %vm2409_vm4, %v2480_v16 }
 0x2d2   :  { %v2554_v21 = vpop.permute.xlu1 %2553  ;;  %v2492_v44 = vpop.permute.xlu0 %2491 }
 0x2d3   :  { %2496 = vst.msk [vmem:[#allocation2 + $0x30] sm:$0xff] %vm2420_vm5, %v2492_v44 }
 0x2d4   :  { %2506 = vst.msk [vmem:[#allocation2 + $0x30] sm:$0xff] %vm2431_vm6, %v2502_v51  ;;  %v2746_v51 = vld [vmem:[%s8543_s3 + $0x158] sm:$0xff] }
 0x2d5   :  { %2516 = vst.msk [vmem:[#allocation2 + $0x30] sm:$0xff] %vm2442_vm7, %v2512_v49  ;;  %v2764_v49 = vld [vmem:[%s8543_s3 + $0x1e8] sm:$0xff]  ;;  %v5350_v16 = vpack.c.bf16 %v2746_v51, %v2745_v6 }
 0x2d6   :  { %v2564_v27 = vpop.permute.xlu1 %2563  ;;  %v2490_v43 = vpop.permute.xlu0 %2489 }
 0x2d7   :  { %2495 = vst.msk [vmem:[#allocation2 + $0x8] sm:$0xff] %vm2420_vm5, %v2490_v43  ;;  %v2747_v43 = vld [vmem:[%s8543_s3 + $0x160] sm:$0xff] }
 0x2da   :  { %v2524_v52 = vpop.permute.xlu1 %2523  ;;  %v2500_v61 = vpop.permute.xlu0 %2499 }
 0x2db   :  { %2528 = vst.msk [vmem:[#allocation2 + $0x38] sm:$0xff] %vm2376_vm1, %v2524_v52  ;;  %v2748_v52 = vld [vmem:[%s8543_s3 + $0x168] sm:$0xff] }
 0x2dc   :  { %2505 = vst.msk [vmem:[#allocation2 + $0x8] sm:$0xff] %vm2431_vm6, %v2500_v61  ;;  %v2699_v15 = vld [vmem:[#allocation2 + $0x30] sm:$0xff] }
 0x2dd   :  { %v2765_v61 = vld [vmem:[%s8543_s3 + $0x1f0] sm:$0xff] }
 0x2de   :  { %v2534_v1 = vpop.permute.xlu1 %2533  ;;  %v2510_v30 = vpop.permute.xlu0 %2509 }
 0x2df   :  { %2538 = vst.msk [vmem:[#allocation2 + $0x38] sm:$0xff] %vm2387_vm2, %v2534_v1  ;;  %v2766_v1 = vld [vmem:[%s8543_s3 + $0x1f8] sm:$0xff] }
 0x2e0   :  { %2515 = vst.msk [vmem:[#allocation2 + $0x8] sm:$0xff] %vm2442_vm7, %v2510_v30  ;;  %v5354_v30 = vpack.c.bf16 %v2748_v52, %v2747_v43 }
 0x2e2   :  { %v2544_v48 = vpop.permute.xlu1 %2543  ;;  %v2596_v25 = vpop.permute.xlu0 %2595 }
 0x2e3   :  { %2548 = vst.msk [vmem:[#allocation2 + $0x38] sm:$0xff] %vm2398_vm3, %v2544_v48 }
 0x2e4   :  { %2600 = vst.msk [vmem:[#allocation2 + $0x40] sm:$0xff] %vm2376_vm1, %v2596_v25  ;;  %v5356_v25 = vpack.c.bf16 %v2766_v1, %v2765_v61  ;;  %v3116_v1 = vld [vmem:[%s8547_s7 + $0x10] sm:$0xff] }
 0x2e5   :  { %2558 = vst.msk [vmem:[#allocation2 + $0x38] sm:$0xff] %vm2409_vm4, %v2554_v21 }
 0x2e6   :  { %2568 = vst.msk [vmem:[#allocation2 + $0x38] sm:$0xff] %vm2420_vm5, %v2564_v27  ;;  %v8178_v39 = vpop.permute.xlu1 %2541  ;;  %v2606_v2 = vpop.permute.xlu0 %2605  ;;  %v5352_v27 = vpack.c.bf16 %v2764_v49, %v2763_v56 }
 0x2e7   :  { %v2694_v62 = vld [vmem:[#allocation2 + $0x8] sm:$0xff]  ;;  %2610 = vst.msk [vmem:[#allocation2 + $0x40] sm:$0xff] %vm2387_vm2, %v2606_v2 }
 0x2e8   :  { %2853 = vmatprep.mubr.f32.mxu1 %v2694_v62 }
 0x2e9   :  { %2854 = vmatmul.mubr.f32.vlgmr.msra.gmra.mrb[104].mxu1 %v2693_v13 }
 0x2ea   :  { %2858 = vmatprep.mubr.f32.mxu1 %v2699_v15  ;;  %5331 = vmatpush3.bf16.msra.mxu1 %v5330_v26  ;;  %v2574_v19 = vpop.permute.xlu1 %2573  ;;  %v2616_v11 = vpop.permute.xlu0 %2615  ;;  %v2773_v15 = vld [vmem:[%s8543_s3 + $0x230] sm:$0xff] }
 0x2eb   :  { %5333 = vmatprep.subr.bf16.mxu1 %v5332_v53  ;;  %2578 = vst.msk [vmem:[#allocation2 + $0x38] sm:$0xff] %vm2431_vm6, %v2574_v19  ;;  %v2771_v53 = vld [vmem:[%s8543_s3 + $0x220] sm:$0xff] }
 0x2ec   :  { %2620 = vst.msk [vmem:[#allocation2 + $0x40] sm:$0xff] %vm2398_vm3, %v2616_v11  ;;  %v5368_v57 = vpack.c.bf16 %v2772_v32, %v2771_v53  ;;  %v3210_v53 = vld [vmem:[%s8549_s9] sm:$0xff]  ;;  %v3211_v32 = vld [vmem:[%s8549_s9 + $0x8] sm:$0xff] }
 0x2ed   :  { %2859 = vmatmul.mubr.f32.gmra.mrb[106].mxu1 %v2698_v24  ;;  %v3017_v24 = vld [vmem:[%s8545_s5 + $0x8] sm:$0xff] }
 0x2ee   :  { %5335 = vmatpush3.bf16.msra.mxu1 %v5334_v46  ;;  %2928 = vmatprep.mubr.f32.mxu1 %v2696_v18  ;;  %v2584_v38 = vpop.permute.xlu1 %2583  ;;  %v2626_v22 = vpop.permute.xlu0 %2625  ;;  %v2774_v46 = vld [vmem:[%s8543_s3 + $0x238] sm:$0xff]  ;;  %v5376_v0 = vpack.c.bf16 %v3017_v24, %v3016_v4 }
 0x2ef   :  { %5337 = vmatprep.subr.bf16.mxu1 %v5336_v28  ;;  %2588 = vst.msk [vmem:[#allocation2 + $0x38] sm:$0xff] %vm2442_vm7, %v2584_v38  ;;  %v5372_v11 = vpack.c.bf16 %v2774_v46, %v2773_v15  ;;  %v3019_v18 = vld [vmem:[%s8545_s5 + $0x18] sm:$0xff]  ;;  %v3212_v15 = vld [vmem:[%s8549_s9 + $0x10] sm:$0xff] }
 0x2f0   :  { %2630 = vst.msk [vmem:[#allocation2 + $0x40] sm:$0xff] %vm2409_vm4, %v2626_v22  ;;  %v5380_v38 = vpack.c.bf16 %v3019_v18, %v3018_v45  ;;  %v3021_v22 = vld [vmem:[%s8545_s5 + $0x28] sm:$0xff]  ;;  %v3213_v46 = vld [vmem:[%s8549_s9 + $0x18] sm:$0xff] }
 0x2f2   :  { %5339 = vmatpush3.bf16.msra.mxu1 %v5338_v60  ;;  %v2668_v9 = vpop.permute.xlu1 %2667  ;;  %v2636_v10 = vpop.permute.xlu0 %2635  ;;  %v3020_v60 = vld [vmem:[%s8545_s5 + $0x20] sm:$0xff] }
 0x2f3   :  { %5341 = vmatprep.subr.bf16.mxu1 %v5340_v59  ;;  %2672 = vst.msk [vmem:[#allocation2 + $0x48] sm:$0xff] %vm2376_vm1, %v2668_v9  ;;  %v5384_v59 = vpack.c.bf16 %v3021_v22, %v3020_v60 }
 0x2f4   :  { %2640 = vst.msk [vmem:[#allocation2 + $0x40] sm:$0xff] %vm2420_vm5, %v2636_v10 }
 0x2f6   :  { %5343 = vmatpush3.bf16.msra.mxu1 %v5342_v34  ;;  %v2678_v37 = vpop.permute.xlu1 %2677  ;;  %v2522_v63 = vpop.permute.xlu0 %2521  ;;  %v2700_v58 = vld [vmem:[#allocation2 + $0x38] sm:$0xff]  ;;  %v3115_v34 = vld [vmem:[%s8547_s7 + $0x8] sm:$0xff] }
 0x2f7   :  { %5345 = vmatprep.subr.bf16.mxu1 %v5344_v7  ;;  %2682 = vst.msk [vmem:[#allocation2 + $0x48] sm:$0xff] %vm2387_vm2, %v2678_v37  ;;  %v5392_v9 = vpack.c.bf16 %v3115_v34, %v3114_v23 }
 0x2f8   :  { %2527 = vst.msk [vmem:[#allocation2 + $0x10] sm:$0xff] %vm2376_vm1, %v2522_v63 }
 0x2fa   :  { %5347 = vmatpush3.bf16.msra.mxu1 %v5346_v29  ;;  %v2688_v21 = vpop.permute.xlu1 %2687  ;;  %v2532_v44 = vpop.permute.xlu0 %2531  ;;  %v4162_v29 = vld [vmem:[%s8544_s4] ss:$0 sm:$0xff] }
 0x2fb   :  { %5349 = vmatprep.subr.bf16.mxu1 %v5348_v8  ;;  %2692 = vst.msk [vmem:[#allocation2 + $0x48] sm:$0xff] %vm2398_vm3, %v2688_v21 }
 0x2fc   :  { %2537 = vst.msk [vmem:[#allocation2 + $0x10] sm:$0xff] %vm2387_vm2, %v2532_v44 }
 0x2fd   :  { %2547 = vst.msk [vmem:[#allocation2 + $0x10] sm:$0xff] %vm2398_vm3, %v8178_v39  ;;  %v2770_v39 = vld [vmem:[%s8543_s3 + $0x218] sm:$0xff] }
 0x2fe   :  { %2557 = vst.msk [vmem:[#allocation2 + $0x10] sm:$0xff] %vm2409_vm4, %v7980_v55  ;;  %5351 = vmatpush3.bf16.msra.mxu1 %v5350_v16  ;;  %v2646_v48 = vpop.permute.xlu0 %2645  ;;  %v2767_v55 = vld [vmem:[%s8543_s3 + $0x200] sm:$0xff] }
 0x2ff   :  { %2567 = vst.msk [vmem:[#allocation2 + $0x10] sm:$0xff] %vm2420_vm5, %v8000_v31  ;;  %5353 = vmatprep.subr.bf16.mxu1 %v5352_v27  ;;  %v2768_v31 = vld [vmem:[%s8543_s3 + $0x208] sm:$0xff] }
 0x300   :  { %2577 = vst.msk [vmem:[#allocation2 + $0x10] sm:$0xff] %vm2431_vm6, %v8025_v12  ;;  %2650 = vst.msk [vmem:[#allocation2 + $0x40] sm:$0xff] %vm2431_vm6, %v2646_v48  ;;  %v5360_v26 = vpack.c.bf16 %v2768_v31, %v2767_v55  ;;  %v2769_v12 = vld [vmem:[%s8543_s3 + $0x210] sm:$0xff]  ;;  %v3119_v55 = vld [vmem:[%s8547_s7 + $0x28] sm:$0xff] }
 0x301   :  { %2587 = vst.msk [vmem:[#allocation2 + $0x10] sm:$0xff] %vm2442_vm7, %v8149_v36  ;;  %v5364_v62 = vpack.c.bf16 %v2770_v39, %v2769_v12  ;;  %v5400_v31 = vpack.c.bf16 %v3119_v55, %v3118_v40  ;;  %v5570_v12 = vmov 0.0|0.0   ;;  %v4165_v39 = vld [vmem:[%s8546_s6] ss:$0 sm:$0xff] }
 0x302   :  { %5355 = vmatpush3.bf16.msra.mxu1 %v5354_v30  ;;  %v2656_v33 = vpop.permute.xlu0 %2655  ;;  %v2702_v50 = vld [vmem:[#allocation2 + $0x48] sm:$0xff]  ;;  %v3117_v30 = vld [vmem:[%s8547_s7 + $0x18] sm:$0xff] }
 0x303   :  { %5357 = vmatprep.subr.bf16.mxu1 %v5356_v25  ;;  %2660 = vst.msk [vmem:[#allocation2 + $0x40] sm:$0xff] %vm2442_vm7, %v2656_v33  ;;  %v5396_v14 = vpack.c.bf16 %v3117_v30, %v3116_v1  ;;  %v3121_v33 = vld [vmem:[%s8547_s7 + $0x38] sm:$0xff] }
 0x306   :  { %5359 = vmatpush3.bf16.msra.mxu1 %v5358_v42  ;;  %v2666_v2 = vpop.permute.xlu0 %2665  ;;  %v3120_v42 = vld [vmem:[%s8547_s7 + $0x30] sm:$0xff] }
 0x307   :  { %5361 = vmatprep.subr.bf16.mxu1 %v5360_v26  ;;  %2671 = vst.msk [vmem:[#allocation2 + $0x20] sm:$0xff] %vm2376_vm1, %v2666_v2 }
 0x308   :  { %v2695_v36 = vld [vmem:[#allocation2 + $0x10] sm:$0xff] }
 0x309   :  { %2929 = vmatmul.mubr.f32.vlgmr.msra.gmra.mrb[108].mxu1 %v2695_v36 }
 0x30a   :  { %5363 = vmatpush3.bf16.msra.mxu1 %v5360_v26  ;;  %v2676_v54 = vpop.permute.xlu0 %2675  ;;  %v2701_v13 = vld [vmem:[#allocation2 + $0x40] sm:$0xff]  ;;  %v5404_v26 = vpack.c.bf16 %v3121_v33, %v3120_v42 }
 0x30b   :  { %5365 = vmatprep.subr.bf16.mxu1 %v5364_v62  ;;  %2681 = vst.msk [vmem:[#allocation2 + $0x20] sm:$0xff] %vm2387_vm2, %v2676_v54  ;;  %2933 = vmatprep.mubr.f32.mxu1 %v2701_v13 }
 0x30d   :  { %2934 = vmatmul.mubr.f32.gmra.mrb[110].mxu1 %v2700_v58 }
 0x30e   :  { %5367 = vmatpush3.bf16.msra.mxu1 %v5364_v62  ;;  %v2686_v19 = vpop.permute.xlu0 %2685 }
 0x30f   :  { %5369 = vmatprep.subr.bf16.mxu1 %v5368_v57  ;;  %2691 = vst.msk [vmem:[#allocation2 + $0x20] sm:$0xff] %vm2398_vm3, %v2686_v19  ;;  %v8384_v19 = vpack.c.bf16 %v3213_v46, %v3212_v15 }
 0x312   :  { %5371 = vmatpush3.bf16.msra.mxu1 %v5368_v57  ;;  %v8373_v57 = vpack.c.bf16 %v3211_v32, %v3210_v53 }
 0x313   :  { %5373 = vmatprep.subr.bf16.mxu1 %v5372_v11 }
 0x316   :  { %5375 = vmatpush3.bf16.msra.mxu1 %v5372_v11  ;;  %v2697_v28 = vld [vmem:[#allocation2 + $0x20] sm:$0xff]  ;;  %v5572_v11 = vmov 0.0  }
 0x317   :  { %5124 = vmatprep.mubr.msk.f32.mxu1 %vm2782_vm8, %v2697_v28  ;;  %5377 = vmatprep.subr.bf16.mxu1 %v5376_v0  ;;  %v4168_v28 = vld [vmem:[%s8548_s8] ss:$0 sm:$0xff] }
 0x319   :  { %5125 = vmatmul.mubr.msk.f32.vlgmr.msra.gmra.mrb[112].mxu1 %vm2782_vm8, %v2702_v50 }
 0x31a   :  { %5379 = vmatpush3.bf16.msra.mxu1 %v5376_v0  ;;  %v8406_v0 = vld [vmem:[%s8550_s10] ss:$0 sm:$0xff] }
 0x31b   :  { %5381 = vmatprep.subr.bf16.mxu1 %v5380_v38 }
 0x31e   :  { %5383 = vmatpush3.bf16.msra.mxu1 %v5380_v38 }
 0x31f   :  { %5385 = vmatprep.subr.bf16.mxu1 %v5384_v59 }
 0x322   :  { %5387 = vmatpush3.bf16.msra.mxu1 %v5384_v59 }
 0x323   :  { %5389 = vmatprep.subr.bf16.mxu1 %v5388_v41 }
 0x326   :  { %5391 = vmatpush3.bf16.msra.mxu1 %v5388_v41 }
 0x327   :  { %5393 = vmatprep.subr.bf16.mxu1 %v5392_v9 }
 0x3bc   :  { %v4525_v10 = vpop.f32.mrb[104].mxu1 }
 0x3bd   :  { %v4526_v7 = vpop.f32.mrb[105].mxu1 }
 0x3be   :  { %v4527_v47 = vadd.f32 %v4526_v7, %v4525_v10 }
 0x3c0   :  { %v4528_v3 = vpop.f32.mrb[106].mxu1  ;;  %v2856_v8 = vadd.f32 %v4527_v47, %v4162_v29 }
 0x3c1   :  { %v4529_v5 = vpop.f32.mrb[107].mxu1 }
 0x3c2   :  { %v4530_v35 = vadd.f32 %v4529_v5, %v4528_v3 }
 0x3c4   :  { %v2861_v16 = vadd.f32 %v4530_v35, %v4162_v29 }
 0x3dc   :  { %v4563_v37 = vpop.f32.mrb[108].mxu1 }
 0x3dd   :  { %v4564_v63 = vpop.f32.mrb[109].mxu1 }
 0x3de   :  { %v4565_v6 = vadd.f32 %v4564_v63, %v4563_v37 }
 0x3e0   :  { %v4566_v51 = vpop.f32.mrb[110].mxu1  ;;  %v2931_v56 = vadd.f32 %v4565_v6, %v2856_v8 }
 0x3e1   :  { %v4567_v49 = vpop.f32.mrb[111].mxu1 }
 0x3e2   :  { %v4568_v21 = vadd.f32 %v4567_v49, %v4566_v51 }
 0x3e4   :  { %v2936_v44 = vadd.f32 %v4568_v21, %v2861_v16 }
 0x3ec   :  { %v5126_v27 = vpop.f32.mrb[112].mxu1 }
 0x3ed   :  { %v3011_v43 = vadd.f32 %v5126_v27, %v2936_v44  ;;  %v3005_v52 = vpop.f32.mrb[113].mxu1 }
 0x3ee   :  { %v3006_v61 = vadd.f32 %v3005_v52, %v2931_v56 }
 0x3ef   :  { %v3015_v25 = vmax.f32 %v3011_v43, 0.0 }
 0x3f0   :  { %v3014_v48 = vmax.f32 %v3006_v61, 0.0 }
 0x3f2   :  { %5143 = vmatprep.mubr.msk.f32.mxu1 %vm2782_vm8, %v3014_v48 }
 0x3f3   :  { %5144 = vmatmul.mubr.msk.f32.vlgmr.msra.gmra.mrb[114].mxu1 %vm2782_vm8, %v3015_v25 }
 0x3f4   :  { %5395 = vmatpush3.bf16.msra.mxu1 %v5392_v9 }
 0x3f5   :  { %5397 = vmatprep.subr.bf16.mxu1 %v5396_v14 }
 0x3f8   :  { %5399 = vmatpush3.bf16.msra.mxu1 %v5396_v14 }
 0x3f9   :  { %5401 = vmatprep.subr.bf16.mxu1 %v5400_v31 }
 0x3fc   :  { %5403 = vmatpush3.bf16.msra.mxu1 %v5400_v31 }
 0x3fd   :  { %5405 = vmatprep.subr.bf16.mxu1 %v5404_v26 }
 0x400   :  { %5407 = vmatpush3.bf16.msra.mxu1 %v5404_v26 }
 0x401   :  { %5408 = vmatprep.subr.bf16.mxu1 %v5570_v12 }
 0x4c6   :  { %v5145_v2 = vpop.f32.mrb[114].mxu1 }
 0x4c7   :  { %v3109_v62 = vadd.f32 %v5145_v2, %v4165_v39  ;;  %v3103_v36 = vpop.f32.mrb[115].mxu1 }
 0x4c8   :  { %v3104_v54 = vadd.f32 %v4165_v39, %v3103_v36 }
 0x4c9   :  { %v3113_v58 = vmax.f32 %v3109_v62, 0.0 }
 0x4ca   :  { %v3112_v13 = vmax.f32 %v3104_v54, 0.0 }
 0x4cc   :  { %5162 = vmatprep.mubr.msk.f32.mxu1 %vm2782_vm8, %v3112_v13 }
 0x4cd   :  { %5163 = vmatmul.mubr.msk.f32.vlgmr.msra.gmra.mrb[116].mxu1 %vm2782_vm8, %v3113_v58 }
 0x4ce   :  { %5410 = vmatpush3.bf16.msra.mxu1 %v8373_v57  ;;  %5173 = vmatprep.mubr.msk.f32.mxu1 %vm5571_vm9, %v5572_v11 }
 0x4cf   :  { %5411 = vmatprep.subr.bf16.mxu1 %v5570_v12 }
 0x4d2   :  { %5413 = vmatpush3.bf16.msra.mxu1 %v8384_v19 }
 0x4d3   :  { %5414 = vmatprep.subr.bf16.mxu1 %v5570_v12 }
 0x4d5   :  { %5174 = vmatmul.mubr.f32.vlgmr.msra.gmra.mrb[118].mxu1 %v5572_v11 }
 0x4d6   :  { %5416 = vmatpush3.bf16.msra.mxu1 %v8373_v57  ;;  %5184 = vmatprep.mubr.msk.f32.mxu1 %vm5571_vm9, %v5572_v11 }
 0x4d7   :  { %5417 = vmatprep.subr.bf16.mxu1 %v5570_v12 }
 0x4da   :  { %5419 = vmatpush3.bf16.msra.mxu1 %v8384_v19 }
 0x4db   :  { %5420 = vmatprep.subr.bf16.mxu1 %v5570_v12 }
 0x5a0   :  { %v5164_v50 = vpop.f32.mrb[116].mxu1 }
 0x5a1   :  { %v8401_v4 = vadd.f32 %v5164_v50, %v4168_v28  ;;  %v3201_v24 = vpop.f32.mrb[117].mxu1 }
 0x5a2   :  { %v8410_v38 = vadd.f32 %v4168_v28, %v3201_v24 }
 0x5a8   :  { %v3291_v45 = vpop.f32.mrb[118].mxu1 }
 0x5a9   :  { %v3292_v18 = vadd.f32 %v8406_v0, %v3291_v45  ;;  %v5175_v60 = vpop.f32.mrb[119].mxu1 }
 0x5ab   :  { %3303 = vrot.lane.b32.xlu0 %v3292_v18, %s5563_s1  ;;  %v3295_v22 = vadd.f32 %v3292_v18, %v8410_v38 }
 0x5ad   :  { %v4172_v59 = vmul.f32 -1.442695, %v3295_v22 }
 0x5af   :  { %5489 = vpow2.f32 %v4172_v59 }
 0x5b9   :  { %v5490_v17 = vpop.eup %5489 }
 0x5ba   :  { %v3299_v20 = vadd.f32 1.0, %v5490_v17 }
 0x5bc   :  { %5491 = vrcp.f32 %v3299_v20 }
 0x5c6   :  { %v5492_v41 = vpop.eup %5491 }
 0x5c7   :  { %v3313_v47 = vsub.f32 1.0, %v5492_v41  ;;  %v3319_v5 = vmul.f32 0.0, %v5492_v41 }
 0x61d   :  { %v3304_v23 = vpop.permute.xlu0 %3303 }
 0x61e   :  { %v3306_v34 = vmul.f32 %v5492_v41, %v3304_v23 }
 0x620   :  { %3308 = vrot.lane.b32.xlu1 %v3306_v34, %s5563_s1 }
 0x692   :  { %v3309_v9 = vpop.permute.xlu1 %3308 }
 0x693   :  { %v3311_v10 = vadd.f32 %v3309_v9, %v8410_v38 }
 0x695   :  { %5493 = vtanh.f32 %v3311_v10 }
 0x69f   :  { %v5494_v7 = vpop.eup %5493 }
 0x6a0   :  { %3315 = vrot.lane.b32.xlu0 %v5494_v7, %s5565_s15 }
 0x712   :  { %v3316_v3 = vpop.permute.xlu0 %3315 }
 0x713   :  { %v3318_v35 = vmul.f32 %v3316_v3, %v3313_v47 }
 0x715   :  { %v3320_v29 = vadd.f32 %v3319_v5, %v3318_v35 }
 0x717   :  { %3322 = vrot.lane.b32.xlu1 %v3320_v29, %s5565_s15  ;;  %v3422_v30 = vrot.slane %v3320_v29, 6 }
 0x789   :  { %v3323_v37 = vpop.permute.xlu1 %3322 }
 0x78a   :  { %5185 = vmatmul.mubr.msk.f32.vlgmr.msra.gmra.mrb[120].mxu1 %vm3221_vm10, %v3323_v37 }
 0x78b   :  { %5422 = vmatpush3.bf16.msra.mxu1 %v8373_v57  ;;  %5195 = vmatprep.mubr.msk.f32.mxu1 %vm5571_vm9, %v5572_v11 }
 0x78c   :  { %5423 = vmatprep.subr.bf16.mxu1 %v5570_v12 }
 0x78f   :  { %5425 = vmatpush3.bf16.msra.mxu1 %v8384_v19 }
 0x790   :  { %5426 = vmatprep.subr.bf16.mxu1 %v5570_v12 }
 0x85d   :  { %v3392_v63 = vpop.f32.mrb[120].mxu1 }
 0x85e   :  { %v3393_v8 = vadd.f32 %v8406_v0, %v3392_v63  ;;  %v5186_v6 = vpop.f32.mrb[121].mxu1 }
 0x860   :  { %v3397_v51 = vrot.slane %v3393_v8, 6 }
 0x862   :  { %3406 = vrot.lane.b32.xlu0 %v3397_v51, %s5563_s1  ;;  %v3399_v56 = vadd.f32 %v3397_v51, %v8410_v38 }
 0x864   :  { %v4174_v49 = vmul.f32 -1.442695, %v3399_v56 }
 0x866   :  { %5495 = vpow2.f32 %v4174_v49 }
 0x870   :  { %v5496_v16 = vpop.eup %5495 }
 0x871   :  { %v3403_v21 = vadd.f32 1.0, %v5496_v16 }
 0x873   :  { %5497 = vrcp.f32 %v3403_v21 }
 0x87d   :  { %v5498_v44 = vpop.eup %5497 }
 0x87e   :  { %v3416_v48 = vsub.f32 1.0, %v5498_v44  ;;  %v3424_v40 = vmul.f32 %v5498_v44, %v3422_v30 }
 0x8d4   :  { %v3407_v27 = vpop.permute.xlu0 %3406 }
 0x8d5   :  { %v3409_v43 = vmul.f32 %v5498_v44, %v3407_v27 }
 0x8d7   :  { %3411 = vrot.lane.b32.xlu1 %v3409_v43, %s5563_s1 }
 0x949   :  { %v3412_v52 = vpop.permute.xlu1 %3411 }
 0x94a   :  { %v3414_v61 = vadd.f32 %v3412_v52, %v8410_v38 }
 0x94c   :  { %5499 = vtanh.f32 %v3414_v61 }
 0x956   :  { %v5500_v1 = vpop.eup %5499 }
 0x957   :  { %3418 = vrot.lane.b32.xlu0 %v5500_v1, %s5565_s15 }
 0x9c9   :  { %v3419_v25 = vpop.permute.xlu0 %3418 }
 0x9ca   :  { %v3421_v14 = vmul.f32 %v3419_v25, %v3416_v48 }
 0x9cc   :  { %v3425_v55 = vadd.f32 %v3424_v40, %v3421_v14 }
 0x9ce   :  { %v3427_v31 = vrot.slane %v3425_v55, 2  ;;  %v3528_v50 = vrot.slane %v3425_v55, 6 }
 0x9d0   :  { %3428 = vrot.lane.b32.xlu1 %v3427_v31, %s5565_s15 }
 0xa42   :  { %v3429_v42 = vpop.permute.xlu1 %3428 }
 0xa43   :  { %5196 = vmatmul.mubr.msk.f32.vlgmr.msra.gmra.mrb[122].mxu1 %vm3221_vm10, %v3429_v42 }
 0xa44   :  { %5428 = vmatpush3.bf16.msra.mxu1 %v8373_v57  ;;  %5206 = vmatprep.mubr.msk.f32.mxu1 %vm5571_vm9, %v5572_v11 }
 0xa45   :  { %5429 = vmatprep.subr.bf16.mxu1 %v5570_v12 }
 0xa48   :  { %5431 = vmatpush3.bf16.msra.mxu1 %v8384_v19 }
 0xa49   :  { %5432 = vmatprep.subr.bf16.mxu1 %v5570_v12 }
 0xb16   :  { %v3498_v33 = vpop.f32.mrb[122].mxu1 }
 0xb17   :  { %v3499_v26 = vadd.f32 %v8406_v0, %v3498_v33  ;;  %v5197_v39 = vpop.f32.mrb[123].mxu1 }
 0xb19   :  { %v3503_v2 = vrot.slane %v3499_v26, 4 }
 0xb1b   :  { %3512 = vrot.lane.b32.xlu0 %v3503_v2, %s5563_s1  ;;  %v3505_v62 = vadd.f32 %v3503_v2, %v8410_v38 }
 0xb1d   :  { %v4176_v36 = vmul.f32 -1.442695, %v3505_v62 }
 0xb1f   :  { %5501 = vpow2.f32 %v4176_v36 }
 0xb29   :  { %v5502_v53 = vpop.eup %5501 }
 0xb2a   :  { %v3509_v32 = vadd.f32 1.0, %v5502_v53 }
 0xb2c   :  { %5503 = vrcp.f32 %v3509_v32 }
 0xb36   :  { %v5504_v54 = vpop.eup %5503 }
 0xb37   :  { %v3522_v24 = vsub.f32 1.0, %v5504_v54  ;;  %v3530_v18 = vmul.f32 %v5504_v54, %v3528_v50 }
 0xb8d   :  { %v3513_v13 = vpop.permute.xlu0 %3512 }
 0xb8e   :  { %v3515_v58 = vmul.f32 %v5504_v54, %v3513_v13 }
 0xb90   :  { %3517 = vrot.lane.b32.xlu1 %v3515_v58, %s5563_s1 }
 0xc02   :  { %v3518_v15 = vpop.permute.xlu1 %3517 }
 0xc03   :  { %v3520_v46 = vadd.f32 %v3518_v15, %v8410_v38 }
 0xc05   :  { %5505 = vtanh.f32 %v3520_v46 }
 0xc0f   :  { %v5506_v28 = vpop.eup %5505 }
 0xc10   :  { %3524 = vrot.lane.b32.xlu0 %v5506_v28, %s5565_s15 }
 0xc82   :  { %v3525_v45 = vpop.permute.xlu0 %3524 }
 0xc83   :  { %v3527_v60 = vmul.f32 %v3525_v45, %v3522_v24 }
 0xc85   :  { %v3531_v22 = vadd.f32 %v3530_v18, %v3527_v60 }
 0xc87   :  { %v3533_v59 = vrot.slane %v3531_v22, 4  ;;  %v3634_v8 = vrot.slane %v3531_v22, 6 }
 0xc89   :  { %3534 = vrot.lane.b32.xlu1 %v3533_v59, %s5565_s15 }
 0xcfb   :  { %v3535_v17 = vpop.permute.xlu1 %3534 }
 0xcfc   :  { %5207 = vmatmul.mubr.msk.f32.vlgmr.msra.gmra.mrb[124].mxu1 %vm3221_vm10, %v3535_v17 }
 0xcfd   :  { %5434 = vmatpush3.bf16.msra.mxu1 %v8373_v57  ;;  %5217 = vmatprep.mubr.msk.f32.mxu1 %vm5571_vm9, %v5572_v11 }
 0xcfe   :  { %5435 = vmatprep.subr.bf16.mxu1 %v5570_v12 }
 0xd01   :  { %5437 = vmatpush3.bf16.msra.mxu1 %v8384_v19 }
 0xd02   :  { %5438 = vmatprep.subr.bf16.mxu1 %v5570_v12 }
 0xdcf   :  { %v3604_v20 = vpop.f32.mrb[124].mxu1 }
 0xdd0   :  { %v3605_v41 = vadd.f32 %v8406_v0, %v3604_v20  ;;  %v5208_v23 = vpop.f32.mrb[125].mxu1 }
 0xdd2   :  { %v3609_v34 = vrot.slane %v3605_v41, 2 }
 0xdd4   :  { %3618 = vrot.lane.b32.xlu0 %v3609_v34, %s5563_s1  ;;  %v3611_v9 = vadd.f32 %v3609_v34, %v8410_v38 }
 0xdd6   :  { %v4178_v10 = vmul.f32 -1.442695, %v3611_v9 }
 0xdd8   :  { %5507 = vpow2.f32 %v4178_v10 }
 0xde2   :  { %v5508_v7 = vpop.eup %5507 }
 0xde3   :  { %v3615_v47 = vadd.f32 1.0, %v5508_v7 }
 0xde5   :  { %5509 = vrcp.f32 %v3615_v47 }
 0xdef   :  { %v5510_v3 = vpop.eup %5509 }
 0xdf0   :  { %v3628_v6 = vsub.f32 1.0, %v5510_v3  ;;  %v3636_v56 = vmul.f32 %v5510_v3, %v3634_v8 }
 0xe46   :  { %v3619_v5 = vpop.permute.xlu0 %3618 }
 0xe47   :  { %v3621_v35 = vmul.f32 %v5510_v3, %v3619_v5 }
 0xe49   :  { %3623 = vrot.lane.b32.xlu1 %v3621_v35, %s5563_s1 }
 0xebb   :  { %v3624_v29 = vpop.permute.xlu1 %3623 }
 0xebc   :  { %v3626_v37 = vadd.f32 %v3624_v29, %v8410_v38 }
 0xebe   :  { %5511 = vtanh.f32 %v3626_v37 }
 0xec8   :  { %v5512_v63 = vpop.eup %5511 }
 0xec9   :  { %3630 = vrot.lane.b32.xlu0 %v5512_v63, %s5565_s15 }
 0xf3b   :  { %v3631_v51 = vpop.permute.xlu0 %3630 }
 0xf3c   :  { %v3633_v49 = vmul.f32 %v3631_v51, %v3628_v6 }
 0xf3e   :  { %v3637_v16 = vadd.f32 %v3636_v56, %v3633_v49 }
 0xf40   :  { %v3639_v21 = vrot.slane %v3637_v16, 6 }
 0xf42   :  { %3640 = vrot.lane.b32.xlu1 %v3639_v21, %s5565_s15 }
 0xfb4   :  { %v3641_v44 = vpop.permute.xlu1 %3640 }
 0xfb5   :  { %5218 = vmatmul.mubr.msk.f32.vlgmr.msra.gmra.mrb[126].mxu1 %vm3221_vm10, %v3641_v44 }
 0xfb6   :  { %5440 = vmatpush3.bf16.msra.mxu1 %v8373_v57  ;;  %5228 = vmatprep.mubr.msk.f32.mxu1 %vm5571_vm9, %v5572_v11 }
 0xfb7   :  { %5441 = vmatprep.subr.bf16.mxu1 %v5570_v12 }
 0xfba   :  { %5443 = vmatpush3.bf16.msra.mxu1 %v8384_v19 }
 0xfbb   :  { %5444 = vmatprep.subr.bf16.mxu1 %v5570_v12 }
0x1088   :  { %v3710_v38 = vpop.f32.mrb[126].mxu1 }
0x1089   :  { %v3711_v27 = vadd.f32 %v8406_v0, %v3710_v38  ;;  %v5219_v43 = vpop.f32.mrb[127].mxu1 }
0x108b   :  { %3722 = vrot.lane.b32.xlu0 %v3711_v27, %s5563_s1  ;;  %v3714_v52 = vadd.f32 %v3711_v27, %v8401_v4 }
0x108d   :  { %v4180_v61 = vmul.f32 -1.442695, %v3714_v52 }
0x108f   :  { %5513 = vpow2.f32 %v4180_v61 }
0x1099   :  { %v5514_v1 = vpop.eup %5513 }
0x109a   :  { %v3718_v30 = vadd.f32 1.0, %v5514_v1 }
0x109c   :  { %5515 = vrcp.f32 %v3718_v30 }
0x10a6   :  { %v5516_v48 = vpop.eup %5515 }
0x10a7   :  { %v3732_v42 = vsub.f32 1.0, %v5516_v48  ;;  %v3739_v26 = vmul.f32 %v5516_v48, %v3639_v21 }
0x10fd   :  { %v3723_v25 = vpop.permute.xlu0 %3722 }
0x10fe   :  { %v3725_v14 = vmul.f32 %v5516_v48, %v3723_v25 }
0x1100   :  { %3727 = vrot.lane.b32.xlu1 %v3725_v14, %s5563_s1 }
0x1172   :  { %v3728_v40 = vpop.permute.xlu1 %3727 }
0x1173   :  { %v3730_v55 = vadd.f32 %v3728_v40, %v8401_v4 }
0x1175   :  { %5517 = vtanh.f32 %v3730_v55 }
0x117f   :  { %v5518_v31 = vpop.eup %5517 }
0x1180   :  { %3734 = vrot.lane.b32.xlu0 %v5518_v31, %s5565_s15 }
0x11f2   :  { %v3735_v33 = vpop.permute.xlu0 %3734 }
0x11f3   :  { %v3737_v39 = vmul.f32 %v3735_v33, %v3732_v42 }
0x11f5   :  { %v3740_v2 = vadd.f32 %v3739_v26, %v3737_v39  ;;  %v4059_v26 = vld [vmem:[%s8551_s11 + $0x8] sm:$0xff]  ;;  %v4060_v39 = vld [vmem:[%s8551_s11 + $0x10] sm:$0xff] }
0x11f7   :  { %3742 = vrot.lane.b32.xlu1 %v3740_v2, %s5565_s15  ;;  %v3842_v22 = vrot.slane %v3740_v2, 6 }
0x1269   :  { %v3743_v62 = vpop.permute.xlu1 %3742 }
0x126a   :  { %5229 = vmatmul.mubr.msk.f32.vlgmr.msra.gmra.mrb[128].mxu1 %vm3221_vm10, %v3743_v62  ;;  %v4061_v62 = vld [vmem:[%s8551_s11 + $0x18] sm:$0xff] }
0x126b   :  { %5446 = vmatpush3.bf16.msra.mxu1 %v8373_v57  ;;  %5239 = vmatprep.mubr.msk.f32.mxu1 %vm5571_vm9, %v5572_v11 }
0x126c   :  { %5447 = vmatprep.subr.bf16.mxu1 %v5570_v12 }
0x126f   :  { %5449 = vmatpush3.bf16.msra.mxu1 %v8384_v19 }
0x1270   :  { %5450 = vmatprep.subr.bf16.mxu1 %v5570_v12 }
0x133d   :  { %v3812_v36 = vpop.f32.mrb[128].mxu1 }
0x133e   :  { %v3813_v53 = vadd.f32 %v8406_v0, %v3812_v36  ;;  %v5230_v32 = vpop.f32.mrb[129].mxu1 }
0x1340   :  { %v3817_v54 = vrot.slane %v3813_v53, 6 }
0x1342   :  { %3826 = vrot.lane.b32.xlu0 %v3817_v54, %s5563_s1  ;;  %v3819_v13 = vadd.f32 %v3817_v54, %v8401_v4 }
0x1344   :  { %v4182_v58 = vmul.f32 -1.442695, %v3819_v13 }
0x1346   :  { %5519 = vpow2.f32 %v4182_v58 }
0x1350   :  { %v5520_v15 = vpop.eup %5519 }
0x1351   :  { %v3823_v46 = vadd.f32 1.0, %v5520_v15 }
0x1353   :  { %5521 = vrcp.f32 %v3823_v46 }
0x135d   :  { %v5522_v28 = vpop.eup %5521 }
0x135e   :  { %v3836_v59 = vsub.f32 1.0, %v5522_v28  ;;  %v3844_v20 = vmul.f32 %v5522_v28, %v3842_v22 }
0x13b4   :  { %v3827_v50 = vpop.permute.xlu0 %3826 }
0x13b5   :  { %v3829_v24 = vmul.f32 %v5522_v28, %v3827_v50 }
0x13b7   :  { %3831 = vrot.lane.b32.xlu1 %v3829_v24, %s5563_s1 }
0x1429   :  { %v3832_v45 = vpop.permute.xlu1 %3831 }
0x142a   :  { %v3834_v18 = vadd.f32 %v3832_v45, %v8401_v4 }
0x142c   :  { %5523 = vtanh.f32 %v3834_v18 }
0x1436   :  { %v5524_v60 = vpop.eup %5523 }
0x1437   :  { %3838 = vrot.lane.b32.xlu0 %v5524_v60, %s5565_s15 }
0x14a9   :  { %v3839_v17 = vpop.permute.xlu0 %3838 }
0x14aa   :  { %v3841_v41 = vmul.f32 %v3839_v17, %v3836_v59 }
0x14ac   :  { %v3845_v23 = vadd.f32 %v3844_v20, %v3841_v41 }
0x14ae   :  { %v3847_v34 = vrot.slane %v3845_v23, 2  ;;  %v3948_v56 = vrot.slane %v3845_v23, 6 }
0x14b0   :  { %3848 = vrot.lane.b32.xlu1 %v3847_v34, %s5565_s15 }
0x1522   :  { %v3849_v9 = vpop.permute.xlu1 %3848 }
0x1523   :  { %5240 = vmatmul.mubr.msk.f32.vlgmr.msra.gmra.mrb[130].mxu1 %vm3221_vm10, %v3849_v9 }
0x1524   :  { %5452 = vmatpush3.bf16.msra.mxu1 %v8373_v57  ;;  %5250 = vmatprep.mubr.msk.f32.mxu1 %vm5571_vm9, %v5572_v11 }
0x1525   :  { %5453 = vmatprep.subr.bf16.mxu1 %v5570_v12 }
0x1528   :  { %5455 = vmatpush3.bf16.msra.mxu1 %v8384_v19 }
0x1529   :  { %5456 = vmatprep.subr.bf16.mxu1 %v5570_v12 }
0x15f6   :  { %v3918_v10 = vpop.f32.mrb[130].mxu1 }
0x15f7   :  { %v3919_v7 = vadd.f32 %v8406_v0, %v3918_v10  ;;  %v5241_v47 = vpop.f32.mrb[131].mxu1 }
0x15f9   :  { %v3923_v3 = vrot.slane %v3919_v7, 4 }
0x15fb   :  { %3932 = vrot.lane.b32.xlu0 %v3923_v3, %s5563_s1  ;;  %v3925_v5 = vadd.f32 %v3923_v3, %v8401_v4 }
0x15fd   :  { %v4184_v35 = vmul.f32 -1.442695, %v3925_v5 }
0x15ff   :  { %5525 = vpow2.f32 %v4184_v35 }
0x1609   :  { %v5526_v57 = vpop.eup %5525 }
0x160a   :  { %v3929_v29 = vadd.f32 1.0, %v5526_v57 }
0x160c   :  { %5527 = vrcp.f32 %v3929_v29 }
0x1616   :  { %v5528_v37 = vpop.eup %5527 }
0x1617   :  { %v3942_v49 = vsub.f32 1.0, %v5528_v37  ;;  %v3950_v21 = vmul.f32 %v5528_v37, %v3948_v56 }
0x166d   :  { %v3933_v63 = vpop.permute.xlu0 %3932 }
0x166e   :  { %v3935_v8 = vmul.f32 %v5528_v37, %v3933_v63 }
0x1670   :  { %3937 = vrot.lane.b32.xlu1 %v3935_v8, %s5563_s1 }
0x16e2   :  { %v3938_v19 = vpop.permute.xlu1 %3937 }
0x16e3   :  { %v3940_v6 = vadd.f32 %v3938_v19, %v8401_v4 }
0x16e5   :  { %5529 = vtanh.f32 %v3940_v6 }
0x16ef   :  { %v5530_v51 = vpop.eup %5529 }
0x16f0   :  { %3944 = vrot.lane.b32.xlu0 %v5530_v51, %s5565_s15 }
0x1762   :  { %v3945_v16 = vpop.permute.xlu0 %3944 }
0x1763   :  { %v3947_v44 = vmul.f32 %v3945_v16, %v3942_v49 }
0x1765   :  { %v3951_v38 = vadd.f32 %v3950_v21, %v3947_v44 }
0x1767   :  { %v3953_v27 = vrot.slane %v3951_v38, 4  ;;  %v4054_v53 = vrot.slane %v3951_v38, 6 }
0x1769   :  { %3954 = vrot.lane.b32.xlu1 %v3953_v27, %s5565_s15 }
0x17db   :  { %v3955_v43 = vpop.permute.xlu1 %3954 }
0x17dc   :  { %5251 = vmatmul.mubr.msk.f32.vlgmr.msra.gmra.mrb[132].mxu1 %vm3221_vm10, %v3955_v43 }
0x17dd   :  { %5261 = vmatprep.mubr.msk.f32.mxu1 %vm5571_vm9, %v5572_v11 }
0x18af   :  { %v4024_v52 = vpop.f32.mrb[132].mxu1 }
0x18b0   :  { %v4025_v61 = vadd.f32 %v8406_v0, %v4024_v52  ;;  %v5252_v1 = vpop.f32.mrb[133].mxu1  ;;  %v4058_v0 = vld [vmem:[%s8551_s11] sm:$0xff] }
0x18b1   :  { %v5457_v2 = vpack.c.bf16 %v4059_v26, %v4058_v0 }
0x18b2   :  { %v4029_v30 = vrot.slane %v4025_v61, 2 }
0x18b3   :  { %5458 = vmatpush3.bf16.msra.mxu1 %v5457_v2 }
0x18b4   :  { %4038 = vrot.lane.b32.xlu0 %v4029_v30, %s5563_s1  ;;  %v4031_v48 = vadd.f32 %v4029_v30, %v8401_v4  ;;  %5459 = vmatprep.subr.bf16.mxu1 %v5570_v12  ;;  %v4187_v12 = vld [vmem:[%s8552_s12] ss:$0 sm:$0xff] }
0x18b6   :  { %v4186_v25 = vmul.f32 -1.442695, %v4031_v48 }
0x18b8   :  { %5531 = vpow2.f32 %v4186_v25 }
0x18c2   :  { %v5532_v14 = vpop.eup %5531 }
0x18c3   :  { %v4035_v40 = vadd.f32 1.0, %v5532_v14 }
0x18c5   :  { %5533 = vrcp.f32 %v4035_v40 }
0x18cf   :  { %v5534_v55 = vpop.eup %5533 }
0x18d0   :  { %v4048_v32 = vsub.f32 1.0, %v5534_v55  ;;  %v4056_v13 = vmul.f32 %v5534_v55, %v4054_v53 }
0x1926   :  { %v4039_v31 = vpop.permute.xlu0 %4038 }
0x1927   :  { %v4041_v42 = vmul.f32 %v5534_v55, %v4039_v31 }
0x1929   :  { %4043 = vrot.lane.b32.xlu1 %v4041_v42, %s5563_s1 }
0x199b   :  { %v4044_v11 = vpop.permute.xlu1 %4043 }
0x199c   :  { %v4046_v33 = vadd.f32 %v4044_v11, %v8401_v4  ;;  %v5460_v4 = vpack.c.bf16 %v4061_v62, %v4060_v39 }
0x199e   :  { %5535 = vtanh.f32 %v4046_v33  ;;  %5461 = vmatpush3.bf16.msra.mxu1 %v5460_v4 }
0x19a8   :  { %v5536_v36 = vpop.eup %5535 }
0x19a9   :  { %4050 = vrot.lane.b32.xlu0 %v5536_v36, %s5565_s15 }
0x1a1b   :  { %v4051_v54 = vpop.permute.xlu0 %4050 }
0x1a1c   :  { %v4053_v58 = vmul.f32 %v4051_v54, %v4048_v32 }
0x1a1e   :  { %v4057_v15 = vadd.f32 %v4056_v13, %v4053_v58 }
0x1a20   :  { %v4070_v46 = vrot.slane %v4057_v15, 6 }
0x1a22   :  { %4071 = vrot.lane.b32.xlu1 %v4070_v46, %s5565_s15 }
0x1a94   :  { %v4072_v28 = vpop.permute.xlu1 %4071 }
0x1a95   :  { %5262 = vmatmul.mubr.msk.f32.vlgmr.msra.gmra.mrb[134].mxu1 %vm3221_vm10, %v4072_v28 }
0x1b68   :  { %v4141_v50 = vpop.f32.mrb[134].mxu1 }
0x1b69   :  { %v4142_v24 = vadd.f32 %v4187_v12, %v4141_v50  ;;  %v5263_v45 = vpop.f32.mrb[135].mxu1 }
0x1b6b   :  { %4146 = vst.msk [vmem:[#allocation3] sm:$0x3] %vm4145_vm11, %v4142_v24 }
0x1b6c   :  { %5550 = shalt.err (!%p5547_p4)
}
0x1b6d   :  { %s5551_s23 = scalar_lea.hbm %s8553_s13, 32 }
0x1b6e   :  { %p5552_p5 = scmp.ne.s32.totalorder %s8553_s13, %s5551_s23  ;;  %p5555_p6 = scmp.lt.u32.totalorder %s5551_s23, %s8553_s13 }
0x1b70   :  { %p5557_p7 = pnand %p5555_p6, %p5552_p5 }
0x1b72   :  { %5560 = shalt.err (!%p5557_p7)
}
0x1b73   :  { %4156 = dma.vmem_to_hbm [thread:$0]  %s4154_s21, 32, %s8553_s13, [#allocation4]  }
0x1b74   :  { %5561 = dma.done.wait [#allocation4], 32  }
0x1b75   :  { %5562 = vsyncadd [#allocation4], 4294967264 }
0x1b76   :  { %4160 = vsyncpa [#allocation4], 1 }

</bundles_post_ra>
